<compile_context>
chip_gen: v7x
topology: tpu7x:2x2x1
jax: 0.10.0
libtpu: 0.0.40
codegen_flags: <defaults>
</compile_context>

<pallas_src>
import numpy as np
import jax
import jax.numpy as jnp
from jax.experimental import pallas as pl
from jax.experimental.pallas import tpu as pltpu

B = 2
L = 64            # must be a multiple of 32 so AdaptiveAvgPool1d(8) bins are equal
NUM_CLASSES = 4


# ---------------------------------------------------------------------------
# Pallas kernel
# ---------------------------------------------------------------------------
def _conv1d_relu(xp, w, b, K, lout):
    """'valid' conv on a pre-padded input via a single im2col matmul + bias + ReLU.

    xp: (B, lout + K - 1, Cin); w: (K*Cin, Cout); b: (1, Cout) -> (B, lout, Cout).
    """
    bb, _, cin = xp.shape
    cout = w.shape[-1]
    cols = [xp[:, k:k + lout, :] for k in range(K)]            # K shifted views
    slab = jnp.concatenate(cols, axis=-1).reshape(bb * lout, K * cin)
    y = jnp.dot(slab, w, preferred_element_type=jnp.float32) + b
    return jnp.maximum(y, 0.0).reshape(bb, lout, cout)


def _maxpool2(x):
    bb, l, c = x.shape
    return x.reshape(bb, l // 2, 2, c).max(axis=2)


def classifier_kernel(xpad_ref, wconv_ref, bias_ref, wl1_ref, wl2_ref,
                      out_ref, pad2_ref, pad3_ref):
    l1 = xpad_ref.shape[1] - 6                                 # original L
    l2, l3 = l1 // 2, l1 // 4
    bias = bias_ref[...]                                       # (5, 128)

    # conv1 (K=7, 2->16) + ReLU + MaxPool1d(2)
    x = xpad_ref[...].astype(jnp.float32)                      # (B, L+6, 2)
    h = _conv1d_relu(x, wconv_ref[0][:14, :16], bias[0:1, :16], 7, l1)
    h = _maxpool2(h)                                           # (B, L/2, 16)

    # conv2 (K=5, 16->32): stage through a pre-zeroed padded scratch buffer.
    pad2_ref[...] = jnp.zeros_like(pad2_ref)
    pad2_ref[:, 2:2 + l2, :] = h
    h = _conv1d_relu(pad2_ref[...], wconv_ref[1][:80, :32], bias[1:2, :32], 5, l2)
    h = _maxpool2(h)                                           # (B, L/4, 32)

    # conv3 (K=3, 32->64)
    pad3_ref[...] = jnp.zeros_like(pad3_ref)
    pad3_ref[:, 1:1 + l3, :] = h
    h = _conv1d_relu(pad3_ref[...], wconv_ref[2][:96, :64], bias[2:3, :64], 3, l3)

    # AdaptiveAvgPool1d(8): L/4 is a multiple of 8 -> equal-size bins.
    bb, l, c = h.shape
    h = h.reshape(bb, 8, l // 8, c).mean(axis=2)               # (B, 8, 64)

    # Flatten (pos-major / channel-minor; wl1 rows re-ordered to match in glue)
    # + Linear(512 -> 128) as a single matmul + ReLU.
    hf = h.reshape(bb, 8 * c)                                  # (B, 512)
    f = jnp.dot(hf, wl1_ref[...], preferred_element_type=jnp.float32)
    f = jnp.maximum(f + bias[3:4, :], 0.0)                     # (B, 128)

    out = jnp.dot(f, wl2_ref[...], preferred_element_type=jnp.float32)
    out_ref[...] = (out + bias[4:5, :out_ref.shape[-1]]).astype(out_ref.dtype)


# ---------------------------------------------------------------------------
# Wrapper (glue: layout permutations, packing, pallas_call)
# ---------------------------------------------------------------------------
def interference_classifier(x_ncl, params_pt):
    """x_ncl: (B, 2, L) float32 in PyTorch NCL layout; params in PyTorch shapes."""
    w1, b1, w2, b2, w3, b3, wl1, bl1, wl2, bl2 = params_pt
    bb, _, ln = x_ncl.shape
    assert ln % 32 == 0, "AdaptiveAvgPool1d(8) emulation needs L % 32 == 0"

    x = jnp.transpose(x_ncl, (0, 2, 1))                        # (B, L, 2) channels-last
    xpad = jnp.pad(x, ((0, 0), (3, 3), (0, 0)))                # conv1 'same' padding

    def conv_w(w):                                             # (Cout,Cin,K) -> (K*Cin,Cout)
        co, ci, k = w.shape
        return jnp.transpose(w, (2, 1, 0)).reshape(k * ci, co)

    # Pack the three conv weights into one buffer (fewer DMA descriptors).
    wconv = jnp.zeros((3, 96, 64), jnp.float32)
    wconv = wconv.at[0, :14, :16].set(conv_w(w1))
    wconv = wconv.at[1, :80, :32].set(conv_w(w2))
    wconv = wconv.at[2, :96, :64].set(conv_w(w3))

    # Pack all five biases into one (5, 128) buffer.
    bias = jnp.zeros((5, 128), jnp.float32)
    bias = bias.at[0, :16].set(b1).at[1, :32].set(b2).at[2, :64].set(b3)
    bias = bias.at[3, :128].set(bl1).at[4, :NUM_CLASSES].set(bl2)

    # fc1 (128, 512): PyTorch flatten is channel-major (f = c*8 + pos); the
    # in-kernel flatten is pos-major (f = pos*64 + c) -> permute rows to match.
    wl1k = jnp.transpose(wl1.reshape(128, 64, 8), (2, 1, 0)).reshape(8 * 64, 128)
    wl2k = jnp.transpose(wl2, (1, 0))                          # (128, 4)

    args = (xpad, wconv, bias, wl1k, wl2k)
    vmem = pl.BlockSpec(memory_space=pltpu.MemorySpace.VMEM)
    return pl.pallas_call(
        classifier_kernel,
        out_shape=jax.ShapeDtypeStruct((bb, NUM_CLASSES), jnp.float32),
        in_specs=[vmem] * len(args),
        out_specs=vmem,
        scratch_shapes=[pltpu.VMEM((bb, ln // 2 + 4, 16), jnp.float32),  # conv2 padded input
                        pltpu.VMEM((bb, ln // 4 + 2, 32), jnp.float32)],  # conv3 padded input
    )(*args)


# ---------------------------------------------------------------------------
# Pure-JAX reference (PyTorch semantics) for verification
# ---------------------------------------------------------------------------
def reference_forward(x_ncl, params_pt):
    w1, b1, w2, b2, w3, b3, wl1, bl1, wl2, bl2 = params_pt

    def conv_relu(x, w, b, pad):
        y = jax.lax.conv_general_dilated(
            x, w, window_strides=(1,), padding=[(pad, pad)],
            dimension_numbers=("NCH", "OIH", "NCH"))
        return jax.nn.relu(y + b[None, :, None])

    def maxpool2(x):
        n, c, l = x.shape
        return x.reshape(n, c, l // 2, 2).max(axis=3)

    h = maxpool2(conv_relu(x_ncl, w1, b1, 3))
    h = maxpool2(conv_relu(h, w2, b2, 2))
    h = conv_relu(h, w3, b3, 1)
    n, c, l = h.shape
    h = h.reshape(n, c, 8, l // 8).mean(axis=3)                # AdaptiveAvgPool1d(8)
    f = h.reshape(n, -1)                                       # channel-major flatten
    f = jax.nn.relu(f @ wl1.T + bl1)
    return f @ wl2.T + bl2


# ---------------------------------------------------------------------------
def init_params(key):
    ks = jax.random.split(key, 10)
    s = 0.1
    w1 = s * jax.random.normal(ks[0], (16, 2, 7), jnp.float32)
    b1 = s * jax.random.normal(ks[1], (16,), jnp.float32)
    w2 = s * jax.random.normal(ks[2], (32, 16, 5), jnp.float32)
    b2 = s * jax.random.normal(ks[3], (32,), jnp.float32)
    w3 = s * jax.random.normal(ks[4], (64, 32, 3), jnp.float32)
    b3 = s * jax.random.normal(ks[5], (64,), jnp.float32)
    wl1 = s * jax.random.normal(ks[6], (128, 64 * 8), jnp.float32)
    bl1 = s * jax.random.normal(ks[7], (128,), jnp.float32)
    wl2 = s * jax.random.normal(ks[8], (4, 128), jnp.float32)
    bl2 = s * jax.random.normal(ks[9], (4,), jnp.float32)
    return (w1, b1, w2, b2, w3, b3, wl1, bl1, wl2, bl2)


if __name__ == "__main__":
    key = jax.random.PRNGKey(0)
    k_x, k_p = jax.random.split(key)
    x = jax.random.normal(k_x, (B, 2, L), jnp.float32)         # PyTorch NCL input
    params = init_params(k_p)

    out = jax.block_until_ready(interference_classifier(x, params))
    ref = jax.block_until_ready(reference_forward(x, params))

    assert out.shape == (B, NUM_CLASSES), out.shape
    assert np.all(np.isfinite(np.asarray(out)))
    np.testing.assert_allclose(np.asarray(out), np.asarray(ref),
                               rtol=1e-2, atol=1e-2)
    print("KERNEL_OK")
</pallas_src>

<mosaic_0001>
module attributes {stable_mosaic.version = 11 : i64} {
  func.func @classifier_kernel(%arg0: memref<2x70x2xf32, #tpu.memory_space<vmem>>, %arg1: memref<3x96x64xf32, #tpu.memory_space<vmem>>, %arg2: memref<5x128xf32, #tpu.memory_space<vmem>>, %arg3: memref<512x128xf32, #tpu.memory_space<vmem>>, %arg4: memref<128x4xf32, #tpu.memory_space<vmem>>, %arg5: memref<2x4xf32, #tpu.memory_space<vmem>>, %arg6: memref<2x36x16xf32, #tpu.memory_space<vmem>>, %arg7: memref<2x18x32xf32, #tpu.memory_space<vmem>>) attributes {dimension_semantics = [], scalar_prefetch = 0 : i64, scratch_operands = 2 : i64, tpu.core_type = #tpu.core_type<tc>} {
    %c0 = arith.constant 0 : index
    %c0_0 = arith.constant 0 : index
    %0 = vector.load %arg2[%c0, %c0_0] : memref<5x128xf32, #tpu.memory_space<vmem>>, vector<5x128xf32>
    %c0_1 = arith.constant 0 : index
    %c0_2 = arith.constant 0 : index
    %c0_3 = arith.constant 0 : index
    %1 = vector.load %arg0[%c0_1, %c0_2, %c0_3] : memref<2x70x2xf32, #tpu.memory_space<vmem>>, vector<2x70x2xf32>
    %c0_4 = arith.constant 0 : index
    %c0_5 = arith.constant 0 : index
    %c0_6 = arith.constant 0 : index
    %2 = vector.load %arg1[%c0_4, %c0_5, %c0_6] : memref<3x96x64xf32, #tpu.memory_space<vmem>>, vector<1x96x64xf32>
    %3 = vector.shape_cast %2 : vector<1x96x64xf32> to vector<96x64xf32>
    %4 = vector.extract_strided_slice %3 {offsets = [0, 0], sizes = [14, 16], strides = [1, 1]} : vector<96x64xf32> to vector<14x16xf32>
    %5 = vector.extract_strided_slice %0 {offsets = [0, 0], sizes = [1, 16], strides = [1, 1]} : vector<5x128xf32> to vector<1x16xf32>
    %6 = vector.extract_strided_slice %1 {offsets = [0, 0, 0], sizes = [2, 64, 2], strides = [1, 1, 1]} : vector<2x70x2xf32> to vector<2x64x2xf32>
    %7 = vector.extract_strided_slice %1 {offsets = [0, 1, 0], sizes = [2, 64, 2], strides = [1, 1, 1]} : vector<2x70x2xf32> to vector<2x64x2xf32>
    %8 = vector.extract_strided_slice %1 {offsets = [0, 2, 0], sizes = [2, 64, 2], strides = [1, 1, 1]} : vector<2x70x2xf32> to vector<2x64x2xf32>
    %9 = vector.extract_strided_slice %1 {offsets = [0, 3, 0], sizes = [2, 64, 2], strides = [1, 1, 1]} : vector<2x70x2xf32> to vector<2x64x2xf32>
    %10 = vector.extract_strided_slice %1 {offsets = [0, 4, 0], sizes = [2, 64, 2], strides = [1, 1, 1]} : vector<2x70x2xf32> to vector<2x64x2xf32>
    %11 = vector.extract_strided_slice %1 {offsets = [0, 5, 0], sizes = [2, 64, 2], strides = [1, 1, 1]} : vector<2x70x2xf32> to vector<2x64x2xf32>
    %12 = vector.extract_strided_slice %1 {offsets = [0, 6, 0], sizes = [2, 64, 2], strides = [1, 1, 1]} : vector<2x70x2xf32> to vector<2x64x2xf32>
    %13 = tpu.concatenate %6, %7, %8, %9, %10, %11, %12 in 2 : vector<2x64x2xf32>, vector<2x64x2xf32>, vector<2x64x2xf32>, vector<2x64x2xf32>, vector<2x64x2xf32>, vector<2x64x2xf32>, vector<2x64x2xf32> -> vector<2x64x14xf32>
    %14 = vector.shape_cast %13 : vector<2x64x14xf32> to vector<128x14xf32>
    %cst = arith.constant dense<0.000000e+00> : vector<128x16xf32>
    %15 = tpu.matmul %14, %4, %cst {dimension_numbers = #tpu.dot_dimension_numbers<[1], [0], [0], [1], [0, 0, 1, 1], [], []>} : vector<128x14xf32>, vector<14x16xf32>, vector<128x16xf32> -> vector<128x16xf32>
    %16 = vector.broadcast %5 : vector<1x16xf32> to vector<128x16xf32>
    %17 = arith.addf %15, %16 : vector<128x16xf32>
    %cst_7 = arith.constant 0.000000e+00 : f32
    %18 = vector.broadcast %cst_7 : f32 to vector<128x16xf32>
    %19 = arith.maximumf %17, %18 : vector<128x16xf32>
    %20 = vector.shape_cast %19 : vector<128x16xf32> to vector<2x64x16xf32>
    %21 = vector.shape_cast %20 : vector<2x64x16xf32> to vector<2x32x2x16xf32>
    %cst_8 = arith.constant dense<0xFF800000> : vector<2x32x16xf32>
    %22 = vector.multi_reduction <maximumf>, %21, %cst_8 [2] : vector<2x32x2x16xf32> to vector<2x32x16xf32>
    %cst_9 = arith.constant 0.000000e+00 : f32
    %23 = vector.broadcast %cst_9 : f32 to vector<2x36x16xf32>
    %c0_10 = arith.constant 0 : index
    %c0_11 = arith.constant 0 : index
    %c0_12 = arith.constant 0 : index
    %24 = vector.load %arg6[%c0_10, %c0_11, %c0_12] : memref<2x36x16xf32, #tpu.memory_space<vmem>>, vector<2x36x16xf32>
    tpu.vector_store %arg6[%c0_10, %c0_11, %c0_12], %23 {strides = array<i32>} : memref<2x36x16xf32, #tpu.memory_space<vmem>>, vector<2x36x16xf32>,
    %c0_13 = arith.constant 0 : index
    %c2 = arith.constant 2 : index
    %c0_14 = arith.constant 0 : index
    %25 = vector.load %arg6[%c0_13, %c2, %c0_14] : memref<2x36x16xf32, #tpu.memory_space<vmem>>, vector<2x32x16xf32>
    tpu.vector_store %arg6[%c0_13, %c2, %c0_14], %22 {strides = array<i32>} : memref<2x36x16xf32, #tpu.memory_space<vmem>>, vector<2x32x16xf32>,
    %c0_15 = arith.constant 0 : index
    %c0_16 = arith.constant 0 : index
    %c0_17 = arith.constant 0 : index
    %26 = vector.load %arg6[%c0_15, %c0_16, %c0_17] : memref<2x36x16xf32, #tpu.memory_space<vmem>>, vector<2x36x16xf32>
    %c1 = arith.constant 1 : index
    %c0_18 = arith.constant 0 : index
    %c0_19 = arith.constant 0 : index
    %27 = vector.load %arg1[%c1, %c0_18, %c0_19] : memref<3x96x64xf32, #tpu.memory_space<vmem>>, vector<1x96x64xf32>
    %28 = vector.shape_cast %27 : vector<1x96x64xf32> to vector<96x64xf32>
    %29 = vector.extract_strided_slice %28 {offsets = [0, 0], sizes = [80, 32], strides = [1, 1]} : vector<96x64xf32> to vector<80x32xf32>
    %30 = vector.extract_strided_slice %0 {offsets = [1, 0], sizes = [1, 32], strides = [1, 1]} : vector<5x128xf32> to vector<1x32xf32>
    %31 = vector.extract_strided_slice %26 {offsets = [0, 0, 0], sizes = [2, 32, 16], strides = [1, 1, 1]} : vector<2x36x16xf32> to vector<2x32x16xf32>
    %32 = vector.extract_strided_slice %26 {offsets = [0, 1, 0], sizes = [2, 32, 16], strides = [1, 1, 1]} : vector<2x36x16xf32> to vector<2x32x16xf32>
    %33 = vector.extract_strided_slice %26 {offsets = [0, 2, 0], sizes = [2, 32, 16], strides = [1, 1, 1]} : vector<2x36x16xf32> to vector<2x32x16xf32>
    %34 = vector.extract_strided_slice %26 {offsets = [0, 3, 0], sizes = [2, 32, 16], strides = [1, 1, 1]} : vector<2x36x16xf32> to vector<2x32x16xf32>
    %35 = vector.extract_strided_slice %26 {offsets = [0, 4, 0], sizes = [2, 32, 16], strides = [1, 1, 1]} : vector<2x36x16xf32> to vector<2x32x16xf32>
    %36 = tpu.concatenate %31, %32, %33, %34, %35 in 2 : vector<2x32x16xf32>, vector<2x32x16xf32>, vector<2x32x16xf32>, vector<2x32x16xf32>, vector<2x32x16xf32> -> vector<2x32x80xf32>
    %37 = vector.shape_cast %36 : vector<2x32x80xf32> to vector<64x80xf32>
    %cst_20 = arith.constant dense<0.000000e+00> : vector<64x32xf32>
    %38 = tpu.matmul %37, %29, %cst_20 {dimension_numbers = #tpu.dot_dimension_numbers<[1], [0], [0], [1], [0, 0, 1, 1], [], []>} : vector<64x80xf32>, vector<80x32xf32>, vector<64x32xf32> -> vector<64x32xf32>
    %39 = vector.broadcast %30 : vector<1x32xf32> to vector<64x32xf32>
    %40 = arith.addf %38, %39 : vector<64x32xf32>
    %cst_21 = arith.constant 0.000000e+00 : f32
    %41 = vector.broadcast %cst_21 : f32 to vector<64x32xf32>
    %42 = arith.maximumf %40, %41 : vector<64x32xf32>
    %43 = vector.shape_cast %42 : vector<64x32xf32> to vector<2x32x32xf32>
    %44 = vector.shape_cast %43 : vector<2x32x32xf32> to vector<2x16x2x32xf32>
    %cst_22 = arith.constant dense<0xFF800000> : vector<2x16x32xf32>
    %45 = vector.multi_reduction <maximumf>, %44, %cst_22 [2] : vector<2x16x2x32xf32> to vector<2x16x32xf32>
    %cst_23 = arith.constant 0.000000e+00 : f32
    %46 = vector.broadcast %cst_23 : f32 to vector<2x18x32xf32>
    %c0_24 = arith.constant 0 : index
    %c0_25 = arith.constant 0 : index
    %c0_26 = arith.constant 0 : index
    %47 = vector.load %arg7[%c0_24, %c0_25, %c0_26] : memref<2x18x32xf32, #tpu.memory_space<vmem>>, vector<2x18x32xf32>
    tpu.vector_store %arg7[%c0_24, %c0_25, %c0_26], %46 {strides = array<i32>} : memref<2x18x32xf32, #tpu.memory_space<vmem>>, vector<2x18x32xf32>,
    %c0_27 = arith.constant 0 : index
    %c1_28 = arith.constant 1 : index
    %c0_29 = arith.constant 0 : index
    %48 = vector.load %arg7[%c0_27, %c1_28, %c0_29] : memref<2x18x32xf32, #tpu.memory_space<vmem>>, vector<2x16x32xf32>
    tpu.vector_store %arg7[%c0_27, %c1_28, %c0_29], %45 {strides = array<i32>} : memref<2x18x32xf32, #tpu.memory_space<vmem>>, vector<2x16x32xf32>,
    %c0_30 = arith.constant 0 : index
    %c0_31 = arith.constant 0 : index
    %c0_32 = arith.constant 0 : index
    %49 = vector.load %arg7[%c0_30, %c0_31, %c0_32] : memref<2x18x32xf32, #tpu.memory_space<vmem>>, vector<2x18x32xf32>
    %c2_33 = arith.constant 2 : index
    %c0_34 = arith.constant 0 : index
    %c0_35 = arith.constant 0 : index
    %50 = vector.load %arg1[%c2_33, %c0_34, %c0_35] : memref<3x96x64xf32, #tpu.memory_space<vmem>>, vector<1x96x64xf32>
    %51 = vector.shape_cast %50 : vector<1x96x64xf32> to vector<96x64xf32>
    %52 = vector.extract_strided_slice %0 {offsets = [2, 0], sizes = [1, 64], strides = [1, 1]} : vector<5x128xf32> to vector<1x64xf32>
    %53 = vector.extract_strided_slice %49 {offsets = [0, 0, 0], sizes = [2, 16, 32], strides = [1, 1, 1]} : vector<2x18x32xf32> to vector<2x16x32xf32>
    %54 = vector.extract_strided_slice %49 {offsets = [0, 1, 0], sizes = [2, 16, 32], strides = [1, 1, 1]} : vector<2x18x32xf32> to vector<2x16x32xf32>
    %55 = vector.extract_strided_slice %49 {offsets = [0, 2, 0], sizes = [2, 16, 32], strides = [1, 1, 1]} : vector<2x18x32xf32> to vector<2x16x32xf32>
    %56 = tpu.concatenate %53, %54, %55 in 2 : vector<2x16x32xf32>, vector<2x16x32xf32>, vector<2x16x32xf32> -> vector<2x16x96xf32>
    %57 = vector.shape_cast %56 : vector<2x16x96xf32> to vector<32x96xf32>
    %cst_36 = arith.constant dense<0.000000e+00> : vector<32x64xf32>
    %58 = tpu.matmul %57, %51, %cst_36 {dimension_numbers = #tpu.dot_dimension_numbers<[1], [0], [0], [1], [0, 0, 1, 1], [], []>} : vector<32x96xf32>, vector<96x64xf32>, vector<32x64xf32> -> vector<32x64xf32>
    %59 = vector.broadcast %52 : vector<1x64xf32> to vector<32x64xf32>
    %60 = arith.addf %58, %59 : vector<32x64xf32>
    %cst_37 = arith.constant 0.000000e+00 : f32
    %61 = vector.broadcast %cst_37 : f32 to vector<32x64xf32>
    %62 = arith.maximumf %60, %61 : vector<32x64xf32>
    %63 = vector.shape_cast %62 : vector<32x64xf32> to vector<2x16x64xf32>
    %64 = vector.shape_cast %63 : vector<2x16x64xf32> to vector<2x8x2x64xf32>
    %cst_38 = arith.constant dense<0.000000e+00> : vector<2x8x64xf32>
    %65 = vector.multi_reduction <add>, %64, %cst_38 [2] : vector<2x8x2x64xf32> to vector<2x8x64xf32>
    %cst_39 = arith.constant 2.000000e+00 : f32
    %66 = vector.broadcast %cst_39 : f32 to vector<2x8x64xf32>
    %67 = arith.divf %65, %66 : vector<2x8x64xf32>
    %68 = vector.shape_cast %67 : vector<2x8x64xf32> to vector<2x512xf32>
    %c0_40 = arith.constant 0 : index
    %c0_41 = arith.constant 0 : index
    %69 = vector.load %arg3[%c0_40, %c0_41] : memref<512x128xf32, #tpu.memory_space<vmem>>, vector<512x128xf32>
    %cst_42 = arith.constant dense<0.000000e+00> : vector<2x128xf32>
    %70 = tpu.matmul %68, %69, %cst_42 {dimension_numbers = #tpu.dot_dimension_numbers<[1], [0], [0], [1], [0, 0, 1, 1], [], []>} : vector<2x512xf32>, vector<512x128xf32>, vector<2x128xf32> -> vector<2x128xf32>
    %71 = vector.extract_strided_slice %0 {offsets = [3, 0], sizes = [1, 128], strides = [1, 1]} : vector<5x128xf32> to vector<1x128xf32>
    %72 = vector.broadcast %71 : vector<1x128xf32> to vector<2x128xf32>
    %73 = arith.addf %70, %72 : vector<2x128xf32>
    %cst_43 = arith.constant 0.000000e+00 : f32
    %74 = vector.broadcast %cst_43 : f32 to vector<2x128xf32>
    %75 = arith.maximumf %73, %74 : vector<2x128xf32>
    %c0_44 = arith.constant 0 : index
    %c0_45 = arith.constant 0 : index
    %76 = vector.load %arg4[%c0_44, %c0_45] : memref<128x4xf32, #tpu.memory_space<vmem>>, vector<128x4xf32>
    %cst_46 = arith.constant dense<0.000000e+00> : vector<2x4xf32>
    %77 = tpu.matmul %75, %76, %cst_46 {dimension_numbers = #tpu.dot_dimension_numbers<[1], [0], [0], [1], [0, 0, 1, 1], [], []>} : vector<2x128xf32>, vector<128x4xf32>, vector<2x4xf32> -> vector<2x4xf32>
    %78 = vector.extract_strided_slice %0 {offsets = [4, 0], sizes = [1, 4], strides = [1, 1]} : vector<5x128xf32> to vector<1x4xf32>
    %79 = vector.broadcast %78 : vector<1x4xf32> to vector<2x4xf32>
    %80 = arith.addf %77, %79 : vector<2x4xf32>
    %c0_47 = arith.constant 0 : index
    %c0_48 = arith.constant 0 : index
    %81 = vector.load %arg5[%c0_47, %c0_48] : memref<2x4xf32, #tpu.memory_space<vmem>>, vector<2x4xf32>
    tpu.vector_store %arg5[%c0_47, %c0_48], %80 {strides = array<i32>} : memref<2x4xf32, #tpu.memory_space<vmem>>, vector<2x4xf32>,
    return
  }
}

</mosaic_0001>

<bundles_post_ra>
// kernel: tpu_custom_call.1
= control target key start
LH: loop header
LB: loop body
LE: loop exit
PB: predicated region body
PF: predicated region fallthrough
CT: control target
= control target key end

     0   :  { %vm143_vm0 = vcmask 1045504   ;;  %vm60_vm1 = vcmask 1046528   ;;  %s4026_s24 = smov 4   ;;  %s4027_s25 = smov 2   ;;  %vm226_vm2 = vcmask 1044480   ;;  %s5587_s0 = inlined_call_operand.vmem [shape: f32[2,70,2], index: 0, kind: input, shape index: {}]   ;;  %s5588_s1 = inlined_call_operand.vmem [shape: f32[3,96,64], index: 1, kind: input, shape index: {}]   ;;  %s5589_s2 = inlined_call_operand.vmem [shape: f32[5,128], index: 2, kind: input, shape index: {}]   ;;  %s5590_s3 = inlined_call_operand.vmem [shape: f32[512,128], index: 3, kind: input, shape index: {}]   ;;  %s5591_s4 = inlined_call_operand.vmem [shape: f32[128,4], index: 4, kind: input, shape index: {}]   ;;  %s5592_s5 = inlined_call_operand.hbm [shape: f32[2,4], index: 5, kind: output, shape index: {}]  }
   0x1   :  { %v4076_v0 = vld [vmem:[%s5587_s0] sm:$0xff]  ;;  %v4081_v1 = vld [vmem:[%s5587_s0 + $0x8] sm:$0xff]  ;;  %v4090_v6 = vld [vmem:[%s5587_s0 + $0x10] sm:$0xff] }
   0x2   :  { %v144_v2 = vrot.slane %v4076_v0, 2  ;;  %v145_v3 = vrot.slane %v4081_v1, 2  ;;  %v61_v4 = vrot.slane %v4076_v0, 1  ;;  %v62_v5 = vrot.slane %v4081_v1, 1  ;;  %v4106_v16 = vld [vmem:[%s5587_s0 + $0x18] sm:$0xff] }
   0x3   :  { %v147_v7 = vrot.slane %v4090_v6, 2  ;;  %v64_v8 = vrot.slane %v4090_v6, 1  ;;  %v228_v11 = vrot.slane %v4081_v1, 3  ;;  %v230_v14 = vrot.slane %v4090_v6, 3 }
   0x4   :  { %v146_v9 = vsel %vm143_vm0, %v144_v2, %v145_v3  ;;  %v63_v10 = vsel %vm60_vm1, %v61_v4, %v62_v5  ;;  %v227_v15 = vrot.slane %v4076_v0, 3 }
   0x5   :  { %178 = vrot.lane.b32.xlu1 %v146_v9, %s4026_s24  ;;  %95 = vrot.lane.b32.xlu0 %v63_v10, %s4027_s25  ;;  %v148_v12 = vsel %vm143_vm0, %v145_v3, %v147_v7  ;;  %v65_v13 = vsel %vm60_vm1, %v62_v5, %v64_v8 }
   0x6   :  { %10 = vsyncpa [#allocation5], 0  ;;  %v66_v17 = vrot.slane %v4106_v16, 1  ;;  %v231_v18 = vsel %vm226_vm2, %v228_v11, %v230_v14  ;;  %v229_v19 = vsel %vm226_vm2, %v227_v15, %v228_v11  ;;  %v310_v20 = vrot.slane %v4076_v0, 4  ;;  %s4028_s28 = smov 6   ;;  %v4125_v27 = vld [vmem:[%s5587_s0 + $0x20] sm:$0xff] }
   0x7   :  { %v311_v21 = vrot.slane %v4081_v1, 4  ;;  %vm309_vm3 = vcmask 1043456   ;;  %v393_v24 = vrot.slane %v4076_v0, 5  ;;  %v394_v25 = vrot.slane %v4081_v1, 5  ;;  %s4029_s6 = smov 8   ;;  %s4030_s7 = smov 10  }
   0x8   :  { %v67_v22 = vsel %vm60_vm1, %v64_v8, %v66_v17  ;;  %v313_v26 = vrot.slane %v4090_v6, 4  ;;  %vm392_vm4 = vcmask 1042432   ;;  %v149_v30 = vrot.slane %v4106_v16, 2  ;;  %s4031_s8 = smov 12   ;;  %v4155_v45 = vld [vmem:[%s5587_s0 + $0x28] sm:$0xff]  ;;  %v4172_v54 = vld [vmem:[%s5587_s0 + $0x30] sm:$0xff] }
   0x9   :  { %180 = vrot.lane.b32.xlu1 %v148_v12, %s4026_s24  ;;  %97 = vrot.lane.b32.xlu0 %v65_v13, %s4027_s25  ;;  %v312_v23 = vsel %vm309_vm3, %v310_v20, %v311_v21  ;;  %v395_v28 = vsel %vm392_vm4, %v393_v24, %v394_v25  ;;  %v68_v31 = vrot.slane %v4125_v27, 1  ;;  %v476_v32 = vrot.slane %v4076_v0, 6  ;;  %v40_v55 = vld [vmem:[%s5588_s1] sm:$0xff]  ;;  %v41_v56 = vld [vmem:[%s5588_s1 + $0x8] sm:$0xff]  ;;  %s4036_s26 = smov 32   ;;  %s4037_s27 = smov 48  }
   0xa   :  { %v314_v29 = vsel %vm309_vm3, %v311_v21, %v313_v26  ;;  %v150_v33 = vsel %vm143_vm0, %v147_v7, %v149_v30  ;;  %v477_v35 = vrot.slane %v4081_v1, 6  ;;  %v396_v36 = vrot.slane %v4090_v6, 5  ;;  %v4208_v13 = vld [vmem:[%s5587_s0 + $0x38] sm:$0xff]  ;;  %s4038_s29 = smov 64  }
   0xb   :  { %v69_v34 = vsel %vm60_vm1, %v66_v17, %v68_v31  ;;  %vm475_vm5 = vcmask 1041408   ;;  %v232_v39 = vrot.slane %v4106_v16, 3  ;;  %v151_v40 = vrot.slane %v4125_v27, 2 }
   0xc   :  { %v478_v37 = vsel %vm475_vm5, %v476_v32, %v477_v35  ;;  %v397_v38 = vsel %vm392_vm4, %v394_v25, %v396_v36  ;;  %v234_v43 = vrot.slane %v4125_v27, 3  ;;  %v479_v44 = vrot.slane %v4090_v6, 6 }
   0xd   :  { %263 = vrot.lane.b32.xlu1 %v231_v18, %s4028_s28  ;;  %261 = vrot.lane.b32.xlu0 %v229_v19, %s4028_s28  ;;  %v233_v41 = vsel %vm226_vm2, %v230_v14, %v232_v39  ;;  %v152_v42 = vsel %vm143_vm0, %v149_v30, %v151_v40  ;;  %v70_v48 = vrot.slane %v4155_v45, 1  ;;  %v315_v49 = vrot.slane %v4106_v16, 4 }
   0xe   :  { %v235_v46 = vsel %vm226_vm2, %v232_v39, %v234_v43  ;;  %v480_v47 = vsel %vm475_vm5, %v477_v35, %v479_v44  ;;  %v398_v52 = vrot.slane %v4106_v16, 5  ;;  %v317_v53 = vrot.slane %v4125_v27, 4 }
   0xf   :  { %v71_v50 = vsel %vm60_vm1, %v68_v31, %v70_v48  ;;  %v316_v51 = vsel %vm309_vm3, %v313_v26, %v315_v49  ;;  %v153_v59 = vrot.slane %v4155_v45, 2  ;;  %v72_v60 = vrot.slane %v4172_v54, 1 }
  0x10   :  { %v399_v57 = vsel %vm392_vm4, %v396_v36, %v398_v52  ;;  %v318_v58 = vsel %vm309_vm3, %v315_v49, %v317_v53  ;;  %v3833_v61 = vpack.c.bf16 %v41_v56, %v40_v55  ;;  %vm4032_vm6 = vmmov 1  }
  0x11   :  { %99 = vrot.lane.b32.xlu1 %v67_v22, %s4027_s25  ;;  %344 = vrot.lane.b32.xlu0 %v312_v23, %s4029_s6  ;;  %vm3834_vm7 = vmpackc.low %vm143_vm0, %vm4032_vm6  ;;  %v154_v62 = vsel %vm143_vm0, %v151_v40, %v153_v59  ;;  %v73_v63 = vsel %vm60_vm1, %v70_v48, %v72_v60  ;;  %v481_v2 = vrot.slane %v4106_v16, 6  ;;  %v400_v3 = vrot.slane %v4125_v27, 5  ;;  %v4225_v23 = vld [vmem:[%s5587_s0 + $0x40] sm:$0x3f] }
  0x12   :  { %3835 = vmatprep.subr.msk.bf16.mxu0 %vm3834_vm7, %v3833_v61  ;;  %v236_v7 = vrot.slane %v4155_v45, 3  ;;  %v155_v8 = vrot.slane %v4172_v54, 2  ;;  %v238_v11 = vrot.slane %v4172_v54, 3  ;;  %v483_v12 = vrot.slane %v4125_v27, 6 }
  0x13   :  { %3838 = vmatpush3.bf16.msk.msra.mxu0 %vm3834_vm7, %v3833_v61  ;;  %v482_v4 = vsel %vm475_vm5, %v479_v44, %v481_v2  ;;  %v401_v5 = vsel %vm392_vm4, %v398_v52, %v400_v3  ;;  %v74_v17 = vrot.slane %v4208_v13, 1  ;;  %v319_v18 = vrot.slane %v4155_v45, 4 }
  0x14   :  { %v237_v9 = vsel %vm226_vm2, %v234_v43, %v236_v7  ;;  %v156_v10 = vsel %vm143_vm0, %v153_v59, %v155_v8  ;;  %v239_v14 = vsel %vm226_vm2, %v236_v7, %v238_v11  ;;  %v484_v15 = vsel %vm475_vm5, %v481_v2, %v483_v12 }
  0x15   :  { %427 = vrot.lane.b32.xlu1 %v395_v28, %s4030_s7  ;;  %346 = vrot.lane.b32.xlu0 %v314_v29, %s4029_s6  ;;  %v75_v19 = vsel %vm60_vm1, %v72_v60, %v74_v17  ;;  %v320_v20 = vsel %vm309_vm3, %v317_v53, %v319_v18  ;;  %v402_v21 = vrot.slane %v4155_v45, 5  ;;  %v321_v22 = vrot.slane %v4172_v54, 4  ;;  %v4277_v53 = vld [vmem:[%s5587_s0 + $0x58] sm:$0xff] }
  0x16   :  { %v157_v26 = vrot.slane %v4208_v13, 2  ;;  %v76_v28 = vrot.slane %v4225_v23, 1  ;;  %v485_v31 = vrot.slane %v4155_v45, 6  ;;  %v404_v32 = vrot.slane %v4172_v54, 5 }
  0x17   :  { %v403_v24 = vsel %vm392_vm4, %v400_v3, %v402_v21  ;;  %v322_v25 = vsel %vm309_vm3, %v319_v18, %v321_v22  ;;  %v240_v35 = vrot.slane %v4208_v13, 3  ;;  %v159_v36 = vrot.slane %v4225_v23, 2 }
  0x18   :  { %v158_v29 = vsel %vm143_vm0, %v155_v8, %v157_v26  ;;  %v77_v30 = vsel %vm60_vm1, %v74_v17, %v76_v28  ;;  %v242_v39 = vrot.slane %v4225_v23, 3  ;;  %v487_v40 = vrot.slane %v4172_v54, 6 }
  0x19   :  { %182 = vrot.lane.b32.xlu1 %v150_v33, %s4026_s24  ;;  %101 = vrot.lane.b32.xlu0 %v69_v34, %s4027_s25  ;;  %v486_v33 = vsel %vm475_vm5, %v483_v12, %v485_v31  ;;  %v405_v34 = vsel %vm392_vm4, %v402_v21, %v404_v32  ;;  %v323_v48 = vrot.slane %v4208_v13, 4  ;;  %v325_v52 = vrot.slane %v4225_v23, 4  ;;  %v4308_v12 = vld [vmem:[%s5587_s0 + $0x60] sm:$0xff] }
  0x1a   :  { %v243_v44 = vsel %vm226_vm2, %v240_v35, %v242_v39  ;;  %v81_v59 = vrot.slane %v4277_v53, 1  ;;  %v164_v7 = vrot.slane %v4277_v53, 2  ;;  %vm558_vm8 = vcmask 15360  }
  0x1b   :  { %vm575_vm9 = vcmask 31744   ;;  %vm592_vm10 = vcmask 48128   ;;  %vm609_vm11 = vcmask 64512   ;;  %vm626_vm12 = vcmask 80896  }
  0x1c   :  { %vm643_vm13 = vcmask 97280   ;;  %vm664_vm14 = vcmask 113664   ;;  %vm1678_vm15 = vcmask 130048   ;;  %vm1754_vm6 = vcmask 1041409  }
  0x1d   :  { %510 = vrot.lane.b32.xlu1 %v478_v37, %s4031_s8  ;;  %429 = vrot.lane.b32.xlu0 %v397_v38, %s4030_s7  ;;  %v241_v37 = vsel %vm226_vm2, %v238_v11, %v240_v35  ;;  %v160_v38 = vsel %vm143_vm0, %v157_v26, %v159_v36  ;;  %v491_v11 = vrot.slane %v4225_v23, 6  ;;  %v413_v35 = vrot.slane %v4277_v53, 5 }
  0x1e   :  { %vm1756_vm7 = vcmask 1042434  }
  0x21   :  { %265 = vrot.lane.b32.xlu1 %v233_v41, %s4028_s28  ;;  %184 = vrot.lane.b32.xlu0 %v152_v42, %s4026_s24  ;;  %v4254_v41 = vld [vmem:[%s5587_s0 + $0x48] sm:$0xff]  ;;  %v4259_v42 = vld [vmem:[%s5587_s0 + $0x50] sm:$0xff] }
  0x22   :  { %v78_v43 = vrot.slane %v4254_v41, 1  ;;  %v161_v55 = vrot.slane %v4254_v41, 2  ;;  %v244_v2 = vrot.slane %v4254_v41, 3  ;;  %v327_v18 = vrot.slane %v4254_v41, 4 }
  0x25   :  { %267 = vrot.lane.b32.xlu1 %v235_v46, %s4028_s28  ;;  %512 = vrot.lane.b32.xlu0 %v480_v47, %s4031_s8  ;;  %v488_v46 = vsel %vm475_vm5, %v485_v31, %v487_v40  ;;  %v79_v47 = vrot.slane %v4259_v42, 1  ;;  %v493_v31 = vrot.slane %v4254_v41, 6 }
  0x27   :  { %v80_v49 = vsel %vm60_vm1, %v78_v43, %v79_v47  ;;  %v82_v61 = vsel %vm60_vm1, %v79_v47, %v81_v59 }
  0x29   :  { %103 = vrot.lane.b32.xlu1 %v71_v50, %s4027_s25  ;;  %348 = vrot.lane.b32.xlu0 %v316_v51, %s4029_s6  ;;  %v324_v50 = vsel %vm309_vm3, %v321_v22, %v323_v48  ;;  %v406_v51 = vrot.slane %v4208_v13, 5 }
  0x2b   :  { %v407_v56 = vsel %vm392_vm4, %v404_v32, %v406_v51 }
  0x2d   :  { %431 = vrot.lane.b32.xlu1 %v399_v57, %s4030_s7  ;;  %350 = vrot.lane.b32.xlu0 %v318_v58, %s4029_s6  ;;  %v326_v57 = vsel %vm309_vm3, %v323_v48, %v325_v52  ;;  %v162_v58 = vrot.slane %v4259_v42, 2 }
  0x2f   :  { %v163_v60 = vsel %vm143_vm0, %v161_v55, %v162_v58  ;;  %v4359_v55 = vld [vmem:[%s5587_s0 + $0x70] sm:$0xff] }
  0x31   :  { %186 = vrot.lane.b32.xlu1 %v154_v62, %s4026_s24  ;;  %105 = vrot.lane.b32.xlu0 %v73_v63, %s4027_s25  ;;  %v489_v62 = vrot.slane %v4208_v13, 6  ;;  %v408_v63 = vrot.slane %v4225_v23, 5  ;;  %v411_v23 = vrot.slane %v4259_v42, 5 }
  0x33   :  { %v490_v3 = vsel %vm475_vm5, %v487_v40, %v489_v62  ;;  %v492_v17 = vsel %vm475_vm5, %v489_v62, %v491_v11  ;;  %v414_v39 = vsel %vm392_vm4, %v411_v23, %v413_v35  ;;  %v249_v40 = vrot.slane %v4308_v12, 3 }
  0x35   :  { %514 = vrot.lane.b32.xlu1 %v482_v4, %s4031_s8  ;;  %433 = vrot.lane.b32.xlu0 %v401_v5, %s4030_s7  ;;  %v409_v4 = vsel %vm392_vm4, %v406_v51, %v408_v63  ;;  %v245_v5 = vrot.slane %v4259_v42, 3 }
  0x37   :  { %v246_v8 = vsel %vm226_vm2, %v244_v2, %v245_v5  ;;  %v415_v2 = vrot.slane %v4308_v12, 5 }
  0x39   :  { %269 = vrot.lane.b32.xlu1 %v237_v9, %s4028_s28  ;;  %188 = vrot.lane.b32.xlu0 %v156_v10, %s4026_s24  ;;  %v165_v9 = vsel %vm143_vm0, %v162_v58, %v164_v7  ;;  %v247_v10 = vrot.slane %v4277_v53, 3  ;;  %v87_v58 = vrot.slane %v4359_v55, 1 }
  0x3b   :  { %v250_v47 = vsel %vm226_vm2, %v247_v10, %v249_v40 }
  0x3d   :  { %271 = vrot.lane.b32.xlu1 %v239_v14, %s4028_s28  ;;  %516 = vrot.lane.b32.xlu0 %v484_v15, %s4031_s8  ;;  %v83_v14 = vrot.slane %v4308_v12, 1  ;;  %v248_v15 = vsel %vm226_vm2, %v245_v5, %v247_v10  ;;  %v416_v10 = vsel %vm392_vm4, %v413_v35, %v415_v2 }
  0x3f   :  { %v84_v21 = vsel %vm60_vm1, %v81_v59, %v83_v14  ;;  %v332_v59 = vrot.slane %v4308_v12, 4 }
  0x41   :  { %107 = vrot.lane.b32.xlu1 %v75_v19, %s4027_s25  ;;  %352 = vrot.lane.b32.xlu0 %v320_v20, %s4029_s6  ;;  %v328_v19 = vrot.slane %v4259_v42, 4  ;;  %v410_v20 = vrot.slane %v4254_v41, 5 }
  0x43   :  { %v329_v22 = vsel %vm309_vm3, %v327_v18, %v328_v19  ;;  %v412_v26 = vsel %vm392_vm4, %v410_v20, %v411_v23 }
  0x45   :  { %435 = vrot.lane.b32.xlu1 %v403_v24, %s4030_s7  ;;  %354 = vrot.lane.b32.xlu0 %v322_v25, %s4029_s6  ;;  %v330_v24 = vrot.slane %v4277_v53, 4  ;;  %v4327_v25 = vld [vmem:[%s5587_s0 + $0x68] sm:$0xff] }
  0x46   :  { %v168_v43 = vrot.slane %v4327_v25, 2  ;;  %v417_v23 = vrot.slane %v4327_v25, 5 }
  0x47   :  { %v331_v28 = vsel %vm309_vm3, %v328_v19, %v330_v24  ;;  %v333_v63 = vsel %vm309_vm3, %v330_v24, %v332_v59 }
  0x49   :  { %190 = vrot.lane.b32.xlu1 %v158_v29, %s4026_s24  ;;  %109 = vrot.lane.b32.xlu0 %v77_v30, %s4027_s25  ;;  %v166_v29 = vrot.slane %v4308_v12, 2  ;;  %v85_v30 = vrot.slane %v4327_v25, 1 }
  0x4b   :  { %v167_v32 = vsel %vm143_vm0, %v164_v7, %v166_v29  ;;  %v169_v48 = vsel %vm143_vm0, %v166_v29, %v168_v43  ;;  %v88_v62 = vsel %vm60_vm1, %v85_v30, %v87_v58  ;;  %v4380_v7 = vld [vmem:[%s5587_s0 + $0x78] sm:$0xff] }
  0x4d   :  { %518 = vrot.lane.b32.xlu1 %v486_v33, %s4031_s8  ;;  %437 = vrot.lane.b32.xlu0 %v405_v34, %s4030_s7  ;;  %v86_v33 = vsel %vm60_vm1, %v83_v14, %v85_v30  ;;  %v494_v34 = vrot.slane %v4259_v42, 6  ;;  %v89_v14 = vrot.slane %v4380_v7, 1 }
  0x51   :  { %273 = vrot.lane.b32.xlu1 %v241_v37, %s4028_s28  ;;  %192 = vrot.lane.b32.xlu0 %v160_v38, %s4026_s24  ;;  %v495_v38 = vsel %vm475_vm5, %v493_v31, %v494_v34 }
  0x55   :  { %275 = vrot.lane.b32.xlu1 %v243_v44, %s4028_s28  ;;  %520 = vrot.lane.b32.xlu0 %v488_v46, %s4031_s8 }
  0x59   :  { %111 = vrot.lane.b32.xlu1 %v80_v49, %s4027_s25  ;;  %356 = vrot.lane.b32.xlu0 %v324_v50, %s4029_s6  ;;  %v251_v49 = vrot.slane %v4327_v25, 3  ;;  %v496_v50 = vrot.slane %v4277_v53, 6 }
  0x5d   :  { %439 = vrot.lane.b32.xlu1 %v407_v56, %s4030_s7  ;;  %358 = vrot.lane.b32.xlu0 %v326_v57, %s4029_s6  ;;  %v252_v56 = vsel %vm226_vm2, %v249_v40, %v251_v49  ;;  %v497_v57 = vsel %vm475_vm5, %v494_v34, %v496_v50  ;;  %v172_v34 = vrot.slane %v4380_v7, 2 }
  0x61   :  { %194 = vrot.lane.b32.xlu1 %v163_v60, %s4026_s24  ;;  %113 = vrot.lane.b32.xlu0 %v82_v61, %s4027_s25 }
  0x65   :  { %522 = vrot.lane.b32.xlu1 %v490_v3, %s4031_s8  ;;  %441 = vrot.lane.b32.xlu0 %v409_v4, %s4030_s7  ;;  %v334_v3 = vrot.slane %v4327_v25, 4 }
  0x67   :  { %v335_v11 = vsel %vm309_vm3, %v332_v59, %v334_v3 }
  0x69   :  { %277 = vrot.lane.b32.xlu1 %v246_v8, %s4028_s28  ;;  %196 = vrot.lane.b32.xlu0 %v165_v9, %s4026_s24  ;;  %v170_v9 = vrot.slane %v4359_v55, 2 }
  0x6b   :  { %v171_v19 = vsel %vm143_vm0, %v168_v43, %v170_v9  ;;  %v173_v43 = vsel %vm143_vm0, %v170_v9, %v172_v34 }
  0x6d   :  { %279 = vrot.lane.b32.xlu1 %v248_v15, %s4028_s28  ;;  %524 = vrot.lane.b32.xlu0 %v492_v17, %s4031_s8 }
  0x71   :  { %115 = vrot.lane.b32.xlu1 %v84_v21, %s4027_s25  ;;  %360 = vrot.lane.b32.xlu0 %v329_v22, %s4029_s6  ;;  %v90_v21 = vsel %vm60_vm1, %v87_v58, %v89_v14  ;;  %v498_v22 = vrot.slane %v4308_v12, 6 }
  0x73   :  { %v499_v31 = vsel %vm475_vm5, %v496_v50, %v498_v22  ;;  %v4434_v50 = vld [vmem:[%s5587_s0 + $0x80] sm:$0xff] }
  0x75   :  { %443 = vrot.lane.b32.xlu1 %v412_v26, %s4030_s7  ;;  %362 = vrot.lane.b32.xlu0 %v331_v28, %s4029_s6 }
  0x77   :  { %v179_v36 = vpop.permute.xlu1 %178  ;;  %v96_v37 = vpop.permute.xlu0 %95 }
  0x78   :  { %v559_v8 = vsel %vm558_vm8, %v4076_v0, %v96_v37 }
  0x79   :  { %198 = vrot.lane.b32.xlu1 %v167_v32, %s4026_s24  ;;  %117 = vrot.lane.b32.xlu0 %v86_v33, %s4027_s25  ;;  %v576_v17 = vsel %vm575_vm9, %v559_v8, %v179_v36  ;;  %v418_v32 = vsel %vm392_vm4, %v415_v2, %v417_v23  ;;  %v253_v33 = vrot.slane %v4359_v55, 3  ;;  %v338_v2 = vrot.slane %v4380_v7, 4  ;;  %v4459_v8 = vld [vmem:[%s5587_s0 + $0x88] sm:$0x3f] }
  0x7b   :  { %v4348_v44 = vpop.permute.xlu1 %180  ;;  %v98_v46 = vpop.permute.xlu0 %97  ;;  %v254_v40 = vsel %vm226_vm2, %v251_v49, %v253_v33 }
  0x7c   :  { %v560_v30 = vsel %vm558_vm8, %v4081_v1, %v98_v46  ;;  %v500_v46 = vrot.slane %v4327_v25, 6 }
  0x7d   :  { %526 = vrot.lane.b32.xlu1 %v495_v38, %s4031_s8  ;;  %445 = vrot.lane.b32.xlu0 %v414_v39, %s4030_s7  ;;  %v577_v1 = vsel %vm575_vm9, %v560_v30, %v4348_v44  ;;  %v255_v38 = vrot.slane %v4380_v7, 3 }
  0x7f   :  { %v264_v51 = vpop.permute.xlu1 %263  ;;  %v262_v52 = vpop.permute.xlu0 %261  ;;  %v256_v49 = vsel %vm226_vm2, %v253_v33, %v255_v38 }
  0x80   :  { %v593_v18 = vsel %vm592_vm10, %v576_v17, %v262_v52  ;;  %v594_v37 = vsel %vm592_vm10, %v577_v1, %v264_v51  ;;  %v501_v52 = vsel %vm475_vm5, %v498_v22, %v500_v46 }
  0x81   :  { %281 = vrot.lane.b32.xlu1 %v250_v47, %s4028_s28  ;;  %200 = vrot.lane.b32.xlu0 %v169_v48, %s4026_s24 }
  0x83   :  { %v4369_v60 = vpop.permute.xlu1 %99  ;;  %v345_v61 = vpop.permute.xlu0 %344 }
  0x84   :  { %v610_v20 = vsel %vm609_vm11, %v593_v18, %v345_v61 }
  0x85   :  { %283 = vrot.lane.b32.xlu1 %v252_v56, %s4028_s28  ;;  %528 = vrot.lane.b32.xlu0 %v497_v57, %s4031_s8  ;;  %v91_v56 = vrot.slane %v4434_v50, 1  ;;  %v336_v57 = vrot.slane %v4359_v55, 4 }
  0x87   :  { %v428_v4 = vpop.permute.xlu1 %427  ;;  %v347_v5 = vpop.permute.xlu0 %346  ;;  %v92_v61 = vsel %vm60_vm1, %v89_v14, %v91_v56  ;;  %v561_v14 = vsel %vm558_vm8, %v4090_v6, %v4369_v60  ;;  %v421_v60 = vrot.slane %v4380_v7, 5 }
  0x88   :  { %v627_v24 = vsel %vm626_vm12, %v610_v20, %v428_v4  ;;  %v611_v39 = vsel %vm609_vm11, %v594_v37, %v347_v5 }
  0x89   :  { %119 = vrot.lane.b32.xlu1 %v88_v62, %s4027_s25  ;;  %364 = vrot.lane.b32.xlu0 %v333_v63, %s4029_s6  ;;  %v337_v62 = vsel %vm309_vm3, %v334_v3, %v336_v57  ;;  %v419_v63 = vrot.slane %v4359_v55, 5  ;;  %v174_v3 = vrot.slane %v4434_v50, 2 }
  0x8b   :  { %v4392_v15 = vpop.permute.xlu1 %182  ;;  %v4394_v0 = vpop.permute.xlu0 %101  ;;  %v420_v9 = vsel %vm392_vm4, %v417_v23, %v419_v63  ;;  %v175_v23 = vsel %vm143_vm0, %v172_v34, %v174_v3 }
  0x8c   :  { %v562_v33 = vsel %vm558_vm8, %v4106_v16, %v4394_v0  ;;  %v259_v16 = vrot.slane %v4459_v8, 3  ;;  %v504_v0 = vrot.slane %v4380_v7, 6 }
  0x8d   :  { %447 = vrot.lane.b32.xlu1 %v416_v10, %s4030_s7  ;;  %366 = vrot.lane.b32.xlu0 %v335_v11, %s4029_s6  ;;  %v339_v10 = vsel %vm309_vm3, %v336_v57, %v338_v2  ;;  %v93_v11 = vrot.slane %v4459_v8, 1 }
  0x8f   :  { %v511_v26 = vpop.permute.xlu1 %510  ;;  %v430_v28 = vpop.permute.xlu0 %429  ;;  %v94_v6 = vsel %vm60_vm1, %v91_v56, %v93_v11 }
  0x90   :  { %v644_v29 = vsel %vm643_vm13, %v627_v24, %v511_v26  ;;  %v628_v44 = vsel %vm626_vm12, %v611_v39, %v430_v28 }
  0x91   :  { %202 = vrot.lane.b32.xlu1 %v171_v19, %s4026_s24  ;;  %121 = vrot.lane.b32.xlu0 %v90_v21, %s4027_s25  ;;  %v578_v19 = vsel %vm575_vm9, %v561_v14, %v4392_v15  ;;  %v502_v21 = vrot.slane %v4359_v55, 6 }
  0x92   :  { %3712 = vmatprep.mubr.msk.f32.mxu0 %vm664_vm14, %v644_v29  ;;  %v257_v29 = vrot.slane %v4434_v50, 3 }
  0x93   :  { %v266_v35 = vpop.permute.xlu1 %265  ;;  %v4416_v36 = vpop.permute.xlu0 %184  ;;  %v503_v30 = vsel %vm475_vm5, %v500_v46, %v502_v21 }
  0x94   :  { %v595_v20 = vsel %vm592_vm10, %v578_v19, %v266_v35  ;;  %v579_v1 = vsel %vm575_vm9, %v562_v33, %v4416_v36  ;;  %v258_v39 = vsel %vm226_vm2, %v255_v38, %v257_v29  ;;  %v260_v38 = vsel %vm226_vm2, %v257_v29, %v259_v16 }
  0x95   :  { %530 = vrot.lane.b32.xlu1 %v499_v31, %s4031_s8  ;;  %449 = vrot.lane.b32.xlu0 %v418_v32, %s4030_s7  ;;  %v422_v31 = vsel %vm392_vm4, %v419_v63, %v421_v60  ;;  %v176_v32 = vrot.slane %v4459_v8, 2 }
  0x97   :  { %v268_v47 = vpop.permute.xlu1 %267  ;;  %v513_v48 = vpop.permute.xlu0 %512 }
  0x98   :  { %v645_v51 = vsel %vm643_vm13, %v628_v44, %v513_v48  ;;  %v596_v37 = vsel %vm592_vm10, %v579_v1, %v268_v47  ;;  %v505_v48 = vsel %vm475_vm5, %v502_v21, %v504_v0 }
  0x99   :  { %285 = vrot.lane.b32.xlu1 %v254_v40, %s4028_s28  ;;  %204 = vrot.lane.b32.xlu0 %v173_v43, %s4026_s24  ;;  %v177_v43 = vsel %vm143_vm0, %v174_v3, %v176_v32  ;;  %v508_v3 = vrot.slane %v4459_v8, 6 }
  0x9a   :  { %3713 = vmatmul.mubr.msk.f32.vlgmr.msra.gmra.mrb[0].mxu0 %vm664_vm14, %v645_v51  ;;  %v340_v51 = vrot.slane %v4434_v50, 4 }
  0x9b   :  { %v4446_v58 = vpop.permute.xlu1 %103  ;;  %v349_v59 = vpop.permute.xlu0 %348 }
  0x9c   :  { %v612_v22 = vsel %vm609_vm11, %v595_v20, %v349_v59  ;;  %v341_v59 = vsel %vm309_vm3, %v338_v2, %v340_v51  ;;  %v563_v2 = vsel %vm558_vm8, %v4125_v27, %v4446_v58 }
  0x9d   :  { %287 = vrot.lane.b32.xlu1 %v256_v49, %s4028_s28  ;;  %532 = vrot.lane.b32.xlu0 %v501_v52, %s4031_s8  ;;  %v342_v49 = vrot.slane %v4459_v8, 4 }
  0x9f   :  { %v432_v4 = vpop.permute.xlu1 %431  ;;  %v351_v5 = vpop.permute.xlu0 %350  ;;  %v343_v57 = vsel %vm309_vm3, %v340_v51, %v342_v49 }
  0xa0   :  { %v629_v24 = vsel %vm626_vm12, %v612_v22, %v432_v4  ;;  %v613_v40 = vsel %vm609_vm11, %v596_v37, %v351_v5 }
  0xa1   :  { %123 = vrot.lane.b32.xlu1 %v92_v61, %s4027_s25  ;;  %368 = vrot.lane.b32.xlu0 %v337_v62, %s4029_s6  ;;  %v423_v61 = vrot.slane %v4434_v50, 5  ;;  %v425_v62 = vrot.slane %v4459_v8, 5 }
  0xa3   :  { %v4470_v17 = vpop.permute.xlu1 %186  ;;  %v4472_v18 = vpop.permute.xlu0 %105  ;;  %v426_v5 = vsel %vm392_vm4, %v423_v61, %v425_v62 }
  0xa4   :  { %v580_v19 = vsel %vm575_vm9, %v563_v2, %v4470_v17  ;;  %v564_v17 = vsel %vm558_vm8, %v4155_v45, %v4472_v18 }
  0xa5   :  { %451 = vrot.lane.b32.xlu1 %v420_v9, %s4030_s7  ;;  %370 = vrot.lane.b32.xlu0 %v339_v10, %s4029_s6  ;;  %v424_v9 = vsel %vm392_vm4, %v421_v60, %v423_v61  ;;  %v506_v10 = vrot.slane %v4434_v50, 6  ;;  %vm1683_vm4 = vcmask 125952  }
  0xa7   :  { %v515_v26 = vpop.permute.xlu1 %514  ;;  %v434_v15 = vpop.permute.xlu0 %433  ;;  %v509_v22 = vsel %vm475_vm5, %v506_v10, %v508_v3  ;;  %v507_v8 = vsel %vm475_vm5, %v504_v0, %v506_v10  ;;  %vm1229_vm5 = vcmask 123904  }
  0xa8   :  { %v646_v28 = vsel %vm643_vm13, %v629_v24, %v515_v26  ;;  %v630_v36 = vsel %vm626_vm12, %v613_v40, %v434_v15 }
  0xa9   :  { %206 = vrot.lane.b32.xlu1 %v175_v23, %s4026_s24  ;;  %125 = vrot.lane.b32.xlu0 %v94_v6, %s4027_s25  ;;  %s4035_s25 = smov 16  }
  0xaa   :  { %3715 = vmatprep.mubr.msk.f32.mxu0 %vm664_vm14, %v646_v28 }
  0xab   :  { %v270_v34 = vpop.permute.xlu1 %269  ;;  %v189_v35 = vpop.permute.xlu0 %188 }
  0xac   :  { %v597_v20 = vsel %vm592_vm10, %v580_v19, %v270_v34  ;;  %v581_v26 = vsel %vm575_vm9, %v564_v17, %v189_v35 }
  0xad   :  { %534 = vrot.lane.b32.xlu1 %v503_v30, %s4031_s8  ;;  %453 = vrot.lane.b32.xlu0 %v422_v31, %s4030_s7 }
  0xaf   :  { %v272_v46 = vpop.permute.xlu1 %271  ;;  %v517_v44 = vpop.permute.xlu0 %516 }
  0xb0   :  { %v647_v47 = vsel %vm643_vm13, %v630_v36, %v517_v44  ;;  %v598_v15 = vsel %vm592_vm10, %v581_v26, %v272_v46 }
  0xb1   :  { %289 = vrot.lane.b32.xlu1 %v258_v39, %s4028_s28  ;;  %208 = vrot.lane.b32.xlu0 %v177_v43, %s4026_s24 }
  0xb2   :  { %3716 = vmatmul.mubr.msk.f32.gmra.mrb[2].mxu0 %vm664_vm14, %v647_v47 }
  0xb3   :  { %v108_v52 = vpop.permute.xlu1 %107  ;;  %v353_v56 = vpop.permute.xlu0 %352 }
  0xb4   :  { %v614_v21 = vsel %vm609_vm11, %v597_v20, %v353_v56  ;;  %v565_v18 = vsel %vm558_vm8, %v4172_v54, %v108_v52 }
  0xb5   :  { %291 = vrot.lane.b32.xlu1 %v260_v38, %s4028_s28  ;;  %536 = vrot.lane.b32.xlu0 %v505_v48, %s4031_s8 }
  0xb7   :  { %v436_v63 = vpop.permute.xlu1 %435  ;;  %v355_v4 = vpop.permute.xlu0 %354 }
  0xb8   :  { %v631_v23 = vsel %vm626_vm12, %v614_v21, %v436_v63  ;;  %v615_v28 = vsel %vm609_vm11, %v598_v15, %v355_v4 }
  0xb9   :  { %374 = vrot.lane.b32.xlu1 %v343_v57, %s4029_s6  ;;  %372 = vrot.lane.b32.xlu0 %v341_v59, %s4029_s6 }
  0xbb   :  { %v191_v11 = vpop.permute.xlu1 %190  ;;  %v110_v14 = vpop.permute.xlu0 %109 }
  0xbc   :  { %v582_v39 = vsel %vm575_vm9, %v565_v18, %v191_v11  ;;  %v566_v44 = vsel %vm558_vm8, %v4208_v13, %v110_v14 }
  0xbd   :  { %457 = vrot.lane.b32.xlu1 %v426_v5, %s4030_s7  ;;  %455 = vrot.lane.b32.xlu0 %v424_v9, %s4030_s7 }
  0xbf   :  { %v519_v27 = vpop.permute.xlu1 %518  ;;  %v438_v58 = vpop.permute.xlu0 %437 }
  0xc0   :  { %v648_v6 = vsel %vm643_vm13, %v631_v23, %v519_v27  ;;  %v632_v29 = vsel %vm626_vm12, %v615_v28, %v438_v58 }
  0xc1   :  { %540 = vrot.lane.b32.xlu1 %v509_v22, %s4031_s8  ;;  %538 = vrot.lane.b32.xlu0 %v507_v8, %s4031_s8 }
  0xc2   :  { %3718 = vmatprep.mubr.msk.f32.mxu0 %vm664_vm14, %v648_v6 }
  0xc3   :  { %v274_v60 = vpop.permute.xlu1 %273  ;;  %v193_v24 = vpop.permute.xlu0 %192 }
  0xc4   :  { %v599_v40 = vsel %vm592_vm10, %v582_v39, %v274_v60  ;;  %v583_v38 = vsel %vm575_vm9, %v566_v44, %v193_v24 }
  0xc7   :  { %v276_v30 = vpop.permute.xlu1 %275  ;;  %v521_v31 = vpop.permute.xlu0 %520 }
  0xc8   :  { %v649_v32 = vsel %vm643_vm13, %v632_v29, %v521_v31  ;;  %v600_v48 = vsel %vm592_vm10, %v583_v38, %v276_v30 }
  0xc9   :  { %3719 = vmatmul.mubr.msk.f32.gmra.mrb[4].mxu0 %vm664_vm14, %v649_v32 }
  0xcb   :  { %v112_v33 = vpop.permute.xlu1 %111  ;;  %v357_v34 = vpop.permute.xlu0 %356 }
  0xcc   :  { %v616_v43 = vsel %vm609_vm11, %v599_v40, %v357_v34  ;;  %v567_v63 = vsel %vm558_vm8, %v4254_v41, %v112_v33 }
  0xcf   :  { %v440_v1 = vpop.permute.xlu1 %439  ;;  %v359_v45 = vpop.permute.xlu0 %358 }
  0xd0   :  { %v633_v16 = vsel %vm626_vm12, %v616_v43, %v440_v1  ;;  %v617_v51 = vsel %vm609_vm11, %v600_v48, %v359_v45  ;;  %v4033_v45 = vmov 0.0  }
  0xd1   :  { %1679 = vst.msk [vmem:[#allocation2] sm:$0xff] %vm1678_vm15, %v4033_v45  ;;  %1680 = vst.msk [vmem:[#allocation2 + $0x8] sm:$0xff] %vm1678_vm15, %v4033_v45 }
  0xd2   :  { %1681 = vst.msk [vmem:[#allocation2 + $0x10] sm:$0xff] %vm1678_vm15, %v4033_v45  ;;  %1682 = vst.msk [vmem:[#allocation2 + $0x18] sm:$0xff] %vm1678_vm15, %v4033_v45 }
  0xd3   :  { %v195_v35 = vpop.permute.xlu1 %194  ;;  %v114_v37 = vpop.permute.xlu0 %113  ;;  %1685 = vst.msk [vmem:[#allocation2 + $0x28] sm:$0xff] %vm1678_vm15, %v4033_v45  ;;  %1686 = vst.msk [vmem:[#allocation2 + $0x30] sm:$0xff] %vm1678_vm15, %v4033_v45 }
  0xd4   :  { %v584_v9 = vsel %vm575_vm9, %v567_v63, %v195_v35  ;;  %v568_v20 = vsel %vm558_vm8, %v4259_v42, %v114_v37  ;;  %1687 = vst.msk [vmem:[#allocation2 + $0x38] sm:$0xff] %vm1678_vm15, %v4033_v45  ;;  %1688 = vst.msk [vmem:[#allocation2 + $0x40] sm:$0xff] %vm1678_vm15, %v4033_v45 }
  0xd5   :  { %1684 = vst.msk [vmem:[#allocation2 + $0x20] sm:$0xf] %vm1683_vm4, %v4033_v45  ;;  %1689 = vst.msk [vmem:[#allocation2 + $0x48] sm:$0xf] %vm1683_vm4, %v4033_v45  ;;  %vm2058_vm4 = vcmask 523264  }
  0xd7   :  { %v523_v0 = vpop.permute.xlu1 %522  ;;  %v442_v36 = vpop.permute.xlu0 %441 }
  0xd8   :  { %v650_v46 = vsel %vm643_vm13, %v633_v16, %v523_v0  ;;  %v634_v49 = vsel %vm626_vm12, %v617_v51, %v442_v36 }
  0xd9   :  { %3721 = vmatprep.mubr.msk.f32.mxu0 %vm664_vm14, %v650_v46 }
  0xdb   :  { %v278_v54 = vpop.permute.xlu1 %277  ;;  %v197_v47 = vpop.permute.xlu0 %196 }
  0xdc   :  { %v601_v10 = vsel %vm592_vm10, %v584_v9, %v278_v54  ;;  %v585_v22 = vsel %vm575_vm9, %v568_v20, %v197_v47 }
  0xdf   :  { %v280_v52 = vpop.permute.xlu1 %279  ;;  %v525_v56 = vpop.permute.xlu0 %524 }
  0xe0   :  { %v651_v57 = vsel %vm643_vm13, %v634_v49, %v525_v56  ;;  %v602_v8 = vsel %vm592_vm10, %v585_v22, %v280_v52 }
  0xe1   :  { %3722 = vmatmul.mubr.msk.f32.gmra.mrb[6].mxu0 %vm664_vm14, %v651_v57 }
  0xe3   :  { %v116_v59 = vpop.permute.xlu1 %115  ;;  %v361_v61 = vpop.permute.xlu0 %360 }
  0xe4   :  { %v618_v3 = vsel %vm609_vm11, %v601_v10, %v361_v61  ;;  %v569_v15 = vsel %vm558_vm8, %v4277_v53, %v116_v59 }
  0xe7   :  { %v444_v62 = vpop.permute.xlu1 %443  ;;  %v363_v13 = vpop.permute.xlu0 %362 }
  0xe8   :  { %v635_v2 = vsel %vm626_vm12, %v618_v3, %v444_v62  ;;  %v619_v23 = vsel %vm609_vm11, %v602_v8, %v363_v13 }
  0xeb   :  { %v199_v4 = vpop.permute.xlu1 %198  ;;  %v118_v5 = vpop.permute.xlu0 %117 }
  0xec   :  { %v586_v30 = vsel %vm575_vm9, %v569_v15, %v199_v4  ;;  %v570_v18 = vsel %vm558_vm8, %v4308_v12, %v118_v5 }
  0xef   :  { %v527_v11 = vpop.permute.xlu1 %526  ;;  %v446_v14 = vpop.permute.xlu0 %445 }
  0xf0   :  { %v652_v19 = vsel %vm643_vm13, %v635_v2, %v527_v11  ;;  %v636_v27 = vsel %vm626_vm12, %v619_v23, %v446_v14 }
  0xf1   :  { %3724 = vmatprep.mubr.msk.f32.mxu0 %vm664_vm14, %v652_v19 }
  0xf3   :  { %v282_v41 = vpop.permute.xlu1 %281  ;;  %v201_v21 = vpop.permute.xlu0 %200 }
  0xf4   :  { %v603_v31 = vsel %vm592_vm10, %v586_v30, %v282_v41  ;;  %v587_v39 = vsel %vm575_vm9, %v570_v18, %v201_v21 }
  0xf7   :  { %v284_v58 = vpop.permute.xlu1 %283  ;;  %v529_v6 = vpop.permute.xlu0 %528 }
  0xf8   :  { %v653_v17 = vsel %vm643_vm13, %v636_v27, %v529_v6  ;;  %v604_v40 = vsel %vm592_vm10, %v587_v39, %v284_v58 }
  0xf9   :  { %3725 = vmatmul.mubr.msk.f32.gmra.mrb[8].mxu0 %vm664_vm14, %v653_v17 }
  0xfb   :  { %v120_v60 = vpop.permute.xlu1 %119  ;;  %v365_v24 = vpop.permute.xlu0 %364 }
  0xfc   :  { %v620_v32 = vsel %vm609_vm11, %v603_v31, %v365_v24  ;;  %v571_v38 = vsel %vm558_vm8, %v4327_v25, %v120_v60  ;;  %v21_v31 = vld [vmem:[%s5589_s2] sm:$0x1f] }
  0xff   :  { %v448_v26 = vpop.permute.xlu1 %447  ;;  %v367_v42 = vpop.permute.xlu0 %366 }
 0x100   :  { %v637_v33 = vsel %vm626_vm12, %v620_v32, %v448_v26  ;;  %v621_v43 = vsel %vm609_vm11, %v604_v40, %v367_v42  ;;  %v660_v42 = vlaneseq }
 0x102   :  { %v4652_v15 = vshrl.u32 %v660_v42, 7 }
 0x103   :  { %v203_v28 = vpop.permute.xlu1 %202  ;;  %v122_v29 = vpop.permute.xlu0 %121 }
 0x104   :  { %v588_v49 = vsel %vm575_vm9, %v571_v38, %v203_v28  ;;  %v572_v13 = vsel %vm558_vm8, %v4359_v55, %v122_v29  ;;  %v662_v28 = vsub.s32 0, %v4652_v15  ;;  %v4034_v29 = vmov 1983009808  }
 0x105   :  { %v895_v30 = vunpack.c.l.s4 %v4034_v29 }
 0x106   :  { %v4658_v32 = vrot.slane %v21_v31, %v662_v28 }
 0x107   :  { %v531_v34 = vpop.permute.xlu1 %530  ;;  %v450_v1 = vpop.permute.xlu0 %449 }
 0x108   :  { %v654_v53 = vsel %vm643_vm13, %v637_v33, %v531_v34  ;;  %v638_v16 = vsel %vm626_vm12, %v621_v43, %v450_v1  ;;  %v896_v33 = vunpack.c.0.s8 %v895_v30 }
 0x109   :  { %3727 = vmatprep.mubr.msk.f32.mxu0 %vm664_vm14, %v654_v53 }
 0x10a   :  { %v4662_v53 = vsub.s32 %v896_v33, %v4652_v15 }
 0x10b   :  { %v286_v35 = vpop.permute.xlu1 %285  ;;  %v205_v37 = vpop.permute.xlu0 %204 }
 0x10c   :  { %v605_v52 = vsel %vm592_vm10, %v588_v49, %v286_v35  ;;  %v589_v4 = vsel %vm575_vm9, %v572_v13, %v205_v37 }
 0x10f   :  { %v288_v0 = vpop.permute.xlu1 %287  ;;  %v533_v36 = vpop.permute.xlu0 %532 }
 0x110   :  { %v655_v46 = vsel %vm643_vm13, %v638_v16, %v533_v36  ;;  %v606_v5 = vsel %vm592_vm10, %v589_v4, %v288_v0 }
 0x111   :  { %3728 = vmatmul.mubr.msk.f32.gmra.mrb[10].mxu0 %vm664_vm14, %v655_v46 }
 0x113   :  { %v124_v44 = vpop.permute.xlu1 %123  ;;  %v369_v54 = vpop.permute.xlu0 %368 }
 0x114   :  { %v622_v56 = vsel %vm609_vm11, %v605_v52, %v369_v54  ;;  %v573_v55 = vsel %vm558_vm8, %v4380_v7, %v124_v44 }
 0x117   :  { %v452_v47 = vpop.permute.xlu1 %451  ;;  %v371_v12 = vpop.permute.xlu0 %370 }
 0x118   :  { %v639_v57 = vsel %vm626_vm12, %v622_v56, %v452_v47  ;;  %v623_v9 = vsel %vm609_vm11, %v606_v5, %v371_v12 }
 0x11b   :  { %v207_v48 = vpop.permute.xlu1 %206  ;;  %v126_v51 = vpop.permute.xlu0 %125 }
 0x11c   :  { %v574_v20 = vsel %vm558_vm8, %v4434_v50, %v126_v51  ;;  %v590_v22 = vsel %vm575_vm9, %v573_v55, %v207_v48  ;;  %vm1758_vm8 = vcmask 1043459  }
 0x11f   :  { %v535_v59 = vpop.permute.xlu1 %534  ;;  %v454_v61 = vpop.permute.xlu0 %453 }
 0x120   :  { %v656_v62 = vsel %vm643_vm13, %v639_v57, %v535_v59  ;;  %v640_v10 = vsel %vm626_vm12, %v623_v9, %v454_v61 }
 0x121   :  { %3730 = vmatprep.mubr.msk.f32.mxu0 %vm664_vm14, %v656_v62 }
 0x123   :  { %v290_v25 = vpop.permute.xlu1 %289  ;;  %v209_v63 = vpop.permute.xlu0 %208 }
 0x124   :  { %v591_v8 = vsel %vm575_vm9, %v574_v20, %v209_v63  ;;  %v607_v23 = vsel %vm592_vm10, %v590_v22, %v290_v25  ;;  %vm1760_vm9 = vcmask 1044484  }
 0x127   :  { %v292_v3 = vpop.permute.xlu1 %291  ;;  %v537_v2 = vpop.permute.xlu0 %536 }
 0x128   :  { %v657_v11 = vsel %vm643_vm13, %v640_v10, %v537_v2  ;;  %v608_v27 = vsel %vm592_vm10, %v591_v8, %v292_v3  ;;  %vm1762_vm10 = vcmask 1045509  }
 0x129   :  { %3731 = vmatmul.mubr.msk.f32.gmra.mrb[12].mxu0 %vm664_vm14, %v657_v11 }
 0x12b   :  { %v375_v14 = vpop.permute.xlu1 %374  ;;  %v373_v19 = vpop.permute.xlu0 %372 }
 0x12c   :  { %v625_v58 = vsel %vm609_vm11, %v608_v27, %v375_v14  ;;  %v624_v6 = vsel %vm609_vm11, %v607_v23, %v373_v19  ;;  %vm1764_vm11 = vcmask 1046534  }
 0x12f   :  { %v458_v41 = vpop.permute.xlu1 %457  ;;  %v456_v21 = vpop.permute.xlu0 %455 }
 0x130   :  { %v642_v17 = vsel %vm626_vm12, %v625_v58, %v458_v41  ;;  %v641_v7 = vsel %vm626_vm12, %v624_v6, %v456_v21  ;;  %vm1766_vm12 = vcmask 1047559  }
 0x133   :  { %v541_v60 = vpop.permute.xlu1 %540  ;;  %v539_v50 = vpop.permute.xlu0 %538 }
 0x134   :  { %v659_v24 = vsel %vm643_vm13, %v642_v17, %v541_v60  ;;  %v658_v26 = vsel %vm643_vm13, %v641_v7, %v539_v50  ;;  %vm2040_vm13 = vcmask 261120  }
 0x135   :  { %3733 = vmatprep.mubr.msk.f32.mxu0 %vm664_vm14, %v658_v26  ;;  %2610 = vst.msk [vmem:[#allocation3] sm:$0xff] %vm2040_vm13, %v4033_v45  ;;  %2611 = vst.msk [vmem:[#allocation3 + $0x8] sm:$0xff] %vm2040_vm13, %v4033_v45 }
 0x136   :  { %3734 = vmatmul.mubr.msk.f32.gmra.mrb[14].mxu0 %vm664_vm14, %v659_v24  ;;  %2613 = vst.msk [vmem:[#allocation3 + $0x18] sm:$0xff] %vm2040_vm13, %v4033_v45  ;;  %2614 = vst.msk [vmem:[#allocation3 + $0x20] sm:$0xff] %vm2040_vm13, %v4033_v45  ;;  %vm2049_vm14 = vcmask 392192  }
 0x16d   :  { %v3714_v34 = vpop.f32.mrb[0].mxu0 }
 0x16e   :  { %v788_v1 = vadd.f32 %v3714_v34, %v4658_v32  ;;  %v782_v18 = vpop.f32.mrb[1].mxu0 }
 0x16f   :  { %v783_v35 = vadd.f32 %v782_v18, %v4658_v32 }
 0x170   :  { %v862_v37 = vmax.f32 %v788_v1, 0.0 }
 0x171   :  { %v861_v39 = vmax.f32 %v783_v35, 0.0 }
 0x172   :  { %v910_v40 = vcombine.high %v862_v37, %v862_v37  ;;  %v917_v43 = vrot.slane %v862_v37, %v4662_v53 }
 0x173   :  { %v893_v16 = vcombine.high %v861_v39, %v861_v39  ;;  %v900_v0 = vrot.slane %v861_v39, %v4662_v53 }
 0x174   :  { %v924_v36 = vrot.slane %v910_v40, %v4662_v53  ;;  %v925_v46 = vcombine.high %v917_v43, %v917_v43  ;;  %v1258_v44 = vsel %vm1229_vm5, %v917_v43, -inf }
 0x175   :  { %v1259_v54 = vrot.slane %v1258_v44, 4  ;;  %v907_v47 = vrot.slane %v893_v16, %v4662_v53  ;;  %v908_v12 = vcombine.high %v900_v0, %v900_v0  ;;  %v1230_v38 = vsel %vm1229_vm5, %v900_v0, -inf }
 0x176   :  { %v926_v48 = vcombine.high %v924_v36, %v924_v36  ;;  %v1265_v51 = vsel %vm1229_vm5, %v925_v46, -inf  ;;  %v1272_v49 = vsel %vm1229_vm5, %v924_v36, -inf  ;;  %v1231_v52 = vrot.slane %v1230_v38, 4 }
 0x177   :  { %v1260_v56 = vmax.f32 %v1258_v44, %v1259_v54  ;;  %v1266_v57 = vrot.slane %v1265_v51, 4  ;;  %v1273_v59 = vrot.slane %v1272_v49, 4  ;;  %v909_v61 = vcombine.high %v907_v47, %v907_v47 }
 0x178   :  { %v1279_v62 = vsel %vm1229_vm5, %v926_v48, -inf  ;;  %v1232_v13 = vmax.f32 %v1230_v38, %v1231_v52  ;;  %v1237_v25 = vsel %vm1229_vm5, %v908_v12, -inf  ;;  %v1244_v63 = vsel %vm1229_vm5, %v907_v47, -inf }
 0x179   :  { %v1267_v4 = vmax.f32 %v1265_v51, %v1266_v57  ;;  %v1274_v5 = vmax.f32 %v1272_v49, %v1273_v59  ;;  %v1280_v9 = vrot.slane %v1279_v62, 4  ;;  %v1238_v3 = vrot.slane %v1237_v25, 4 }
 0x17a   :  { %v1233_v10 = vrot.slane %v1232_v13, 2  ;;  %v1245_v2 = vrot.slane %v1244_v63, 4  ;;  %v1251_v11 = vsel %vm1229_vm5, %v909_v61, -inf  ;;  %v1261_v14 = vrot.slane %v1260_v56, 2 }
 0x17b   :  { %v1268_v19 = vrot.slane %v1267_v4, 2  ;;  %v1281_v55 = vmax.f32 %v1279_v62, %v1280_v9  ;;  %v1239_v41 = vmax.f32 %v1237_v25, %v1238_v3  ;;  %v1252_v22 = vrot.slane %v1251_v11, 4 }
 0x17c   :  { %v1234_v20 = vmax.f32 %v1232_v13, %v1233_v10  ;;  %v1246_v21 = vmax.f32 %v1244_v63, %v1245_v2  ;;  %v1275_v8 = vrot.slane %v1274_v5, 2  ;;  %v1262_v17 = vmax.f32 %v1260_v56, %v1261_v14 }
 0x17d   :  { %v1282_v23 = vrot.slane %v1281_v55, 2  ;;  %v1240_v27 = vrot.slane %v1239_v41, 2  ;;  %v1253_v6 = vmax.f32 %v1251_v11, %v1252_v22  ;;  %v1269_v7 = vmax.f32 %v1267_v4, %v1268_v19 }
 0x17e   :  { %v1247_v58 = vrot.slane %v1246_v21, 2  ;;  %v1235_v60 = vrot.slane %v1234_v20, 1  ;;  %v1276_v42 = vmax.f32 %v1274_v5, %v1275_v8  ;;  %v1263_v33 = vrot.slane %v1262_v17, 1 }
 0x17f   :  { %v1241_v50 = vmax.f32 %v1239_v41, %v1240_v27  ;;  %v1254_v26 = vrot.slane %v1253_v6, 2  ;;  %v1283_v28 = vmax.f32 %v1281_v55, %v1282_v23  ;;  %v1270_v34 = vrot.slane %v1269_v7, 1 }
 0x180   :  { %v1248_v24 = vmax.f32 %v1246_v21, %v1247_v58  ;;  %v1236_v1 = vmax.f32 %v1234_v20, %v1235_v60  ;;  %v1277_v39 = vrot.slane %v1276_v42, 1  ;;  %v1264_v44 = vmax.f32 %v1262_v17, %v1263_v33 }
 0x181   :  { %v1242_v29 = vrot.slane %v1241_v50, 1  ;;  %v1255_v31 = vmax.f32 %v1253_v6, %v1254_v26  ;;  %v1284_v43 = vrot.slane %v1283_v28, 1  ;;  %v1271_v12 = vmax.f32 %v1269_v7, %v1270_v34 }
 0x182   :  { %v1249_v30 = vrot.slane %v1248_v24, 1  ;;  %v1278_v51 = vmax.f32 %v1276_v42, %v1277_v39 }
 0x183   :  { %v1243_v18 = vmax.f32 %v1241_v50, %v1242_v29  ;;  %v1256_v37 = vrot.slane %v1255_v31, 1  ;;  %v1285_v56 = vmax.f32 %v1283_v28, %v1284_v43 }
 0x184   :  { %v1250_v35 = vmax.f32 %v1248_v24, %v1249_v30 }
 0x185   :  { %v3717_v40 = vpop.f32.mrb[2].mxu0  ;;  %v1257_v16 = vmax.f32 %v1255_v31, %v1256_v37  ;;  %v1755_v0 = vsel %vm1754_vm6, %v1243_v18, %v1236_v1 }
 0x186   :  { %v798_v36 = vadd.f32 %v3717_v40, %v4658_v32  ;;  %v792_v46 = vpop.f32.mrb[3].mxu0  ;;  %v1757_v54 = vsel %vm1756_vm7, %v1250_v35, %v1755_v0 }
 0x187   :  { %v793_v47 = vadd.f32 %v792_v46, %v4658_v32  ;;  %v1759_v38 = vsel %vm1758_vm8, %v1257_v16, %v1757_v54 }
 0x188   :  { %v864_v48 = vmax.f32 %v798_v36, 0.0  ;;  %v1761_v49 = vsel %vm1760_vm9, %v1264_v44, %v1759_v38 }
 0x189   :  { %v863_v52 = vmax.f32 %v793_v47, 0.0  ;;  %v1763_v57 = vsel %vm1762_vm10, %v1271_v12, %v1761_v49 }
 0x18a   :  { %v944_v59 = vcombine.high %v864_v48, %v864_v48  ;;  %v951_v61 = vrot.slane %v864_v48, %v4662_v53  ;;  %v1765_v62 = vsel %vm1764_vm11, %v1278_v51, %v1763_v57 }
 0x18b   :  { %v927_v13 = vcombine.high %v863_v52, %v863_v52  ;;  %v934_v25 = vrot.slane %v863_v52, %v4662_v53  ;;  %v1767_v63 = vsel %vm1766_vm12, %v1285_v56, %v1765_v62 }
 0x18c   :  { %v958_v4 = vrot.slane %v944_v59, %v4662_v53  ;;  %v959_v5 = vcombine.high %v951_v61, %v951_v61  ;;  %v1314_v9 = vsel %vm1229_vm5, %v951_v61, -inf  ;;  %1825 = vst.msk [vmem:[#allocation2 + $0x2] sm:$0xff] %vm1678_vm15, %v1767_v63 }
 0x18d   :  { %v1315_v10 = vrot.slane %v1314_v9, 4  ;;  %v941_v3 = vrot.slane %v927_v13, %v4662_v53  ;;  %v942_v2 = vcombine.high %v934_v25, %v934_v25  ;;  %v1286_v11 = vsel %vm1229_vm5, %v934_v25, -inf }
 0x18e   :  { %v960_v14 = vcombine.high %v958_v4, %v958_v4  ;;  %v1321_v19 = vsel %vm1229_vm5, %v959_v5, -inf  ;;  %v1328_v55 = vsel %vm1229_vm5, %v958_v4, -inf  ;;  %v1287_v20 = vrot.slane %v1286_v11, 4 }
 0x18f   :  { %v1316_v41 = vmax.f32 %v1314_v9, %v1315_v10  ;;  %v1322_v21 = vrot.slane %v1321_v19, 4  ;;  %v1329_v22 = vrot.slane %v1328_v55, 4  ;;  %v943_v8 = vcombine.high %v941_v3, %v941_v3 }
 0x190   :  { %v1335_v23 = vsel %vm1229_vm5, %v960_v14, -inf  ;;  %v1288_v27 = vmax.f32 %v1286_v11, %v1287_v20  ;;  %v1293_v58 = vsel %vm1229_vm5, %v942_v2, -inf  ;;  %v1300_v6 = vsel %vm1229_vm5, %v941_v3, -inf }
 0x191   :  { %v1323_v17 = vmax.f32 %v1321_v19, %v1322_v21  ;;  %v1330_v7 = vmax.f32 %v1328_v55, %v1329_v22  ;;  %v1336_v60 = vrot.slane %v1335_v23, 4  ;;  %v1294_v24 = vrot.slane %v1293_v58, 4 }
 0x192   :  { %v1289_v50 = vrot.slane %v1288_v27, 2  ;;  %v1301_v26 = vrot.slane %v1300_v6, 4  ;;  %v1307_v42 = vsel %vm1229_vm5, %v943_v8, -inf  ;;  %v1317_v28 = vrot.slane %v1316_v41, 2 }
 0x193   :  { %v1324_v29 = vrot.slane %v1323_v17, 2  ;;  %v1337_v30 = vmax.f32 %v1335_v23, %v1336_v60  ;;  %v1295_v33 = vmax.f32 %v1293_v58, %v1294_v24  ;;  %v1308_v1 = vrot.slane %v1307_v42, 4 }
 0x194   :  { %v1290_v31 = vmax.f32 %v1288_v27, %v1289_v50  ;;  %v1302_v34 = vmax.f32 %v1300_v6, %v1301_v26  ;;  %v1331_v18 = vrot.slane %v1330_v7, 2  ;;  %v1318_v43 = vmax.f32 %v1316_v41, %v1317_v28 }
 0x195   :  { %v1338_v35 = vrot.slane %v1337_v30, 2  ;;  %v1296_v37 = vrot.slane %v1295_v33, 2  ;;  %v1309_v40 = vmax.f32 %v1307_v42, %v1308_v1  ;;  %v1325_v16 = vmax.f32 %v1323_v17, %v1324_v29 }
 0x196   :  { %v1303_v39 = vrot.slane %v1302_v34, 2  ;;  %v1291_v0 = vrot.slane %v1290_v31, 1  ;;  %v1332_v54 = vmax.f32 %v1330_v7, %v1331_v18  ;;  %v1319_v51 = vrot.slane %v1318_v43, 1 }
 0x197   :  { %v1297_v36 = vmax.f32 %v1295_v33, %v1296_v37  ;;  %v1310_v44 = vrot.slane %v1309_v40, 2  ;;  %v1339_v47 = vmax.f32 %v1337_v30, %v1338_v35  ;;  %v1326_v49 = vrot.slane %v1325_v16, 1 }
 0x198   :  { %v1304_v46 = vmax.f32 %v1302_v34, %v1303_v39  ;;  %v1292_v52 = vmax.f32 %v1290_v31, %v1291_v0  ;;  %v1333_v62 = vrot.slane %v1332_v54, 1  ;;  %v1320_v10 = vmax.f32 %v1318_v43, %v1319_v51 }
 0x199   :  { %v1298_v12 = vrot.slane %v1297_v36, 1  ;;  %v1311_v48 = vmax.f32 %v1309_v40, %v1310_v44  ;;  %v1340_v63 = vrot.slane %v1339_v47, 1  ;;  %v1327_v11 = vmax.f32 %v1325_v16, %v1326_v49 }
 0x19a   :  { %v1305_v38 = vrot.slane %v1304_v46, 1  ;;  %v1334_v55 = vmax.f32 %v1332_v54, %v1333_v62 }
 0x19b   :  { %v1299_v56 = vmax.f32 %v1297_v36, %v1298_v12  ;;  %v1312_v59 = vrot.slane %v1311_v48, 1  ;;  %v1341_v22 = vmax.f32 %v1339_v47, %v1340_v63 }
 0x19c   :  { %v1306_v57 = vmax.f32 %v1304_v46, %v1305_v38  ;;  %v3720_v61 = vpop.f32.mrb[4].mxu0 }
 0x19d   :  { %v808_v13 = vadd.f32 %v3720_v61, %v4658_v32  ;;  %v802_v25 = vpop.f32.mrb[5].mxu0  ;;  %v1313_v4 = vmax.f32 %v1311_v48, %v1312_v59  ;;  %v1768_v5 = vsel %vm1754_vm6, %v1299_v56, %v1292_v52  ;;  %v4721_v56 = vld [vmem:[#allocation2] sm:$0xff] }
 0x19e   :  { %v803_v9 = vadd.f32 %v802_v25, %v4658_v32  ;;  %v1769_v3 = vsel %vm1756_vm7, %v1306_v57, %v1768_v5 }
 0x19f   :  { %v866_v2 = vmax.f32 %v808_v13, 0.0  ;;  %v1770_v14 = vsel %vm1758_vm8, %v1313_v4, %v1769_v3 }
 0x1a0   :  { %v865_v19 = vmax.f32 %v803_v9, 0.0  ;;  %v1771_v20 = vsel %vm1760_vm9, %v1320_v10, %v1770_v14  ;;  %v1864_v9 = vrot.slane %v4721_v56, 1  ;;  %v1906_v10 = vrot.slane %v4721_v56, 2 }
 0x1a1   :  { %v978_v41 = vcombine.high %v866_v2, %v866_v2  ;;  %v985_v21 = vrot.slane %v866_v2, %v4662_v53  ;;  %v1772_v8 = vsel %vm1762_vm10, %v1327_v11, %v1771_v20 }
 0x1a2   :  { %v961_v23 = vcombine.high %v865_v19, %v865_v19  ;;  %v968_v27 = vrot.slane %v865_v19, %v4662_v53  ;;  %v1773_v58 = vsel %vm1764_vm11, %v1334_v55, %v1772_v8 }
 0x1a3   :  { %v992_v6 = vrot.slane %v978_v41, %v4662_v53  ;;  %v993_v17 = vcombine.high %v985_v21, %v985_v21  ;;  %v1370_v7 = vsel %vm1229_vm5, %v985_v21, -inf  ;;  %v1774_v60 = vsel %vm1766_vm12, %v1341_v22, %v1773_v58 }
 0x1a4   :  { %v1371_v50 = vrot.slane %v1370_v7, 4  ;;  %v975_v24 = vrot.slane %v961_v23, %v4662_v53  ;;  %v976_v26 = vcombine.high %v968_v27, %v968_v27  ;;  %1826 = vst.msk [vmem:[#allocation2 + $0xa] sm:$0xff] %vm1678_vm15, %v1774_v60  ;;  %v1342_v30 = vsel %vm1229_vm5, %v968_v27, -inf }
 0x1a5   :  { %v994_v42 = vcombine.high %v992_v6, %v992_v6  ;;  %v1377_v28 = vsel %vm1229_vm5, %v993_v17, -inf  ;;  %v1384_v29 = vsel %vm1229_vm5, %v992_v6, -inf  ;;  %v1343_v35 = vrot.slane %v1342_v30, 4 }
 0x1a6   :  { %v1372_v31 = vmax.f32 %v1370_v7, %v1371_v50  ;;  %v1378_v33 = vrot.slane %v1377_v28, 4  ;;  %v1385_v34 = vrot.slane %v1384_v29, 4  ;;  %v977_v1 = vcombine.high %v975_v24, %v975_v24 }
 0x1a7   :  { %v1391_v18 = vsel %vm1229_vm5, %v994_v42, -inf  ;;  %v1349_v37 = vsel %vm1229_vm5, %v976_v26, -inf  ;;  %v1356_v39 = vsel %vm1229_vm5, %v975_v24, -inf  ;;  %v1344_v36 = vmax.f32 %v1342_v30, %v1343_v35  ;;  %v3535_v26 = vld [vmem:[%s5588_s1 + $0x60] sm:$0xff] }
 0x1a8   :  { %v1373_v40 = vrot.slane %v1372_v31, 2  ;;  %v1379_v43 = vmax.f32 %v1377_v28, %v1378_v33  ;;  %v1386_v16 = vmax.f32 %v1384_v29, %v1385_v34  ;;  %v1392_v0 = vrot.slane %v1391_v18, 4  ;;  %v3537_v33 = vld [vmem:[%s5588_s1 + $0x70] sm:$0xff]  ;;  %v3538_v34 = vld [vmem:[%s5588_s1 + $0x78] sm:$0xff] }
 0x1a9   :  { %v1350_v46 = vrot.slane %v1349_v37, 4  ;;  %v1357_v44 = vrot.slane %v1356_v39, 4  ;;  %v1363_v54 = vsel %vm1229_vm5, %v977_v1, -inf  ;;  %v1345_v48 = vrot.slane %v1344_v36, 2 }
 0x1aa   :  { %v1380_v47 = vrot.slane %v1379_v43, 2  ;;  %v1387_v12 = vrot.slane %v1386_v16, 2  ;;  %v1393_v38 = vmax.f32 %v1391_v18, %v1392_v0  ;;  %v1364_v52 = vrot.slane %v1363_v54, 4 }
 0x1ab   :  { %v1351_v51 = vmax.f32 %v1349_v37, %v1350_v46  ;;  %v1358_v49 = vmax.f32 %v1356_v39, %v1357_v44  ;;  %v1374_v57 = vmax.f32 %v1372_v31, %v1373_v40  ;;  %v1346_v62 = vmax.f32 %v1344_v36, %v1345_v48  ;;  %v4723_v4 = vld [vmem:[#allocation2 + $0x8] sm:$0xff] }
 0x1ac   :  { %v1381_v59 = vmax.f32 %v1379_v43, %v1380_v47  ;;  %v1394_v61 = vrot.slane %v1393_v38, 2  ;;  %v1365_v63 = vmax.f32 %v1363_v54, %v1364_v52  ;;  %v1388_v5 = vmax.f32 %v1386_v16, %v1387_v12  ;;  %v3536_v31 = vld [vmem:[%s5588_s1 + $0x68] sm:$0xff] }
 0x1ad   :  { %v1352_v13 = vrot.slane %v1351_v51, 2  ;;  %v1359_v25 = vrot.slane %v1358_v49, 2  ;;  %v1347_v3 = vrot.slane %v1346_v62, 1  ;;  %v1375_v19 = vrot.slane %v1374_v57, 1 }
 0x1ae   :  { %v1366_v14 = vrot.slane %v1365_v63, 2  ;;  %v1382_v55 = vrot.slane %v1381_v59, 1  ;;  %v1395_v20 = vmax.f32 %v1393_v38, %v1394_v61  ;;  %v1865_v41 = vrot.slane %v4723_v4, 1 }
 0x1af   :  { %v1353_v2 = vmax.f32 %v1351_v51, %v1352_v13  ;;  %v1360_v11 = vmax.f32 %v1358_v49, %v1359_v25  ;;  %v1948_v23 = vrot.slane %v4721_v56, 3  ;;  %v1389_v27 = vrot.slane %v1388_v5, 1 }
 0x1b0   :  { %v1367_v8 = vmax.f32 %v1365_v63, %v1366_v14  ;;  %v1866_v58 = vsel %vm60_vm1, %v1864_v9, %v1865_v41  ;;  %v1907_v6 = vrot.slane %v4723_v4, 2  ;;  %v1990_v17 = vrot.slane %v4721_v56, 4 }
 0x1b1   :  { %v1354_v21 = vrot.slane %v1353_v2, 1  ;;  %v1361_v22 = vrot.slane %v1360_v11, 1  ;;  %v1348_v7 = vmax.f32 %v1346_v62, %v1347_v3  ;;  %1882 = vrot.lane.b32.xlu0 %v1866_v58, %s4035_s25  ;;  %v1376_v42 = vmax.f32 %v1374_v57, %v1375_v19 }
 0x1b2   :  { %v1368_v24 = vrot.slane %v1367_v8, 1  ;;  %v1383_v28 = vmax.f32 %v1381_v59, %v1382_v55  ;;  %v1396_v29 = vrot.slane %v1395_v20, 1  ;;  %v1949_v39 = vrot.slane %v4723_v4, 3 }
 0x1b3   :  { %v1355_v60 = vmax.f32 %v1353_v2, %v1354_v21  ;;  %v1362_v50 = vmax.f32 %v1360_v11, %v1361_v22  ;;  %v1908_v43 = vsel %vm143_vm0, %v1906_v10, %v1907_v6  ;;  %v1991_v0 = vrot.slane %v4723_v4, 4 }
 0x1b4   :  { %v3723_v30 = vpop.f32.mrb[6].mxu0  ;;  %v1369_v1 = vmax.f32 %v1367_v8, %v1368_v24  ;;  %v3839_v44 = vpack.c.bf16 %v3536_v31, %v3535_v26  ;;  %v3843_v54 = vpack.c.bf16 %v3538_v34, %v3537_v33  ;;  %v1390_v47 = vmax.f32 %v1388_v5, %v1389_v27 }
 0x1b5   :  { %v1775_v18 = vsel %vm1754_vm6, %v1355_v60, %v1348_v7  ;;  %v818_v35 = vadd.f32 %v3723_v30, %v4658_v32  ;;  %v812_v37 = vpop.f32.mrb[7].mxu0  ;;  %1924 = vrot.lane.b32.xlu0 %v1908_v43, %s4036_s26  ;;  %v1397_v12 = vmax.f32 %v1395_v20, %v1396_v29  ;;  %v1950_v56 = vsel %vm226_vm2, %v1948_v23, %v1949_v39 }
 0x1b6   :  { %v1776_v40 = vsel %vm1756_vm7, %v1362_v50, %v1775_v18  ;;  %v813_v16 = vadd.f32 %v812_v37, %v4658_v32  ;;  %3840 = vmatprep.subr.bf16.mxu1 %v3839_v44  ;;  %v1992_v62 = vsel %vm309_vm3, %v1990_v17, %v1991_v0 }
 0x1b7   :  { %v1777_v36 = vsel %vm1758_vm8, %v1369_v1, %v1776_v40  ;;  %v868_v46 = vmax.f32 %v818_v35, 0.0  ;;  %3842 = vmatpush3.bf16.msra.mxu1 %v3839_v44 }
 0x1b8   :  { %v1778_v38 = vsel %vm1760_vm9, %v1376_v42, %v1777_v36  ;;  %v867_v48 = vmax.f32 %v813_v16, 0.0  ;;  %3844 = vmatprep.subr.bf16.mxu1 %v3843_v54 }
 0x1b9   :  { %v1779_v51 = vsel %vm1762_vm10, %v1383_v28, %v1778_v38  ;;  %v1012_v49 = vcombine.high %v868_v46, %v868_v46  ;;  %v1019_v52 = vrot.slane %v868_v46, %v4662_v53  ;;  %1966 = vrot.lane.b32.xlu0 %v1950_v56, %s4037_s27  ;;  %v3539_v56 = vld [vmem:[%s5588_s1 + $0x80] sm:$0xff] }
 0x1ba   :  { %v1780_v57 = vsel %vm1764_vm11, %v1390_v47, %v1779_v51  ;;  %v995_v59 = vcombine.high %v867_v48, %v867_v48  ;;  %v1002_v61 = vrot.slane %v867_v48, %v4662_v53 }
 0x1bb   :  { %v1781_v13 = vsel %vm1766_vm12, %v1397_v12, %v1780_v57  ;;  %v1026_v25 = vrot.slane %v1012_v49, %v4662_v53  ;;  %v1027_v63 = vcombine.high %v1019_v52, %v1019_v52  ;;  %v1426_v5 = vsel %vm1229_vm5, %v1019_v52, -inf  ;;  %3846 = vmatpush3.bf16.msra.mxu1 %v3843_v54 }
 0x1bc   :  { %1827 = vst.msk [vmem:[#allocation2 + $0x12] sm:$0xff] %vm1678_vm15, %v1781_v13  ;;  %v1427_v9 = vrot.slane %v1426_v5, 4  ;;  %v1009_v10 = vrot.slane %v995_v59, %v4662_v53  ;;  %v1010_v3 = vcombine.high %v1002_v61, %v1002_v61  ;;  %v1398_v2 = vsel %vm1229_vm5, %v1002_v61, -inf  ;;  %v3540_v13 = vld [vmem:[%s5588_s1 + $0x88] sm:$0xff] }
 0x1bd   :  { %v1028_v11 = vcombine.high %v1026_v25, %v1026_v25  ;;  %v1433_v14 = vsel %vm1229_vm5, %v1027_v63, -inf  ;;  %v1440_v19 = vsel %vm1229_vm5, %v1026_v25, -inf  ;;  %v1399_v55 = vrot.slane %v1398_v2, 4  ;;  %2008 = vrot.lane.b32.xlu0 %v1992_v62, %s4038_s29  ;;  %v3541_v25 = vld [vmem:[%s5588_s1 + $0x90] sm:$0xff]  ;;  %v3542_v63 = vld [vmem:[%s5588_s1 + $0x98] sm:$0xff] }
 0x1be   :  { %v1428_v20 = vmax.f32 %v1426_v5, %v1427_v9  ;;  %v1434_v21 = vrot.slane %v1433_v14, 4  ;;  %v1441_v22 = vrot.slane %v1440_v19, 4  ;;  %v1011_v8 = vcombine.high %v1009_v10, %v1009_v10 }
 0x1bf   :  { %v1447_v23 = vsel %vm1229_vm5, %v1028_v11, -inf  ;;  %v1400_v27 = vmax.f32 %v1398_v2, %v1399_v55  ;;  %v1405_v58 = vsel %vm1229_vm5, %v1010_v3, -inf  ;;  %v1412_v17 = vsel %vm1229_vm5, %v1009_v10, -inf }
 0x1c0   :  { %v1429_v7 = vrot.slane %v1428_v20, 2  ;;  %v1435_v60 = vmax.f32 %v1433_v14, %v1434_v21  ;;  %v1442_v50 = vmax.f32 %v1440_v19, %v1441_v22  ;;  %v1448_v24 = vrot.slane %v1447_v23, 4 }
 0x1c1   :  { %v1401_v26 = vrot.slane %v1400_v27, 2  ;;  %v1406_v42 = vrot.slane %v1405_v58, 4  ;;  %v1413_v28 = vrot.slane %v1412_v17, 4  ;;  %v1419_v29 = vsel %vm1229_vm5, %v1011_v8, -inf }
 0x1c2   :  { %v1436_v30 = vrot.slane %v1435_v60, 2  ;;  %v1449_v31 = vmax.f32 %v1447_v23, %v1448_v24  ;;  %v1420_v18 = vrot.slane %v1419_v29, 4  ;;  %v1430_v35 = vmax.f32 %v1428_v20, %v1429_v7  ;;  %v3543_v7 = vld [vmem:[%s5588_s1 + $0xa0] sm:$0xff] }
 0x1c3   :  { %v1402_v33 = vmax.f32 %v1400_v27, %v1401_v26  ;;  %v1407_v34 = vmax.f32 %v1405_v58, %v1406_v42  ;;  %v1414_v1 = vmax.f32 %v1412_v17, %v1413_v28  ;;  %v1443_v37 = vrot.slane %v1442_v50, 2  ;;  %v4791_v46 = vld [vmem:[#allocation2 + $0x10] sm:$0xff] }
 0x1c4   :  { %v1450_v40 = vrot.slane %v1449_v31, 2  ;;  %v1421_v36 = vmax.f32 %v1419_v29, %v1420_v18  ;;  %v1437_v44 = vmax.f32 %v1435_v60, %v1436_v30  ;;  %v1431_v48 = vrot.slane %v1430_v35, 1 }
 0x1c5   :  { %v1408_v43 = vrot.slane %v1407_v34, 2  ;;  %v1415_v16 = vrot.slane %v1414_v1, 2  ;;  %v1403_v54 = vrot.slane %v1402_v33, 1  ;;  %v1444_v51 = vmax.f32 %v1442_v50, %v1443_v37 }
 0x1c6   :  { %v1422_v38 = vrot.slane %v1421_v36, 2  ;;  %v1451_v49 = vmax.f32 %v1449_v31, %v1450_v40  ;;  %v1867_v52 = vrot.slane %v4791_v46, 1  ;;  %v1993_v62 = vrot.slane %v4791_v46, 4 }
 0x1c7   :  { %v1409_v47 = vmax.f32 %v1407_v34, %v1408_v43  ;;  %v1416_v12 = vmax.f32 %v1414_v1, %v1415_v16  ;;  %v1438_v5 = vrot.slane %v1437_v44, 1  ;;  %v1404_v9 = vmax.f32 %v1402_v33, %v1403_v54 }
 0x1c8   :  { %v1423_v61 = vmax.f32 %v1421_v36, %v1422_v38  ;;  %v1868_v10 = vsel %vm60_vm1, %v1865_v41, %v1867_v52  ;;  %v1909_v3 = vrot.slane %v4791_v46, 2  ;;  %v1994_v19 = vsel %vm309_vm3, %v1991_v0, %v1993_v62  ;;  %v3544_v0 = vld [vmem:[%s5588_s1 + $0xa8] sm:$0xff] }
 0x1c9   :  { %v1410_v57 = vrot.slane %v1409_v47, 1  ;;  %v1417_v59 = vrot.slane %v1416_v12, 1  ;;  %1884 = vrot.lane.b32.xlu1 %v1868_v10, %s4035_s25  ;;  %v1432_v55 = vmax.f32 %v1430_v35, %v1431_v48  ;;  %v1445_v20 = vrot.slane %v1444_v51, 1  ;;  %2010 = vrot.lane.b32.xlu0 %v1994_v19, %s4038_s29 }
 0x1ca   :  { %v1424_v14 = vrot.slane %v1423_v61, 1  ;;  %v3847_v22 = vpack.c.bf16 %v3540_v13, %v3539_v56  ;;  %v3851_v41 = vpack.c.bf16 %v3542_v63, %v3541_v25  ;;  %v1452_v8 = vrot.slane %v1451_v49, 1 }
 0x1cb   :  { %v1411_v2 = vmax.f32 %v1409_v47, %v1410_v57  ;;  %v1418_v11 = vmax.f32 %v1416_v12, %v1417_v59  ;;  %v1910_v50 = vsel %vm143_vm0, %v1907_v6, %v1909_v3  ;;  %v1951_v26 = vrot.slane %v4791_v46, 3 }
 0x1cc   :  { %v3726_v21 = vpop.f32.mrb[8].mxu0  ;;  %v1425_v23 = vmax.f32 %v1423_v61, %v1424_v14  ;;  %3848 = vmatprep.subr.bf16.mxu1 %v3847_v22  ;;  %v1439_v42 = vmax.f32 %v1437_v44, %v1438_v5  ;;  %v1446_v30 = vmax.f32 %v1444_v51, %v1445_v20  ;;  %v3855_v34 = vpack.c.bf16 %v3544_v0, %v3543_v7 }
 0x1cd   :  { %v1782_v27 = vsel %vm1754_vm6, %v1411_v2, %v1404_v9  ;;  %v828_v58 = vadd.f32 %v3726_v21, %v4658_v32  ;;  %v822_v17 = vpop.f32.mrb[9].mxu0  ;;  %1926 = vrot.lane.b32.xlu1 %v1910_v50, %s4036_s26  ;;  %3850 = vmatpush3.bf16.msra.mxu1 %v3847_v22  ;;  %v1453_v1 = vmax.f32 %v1451_v49, %v1452_v8 }
 0x1ce   :  { %v1783_v60 = vsel %vm1756_vm7, %v1418_v11, %v1782_v27  ;;  %v823_v24 = vadd.f32 %v822_v17, %v4658_v32  ;;  %3852 = vmatprep.subr.bf16.mxu1 %v3851_v41  ;;  %v1952_v16 = vsel %vm226_vm2, %v1949_v39, %v1951_v26 }
 0x1cf   :  { %v1784_v28 = vsel %vm1758_vm8, %v1425_v23, %v1783_v60  ;;  %v870_v29 = vmax.f32 %v828_v58, 0.0 }
 0x1d0   :  { %v1785_v31 = vsel %vm1760_vm9, %v1432_v55, %v1784_v28  ;;  %v869_v33 = vmax.f32 %v823_v24, 0.0 }
 0x1d1   :  { %v1786_v6 = vsel %vm1762_vm10, %v1439_v42, %v1785_v31  ;;  %v1046_v18 = vcombine.high %v870_v29, %v870_v29  ;;  %v1053_v35 = vrot.slane %v870_v29, %v4662_v53  ;;  %1968 = vrot.lane.b32.xlu1 %v1952_v16, %s4037_s27  ;;  %3854 = vmatpush3.bf16.msra.mxu1 %v3851_v41 }
 0x1d2   :  { %v1787_v37 = vsel %vm1764_vm11, %v1446_v30, %v1786_v6  ;;  %v1029_v40 = vcombine.high %v869_v33, %v869_v33  ;;  %v1036_v43 = vrot.slane %v869_v33, %v4662_v53  ;;  %3856 = vmatprep.subr.bf16.mxu1 %v3855_v34 }
 0x1d3   :  { %v1788_v36 = vsel %vm1766_vm12, %v1453_v1, %v1787_v37  ;;  %v1060_v44 = vrot.slane %v1046_v18, %v4662_v53  ;;  %v1061_v54 = vcombine.high %v1053_v35, %v1053_v35  ;;  %v1482_v47 = vsel %vm1229_vm5, %v1053_v35, -inf }
 0x1d4   :  { %1828 = vst.msk [vmem:[#allocation2 + $0x1a] sm:$0xff] %vm1678_vm15, %v1788_v36  ;;  %v1483_v12 = vrot.slane %v1482_v47, 4  ;;  %v1043_v38 = vrot.slane %v1029_v40, %v4662_v53  ;;  %v1044_v48 = vcombine.high %v1036_v43, %v1036_v43  ;;  %v1454_v4 = vsel %vm1229_vm5, %v1036_v43, -inf }
 0x1d5   :  { %v1062_v39 = vcombine.high %v1060_v44, %v1060_v44  ;;  %v1489_v51 = vsel %vm1229_vm5, %v1061_v54, -inf  ;;  %v1496_v49 = vsel %vm1229_vm5, %v1060_v44, -inf  ;;  %v1455_v56 = vrot.slane %v1454_v4, 4  ;;  %3858 = vmatpush3.bf16.msra.mxu1 %v3855_v34 }
 0x1d6   :  { %v1484_v57 = vmax.f32 %v1482_v47, %v1483_v12  ;;  %v1490_v59 = vrot.slane %v1489_v51, 4  ;;  %v1497_v61 = vrot.slane %v1496_v49, 4  ;;  %v1045_v13 = vcombine.high %v1043_v38, %v1043_v38 }
 0x1d7   :  { %v1503_v25 = vsel %vm1229_vm5, %v1062_v39, -inf  ;;  %v1456_v63 = vmax.f32 %v1454_v4, %v1455_v56  ;;  %v1461_v5 = vsel %vm1229_vm5, %v1044_v48, -inf  ;;  %v1468_v9 = vsel %vm1229_vm5, %v1043_v38, -inf }
 0x1d8   :  { %v1485_v10 = vrot.slane %v1484_v57, 2  ;;  %v1491_v2 = vmax.f32 %v1489_v51, %v1490_v59  ;;  %v1498_v11 = vmax.f32 %v1496_v49, %v1497_v61  ;;  %v1504_v14 = vrot.slane %v1503_v25, 4 }
 0x1d9   :  { %v1457_v19 = vrot.slane %v1456_v63, 2  ;;  %v1462_v55 = vrot.slane %v1461_v5, 4  ;;  %v1469_v20 = vrot.slane %v1468_v9, 4  ;;  %v1475_v21 = vsel %vm1229_vm5, %v1045_v13, -inf }
 0x1da   :  { %v1486_v22 = vmax.f32 %v1484_v57, %v1485_v10  ;;  %v1492_v41 = vrot.slane %v1491_v2, 2  ;;  %v1499_v8 = vrot.slane %v1498_v11, 2  ;;  %v1505_v23 = vmax.f32 %v1503_v25, %v1504_v14 }
 0x1db   :  { %v1458_v27 = vmax.f32 %v1456_v63, %v1457_v19  ;;  %v1463_v58 = vmax.f32 %v1461_v5, %v1462_v55  ;;  %v1470_v17 = vmax.f32 %v1468_v9, %v1469_v20  ;;  %v1476_v7 = vrot.slane %v1475_v21, 4  ;;  %v4861_v31 = vld [vmem:[#allocation2 + $0x18] sm:$0xff]  ;;  %v1837_v35 = vld [vmem:[#allocation2 + $0x20] sm:$0xf] }
 0x1dc   :  { %v1487_v0 = vrot.slane %v1486_v22, 1  ;;  %v1493_v60 = vmax.f32 %v1491_v2, %v1492_v41  ;;  %v1500_v50 = vmax.f32 %v1498_v11, %v1499_v8  ;;  %v1506_v24 = vrot.slane %v1505_v23, 2 }
 0x1dd   :  { %v1459_v42 = vrot.slane %v1458_v27, 1  ;;  %v1464_v28 = vrot.slane %v1463_v58, 2  ;;  %v1471_v29 = vrot.slane %v1470_v17, 2  ;;  %v1477_v30 = vmax.f32 %v1475_v21, %v1476_v7 }
 0x1de   :  { %v1507_v33 = vmax.f32 %v1505_v23, %v1506_v24  ;;  %v1488_v34 = vmax.f32 %v1486_v22, %v1487_v0  ;;  %v1494_v37 = vrot.slane %v1493_v60, 1  ;;  %v1501_v40 = vrot.slane %v1500_v50, 1 }
 0x1df   :  { %v1465_v1 = vmax.f32 %v1463_v58, %v1464_v28  ;;  %v1472_v6 = vmax.f32 %v1470_v17, %v1471_v29  ;;  %v1478_v18 = vrot.slane %v1477_v30, 2  ;;  %v1460_v43 = vmax.f32 %v1458_v27, %v1459_v42 }
 0x1e0   :  { %v1869_v16 = vrot.slane %v4861_v31, 1  ;;  %v1911_v47 = vrot.slane %v4861_v31, 2  ;;  %v1508_v12 = vrot.slane %v1507_v33, 1  ;;  %v1871_v48 = vrot.slane %v1837_v35, 1 }
 0x1e1   :  { %v1466_v36 = vrot.slane %v1465_v1, 1  ;;  %v1473_v44 = vrot.slane %v1472_v6, 1  ;;  %v1479_v54 = vmax.f32 %v1477_v30, %v1478_v18  ;;  %v1953_v4 = vrot.slane %v4861_v31, 3 }
 0x1e2   :  { %v1870_v38 = vsel %vm60_vm1, %v1867_v52, %v1869_v16  ;;  %v1912_v56 = vsel %vm143_vm0, %v1909_v3, %v1911_v47  ;;  %v1495_v57 = vmax.f32 %v1493_v60, %v1494_v37  ;;  %v1502_v59 = vmax.f32 %v1500_v50, %v1501_v40 }
 0x1e3   :  { %v1467_v39 = vmax.f32 %v1465_v1, %v1466_v36  ;;  %v1474_v51 = vmax.f32 %v1472_v6, %v1473_v44  ;;  %v1480_v49 = vrot.slane %v1479_v54, 1  ;;  %1886 = vrot.lane.b32.xlu1 %v1870_v38, %s4035_s25  ;;  %1928 = vrot.lane.b32.xlu0 %v1912_v56, %s4036_s26  ;;  %v1913_v13 = vrot.slane %v1837_v35, 2 }
 0x1e4   :  { %v3729_v61 = vpop.f32.mrb[10].mxu0  ;;  %v1995_v52 = vrot.slane %v4861_v31, 4  ;;  %v1955_v10 = vrot.slane %v1837_v35, 3  ;;  %v1509_v2 = vmax.f32 %v1507_v33, %v1508_v12  ;;  %v1872_v3 = vsel %vm60_vm1, %v1869_v16, %v1871_v48 }
 0x1e5   :  { %v1481_v25 = vmax.f32 %v1479_v54, %v1480_v49  ;;  %v1789_v63 = vsel %vm1754_vm6, %v1467_v39, %v1460_v43  ;;  %v838_v5 = vadd.f32 %v3729_v61, %v4658_v32  ;;  %v832_v9 = vpop.f32.mrb[11].mxu0  ;;  %v1954_v55 = vsel %vm226_vm2, %v1951_v26, %v1953_v4 }
 0x1e6   :  { %v1790_v11 = vsel %vm1756_vm7, %v1474_v51, %v1789_v63  ;;  %v833_v14 = vadd.f32 %v832_v9, %v4658_v32  ;;  %v1997_v21 = vrot.slane %v1837_v35, 4  ;;  %v1914_v8 = vsel %vm143_vm0, %v1911_v47, %v1913_v13 }
 0x1e7   :  { %v1791_v19 = vsel %vm1758_vm8, %v1481_v25, %v1790_v11  ;;  %1888 = vrot.lane.b32.xlu1 %v1872_v3, %s4035_s25  ;;  %v872_v20 = vmax.f32 %v838_v5, 0.0  ;;  %1970 = vrot.lane.b32.xlu0 %v1954_v55, %s4037_s27  ;;  %v1996_v23 = vsel %vm309_vm3, %v1993_v62, %v1995_v52  ;;  %v1956_v26 = vsel %vm226_vm2, %v1953_v4, %v1955_v10 }
 0x1e8   :  { %v1792_v22 = vsel %vm1760_vm9, %v1488_v34, %v1791_v19  ;;  %v871_v41 = vmax.f32 %v833_v14, 0.0  ;;  %v1998_v50 = vsel %vm309_vm3, %v1995_v52, %v1997_v21 }
 0x1e9   :  { %v1793_v27 = vsel %vm1762_vm10, %v1495_v57, %v1792_v22  ;;  %v1080_v58 = vcombine.high %v872_v20, %v872_v20  ;;  %v1087_v17 = vrot.slane %v872_v20, %v4662_v53 }
 0x1ea   :  { %v1794_v7 = vsel %vm1764_vm11, %v1502_v59, %v1793_v27  ;;  %v1063_v0 = vcombine.high %v871_v41, %v871_v41  ;;  %v1070_v60 = vrot.slane %v871_v41, %v4662_v53 }
 0x1eb   :  { %v1795_v24 = vsel %vm1766_vm12, %v1509_v2, %v1794_v7  ;;  %v1094_v42 = vrot.slane %v1080_v58, %v4662_v53  ;;  %v1095_v28 = vcombine.high %v1087_v17, %v1087_v17  ;;  %v1538_v62 = vsel %vm1229_vm5, %v1087_v17, -inf  ;;  %1930 = vrot.lane.b32.xlu1 %v1914_v8, %s4036_s26  ;;  %2012 = vrot.lane.b32.xlu0 %v1996_v23, %s4038_s29 }
 0x1ec   :  { %1829 = vst.msk [vmem:[#allocation2 + $0x2a] sm:$0xff] %vm1678_vm15, %v1795_v24  ;;  %v1539_v29 = vrot.slane %v1538_v62, 4  ;;  %v1077_v30 = vrot.slane %v1063_v0, %v4662_v53  ;;  %v1078_v33 = vcombine.high %v1070_v60, %v1070_v60  ;;  %v1510_v34 = vsel %vm1229_vm5, %v1070_v60, -inf }
 0x1ed   :  { %v1096_v1 = vcombine.high %v1094_v42, %v1094_v42  ;;  %v1545_v6 = vsel %vm1229_vm5, %v1095_v28, -inf  ;;  %v1552_v18 = vsel %vm1229_vm5, %v1094_v42, -inf  ;;  %v1511_v35 = vrot.slane %v1510_v34, 4 }
 0x1ee   :  { %v1540_v37 = vmax.f32 %v1538_v62, %v1539_v29  ;;  %v1546_v40 = vrot.slane %v1545_v6, 4  ;;  %v1553_v43 = vrot.slane %v1552_v18, 4  ;;  %v1079_v16 = vcombine.high %v1077_v30, %v1077_v30 }
 0x1ef   :  { %v1559_v36 = vsel %vm1229_vm5, %v1096_v1, -inf  ;;  %v1512_v44 = vmax.f32 %v1510_v34, %v1511_v35  ;;  %v1517_v54 = vsel %vm1229_vm5, %v1078_v33, -inf  ;;  %v1524_v47 = vsel %vm1229_vm5, %v1077_v30, -inf  ;;  %1972 = vrot.lane.b32.xlu1 %v1956_v26, %s4037_s27  ;;  %2014 = vrot.lane.b32.xlu0 %v1998_v50, %s4038_s29 }
 0x1f0   :  { %v1547_v12 = vmax.f32 %v1545_v6, %v1546_v40  ;;  %v1554_v38 = vmax.f32 %v1552_v18, %v1553_v43  ;;  %v1560_v48 = vrot.slane %v1559_v36, 4  ;;  %v1518_v39 = vrot.slane %v1517_v54, 4 }
 0x1f1   :  { %v1513_v4 = vrot.slane %v1512_v44, 2  ;;  %v1525_v51 = vrot.slane %v1524_v47, 4  ;;  %v1531_v49 = vsel %vm1229_vm5, %v1079_v16, -inf  ;;  %v1541_v56 = vrot.slane %v1540_v37, 2 }
 0x1f2   :  { %v1548_v57 = vrot.slane %v1547_v12, 2  ;;  %v1561_v59 = vmax.f32 %v1559_v36, %v1560_v48  ;;  %v1519_v13 = vmax.f32 %v1517_v54, %v1518_v39  ;;  %v1532_v25 = vrot.slane %v1531_v49, 4 }
 0x1f3   :  { %v1514_v61 = vmax.f32 %v1512_v44, %v1513_v4  ;;  %v1526_v52 = vmax.f32 %v1524_v47, %v1525_v51  ;;  %v1555_v63 = vrot.slane %v1554_v38, 2  ;;  %v1542_v11 = vmax.f32 %v1540_v37, %v1541_v56  ;;  %v4915_v30 = vld [vmem:[#allocation2 + $0x28] sm:$0xff] }
 0x1f4   :  { %v1562_v5 = vrot.slane %v1561_v59, 2  ;;  %v1520_v9 = vrot.slane %v1519_v13, 2  ;;  %v1533_v2 = vmax.f32 %v1531_v49, %v1532_v25  ;;  %v1549_v3 = vmax.f32 %v1547_v12, %v1548_v57 }
 0x1f5   :  { %v1527_v10 = vrot.slane %v1526_v52, 2  ;;  %v1515_v14 = vrot.slane %v1514_v61, 1  ;;  %v1556_v21 = vmax.f32 %v1554_v38, %v1555_v63  ;;  %v1543_v27 = vrot.slane %v1542_v11, 1 }
 0x1f6   :  { %v1521_v19 = vmax.f32 %v1519_v13, %v1520_v9  ;;  %v1534_v20 = vrot.slane %v1533_v2, 2  ;;  %v1563_v22 = vmax.f32 %v1561_v59, %v1562_v5  ;;  %v1550_v58 = vrot.slane %v1549_v3, 1 }
 0x1f7   :  { %v1528_v55 = vmax.f32 %v1526_v52, %v1527_v10  ;;  %v1516_v17 = vmax.f32 %v1514_v61, %v1515_v14  ;;  %v1557_v60 = vrot.slane %v1556_v21, 1  ;;  %v1544_v33 = vmax.f32 %v1542_v11, %v1543_v27 }
 0x1f8   :  { %v1522_v41 = vrot.slane %v1521_v19, 1  ;;  %v1535_v23 = vmax.f32 %v1533_v2, %v1534_v20  ;;  %v1564_v24 = vrot.slane %v1563_v22, 1  ;;  %v1551_v6 = vmax.f32 %v1549_v3, %v1550_v58 }
 0x1f9   :  { %v1529_v8 = vrot.slane %v1528_v55, 1  ;;  %v1558_v37 = vmax.f32 %v1556_v21, %v1557_v60  ;;  %v1873_v16 = vrot.slane %v4915_v30, 1  ;;  %v1915_v4 = vrot.slane %v4915_v30, 2 }
 0x1fa   :  { %v1523_v26 = vmax.f32 %v1521_v19, %v1522_v41  ;;  %v1536_v0 = vrot.slane %v1535_v23, 1  ;;  %v1565_v36 = vmax.f32 %v1563_v22, %v1564_v24 }
 0x1fb   :  { %v1530_v7 = vmax.f32 %v1528_v55, %v1529_v8 }
 0x1fc   :  { %v3732_v50 = vpop.f32.mrb[12].mxu0  ;;  %v1537_v42 = vmax.f32 %v1535_v23, %v1536_v0  ;;  %v1796_v28 = vsel %vm1754_vm6, %v1523_v26, %v1516_v17 }
 0x1fd   :  { %v848_v62 = vadd.f32 %v3732_v50, %v4658_v32  ;;  %v842_v29 = vpop.f32.mrb[13].mxu0  ;;  %v1797_v34 = vsel %vm1756_vm7, %v1530_v7, %v1796_v28 }
 0x1fe   :  { %v843_v1 = vadd.f32 %v842_v29, %v4658_v32  ;;  %v1798_v18 = vsel %vm1758_vm8, %v1537_v42, %v1797_v34 }
 0x1ff   :  { %v874_v35 = vmax.f32 %v848_v62, 0.0  ;;  %v1799_v40 = vsel %vm1760_vm9, %v1544_v33, %v1798_v18 }
 0x200   :  { %v873_v43 = vmax.f32 %v843_v1, 0.0  ;;  %v1800_v44 = vsel %vm1762_vm10, %v1551_v6, %v1799_v40 }
 0x201   :  { %v1114_v54 = vcombine.high %v874_v35, %v874_v35  ;;  %v1121_v47 = vrot.slane %v874_v35, %v4662_v53  ;;  %v1801_v12 = vsel %vm1764_vm11, %v1558_v37, %v1800_v44 }
 0x202   :  { %v1097_v38 = vcombine.high %v873_v43, %v873_v43  ;;  %v1104_v48 = vrot.slane %v873_v43, %v4662_v53  ;;  %v1802_v39 = vsel %vm1766_vm12, %v1565_v36, %v1801_v12 }
 0x203   :  { %v1128_v51 = vrot.slane %v1114_v54, %v4662_v53  ;;  %v1129_v49 = vcombine.high %v1121_v47, %v1121_v47  ;;  %v1594_v56 = vsel %vm1229_vm5, %v1121_v47, -inf  ;;  %1830 = vst.msk [vmem:[#allocation2 + $0x32] sm:$0xff] %vm1678_vm15, %v1802_v39 }
 0x204   :  { %v1595_v57 = vrot.slane %v1594_v56, 4  ;;  %v1111_v59 = vrot.slane %v1097_v38, %v4662_v53  ;;  %v1112_v61 = vcombine.high %v1104_v48, %v1104_v48  ;;  %v1566_v13 = vsel %vm1229_vm5, %v1104_v48, -inf }
 0x205   :  { %v1130_v52 = vcombine.high %v1128_v51, %v1128_v51  ;;  %v1601_v25 = vsel %vm1229_vm5, %v1129_v49, -inf  ;;  %v1608_v63 = vsel %vm1229_vm5, %v1128_v51, -inf  ;;  %v1567_v5 = vrot.slane %v1566_v13, 4 }
 0x206   :  { %v1596_v9 = vmax.f32 %v1594_v56, %v1595_v57  ;;  %v1602_v10 = vrot.slane %v1601_v25, 4  ;;  %v1609_v2 = vrot.slane %v1608_v63, 4  ;;  %v1113_v11 = vcombine.high %v1111_v59, %v1111_v59 }
 0x207   :  { %v1615_v3 = vsel %vm1229_vm5, %v1130_v52, -inf  ;;  %v1568_v14 = vmax.f32 %v1566_v13, %v1567_v5  ;;  %v1573_v19 = vsel %vm1229_vm5, %v1112_v61, -inf  ;;  %v1580_v55 = vsel %vm1229_vm5, %v1111_v59, -inf }
 0x208   :  { %v1597_v20 = vrot.slane %v1596_v9, 2  ;;  %v1603_v21 = vmax.f32 %v1601_v25, %v1602_v10  ;;  %v1610_v22 = vmax.f32 %v1608_v63, %v1609_v2  ;;  %v1616_v41 = vrot.slane %v1615_v3, 4 }
 0x209   :  { %v1569_v8 = vrot.slane %v1568_v14, 2  ;;  %v1574_v23 = vrot.slane %v1573_v19, 4  ;;  %v1581_v27 = vrot.slane %v1580_v55, 4  ;;  %v1587_v58 = vsel %vm1229_vm5, %v1113_v11, -inf  ;;  %v3735_v17 = vpop.f32.mrb[14].mxu0 }
 0x20a   :  { %v1598_v26 = vmax.f32 %v1596_v9, %v1597_v20  ;;  %v1604_v7 = vrot.slane %v1603_v21, 2  ;;  %v1611_v0 = vrot.slane %v1610_v22, 2  ;;  %v1617_v60 = vmax.f32 %v1615_v3, %v1616_v41  ;;  %v852_v50 = vpop.f32.mrb[15].mxu0  ;;  %v4939_v48 = vld [vmem:[#allocation2 + $0x30] sm:$0xff] }
 0x20b   :  { %v1570_v24 = vmax.f32 %v1568_v14, %v1569_v8  ;;  %v1575_v42 = vmax.f32 %v1573_v19, %v1574_v23  ;;  %v1582_v28 = vmax.f32 %v1580_v55, %v1581_v27  ;;  %v1588_v62 = vrot.slane %v1587_v58, 4 }
 0x20c   :  { %v1599_v29 = vrot.slane %v1598_v26, 1  ;;  %v1605_v33 = vmax.f32 %v1603_v21, %v1604_v7  ;;  %v1612_v34 = vmax.f32 %v1610_v22, %v1611_v0  ;;  %v1618_v1 = vrot.slane %v1617_v60, 2 }
 0x20d   :  { %v1571_v6 = vrot.slane %v1570_v24, 1  ;;  %v1576_v18 = vrot.slane %v1575_v42, 2  ;;  %v1583_v35 = vrot.slane %v1582_v28, 2  ;;  %v1589_v37 = vmax.f32 %v1587_v58, %v1588_v62 }
 0x20e   :  { %v1600_v40 = vmax.f32 %v1598_v26, %v1599_v29  ;;  %v1606_v43 = vrot.slane %v1605_v33, 1  ;;  %v1613_v36 = vrot.slane %v1612_v34, 1  ;;  %v1619_v44 = vmax.f32 %v1617_v60, %v1618_v1 }
 0x20f   :  { %v1572_v54 = vmax.f32 %v1570_v24, %v1571_v6  ;;  %v1577_v47 = vmax.f32 %v1575_v42, %v1576_v18  ;;  %v1584_v12 = vmax.f32 %v1582_v28, %v1583_v35  ;;  %v1590_v38 = vrot.slane %v1589_v37, 2 }
 0x210   :  { %v1607_v39 = vmax.f32 %v1605_v33, %v1606_v43  ;;  %v1614_v51 = vmax.f32 %v1612_v34, %v1613_v36  ;;  %v1620_v49 = vrot.slane %v1619_v44, 1  ;;  %v858_v56 = vadd.f32 %v3735_v17, %v4658_v32 }
 0x211   :  { %v1578_v57 = vrot.slane %v1577_v47, 1  ;;  %v1585_v59 = vrot.slane %v1584_v12, 1  ;;  %v1591_v61 = vmax.f32 %v1589_v37, %v1590_v38  ;;  %v853_v13 = vadd.f32 %v852_v50, %v4658_v32 }
 0x212   :  { %v1621_v52 = vmax.f32 %v1619_v44, %v1620_v49  ;;  %v876_v25 = vmax.f32 %v858_v56, 0.0  ;;  %v1874_v63 = vrot.slane %v4939_v48, 1  ;;  %v1916_v5 = vrot.slane %v4939_v48, 2 }
 0x213   :  { %v1579_v9 = vmax.f32 %v1577_v47, %v1578_v57  ;;  %v1586_v10 = vmax.f32 %v1584_v12, %v1585_v59  ;;  %v1592_v2 = vrot.slane %v1591_v61, 1  ;;  %v875_v11 = vmax.f32 %v853_v13, 0.0 }
 0x214   :  { %v1148_v3 = vcombine.high %v876_v25, %v876_v25  ;;  %v1155_v14 = vrot.slane %v876_v25, %v4662_v53  ;;  %v1875_v19 = vsel %vm60_vm1, %v1873_v16, %v1874_v63  ;;  %v1917_v32 = vsel %vm143_vm0, %v1915_v4, %v1916_v5 }
 0x215   :  { %v1593_v55 = vmax.f32 %v1591_v61, %v1592_v2  ;;  %v1803_v20 = vsel %vm1754_vm6, %v1579_v9, %v1572_v54  ;;  %v1131_v21 = vcombine.high %v875_v11, %v875_v11  ;;  %v1138_v22 = vrot.slane %v875_v11, %v4662_v53  ;;  %1890 = vrot.lane.b32.xlu1 %v1875_v19, %s4035_s25 }
 0x216   :  { %v1804_v41 = vsel %vm1756_vm7, %v1586_v10, %v1803_v20  ;;  %v1162_v8 = vrot.slane %v1148_v3, %v4662_v53  ;;  %v1163_v23 = vcombine.high %v1155_v14, %v1155_v14  ;;  %v1650_v16 = vsel %vm1229_vm5, %v1155_v14, -inf  ;;  %1932 = vrot.lane.b32.xlu0 %v1917_v32, %s4036_s26 }
 0x217   :  { %v1805_v27 = vsel %vm1758_vm8, %v1593_v55, %v1804_v41  ;;  %v1651_v4 = vrot.slane %v1650_v16, 4  ;;  %v1145_v58 = vrot.slane %v1131_v21, %v4662_v53  ;;  %v1146_v17 = vcombine.high %v1138_v22, %v1138_v22 }
 0x218   :  { %v1806_v26 = vsel %vm1760_vm9, %v1600_v40, %v1805_v27  ;;  %v1164_v7 = vcombine.high %v1162_v8, %v1162_v8  ;;  %v1657_v0 = vsel %vm1229_vm5, %v1163_v23, -inf  ;;  %v1664_v60 = vsel %vm1229_vm5, %v1162_v8, -inf }
 0x219   :  { %v1807_v50 = vsel %vm1762_vm10, %v1607_v39, %v1806_v26  ;;  %v1652_v24 = vmax.f32 %v1650_v16, %v1651_v4  ;;  %v1658_v42 = vrot.slane %v1657_v0, 4  ;;  %v1665_v28 = vrot.slane %v1664_v60, 4 }
 0x21a   :  { %v1808_v62 = vsel %vm1764_vm11, %v1614_v51, %v1807_v50  ;;  %v1671_v29 = vsel %vm1229_vm5, %v1164_v7, -inf  ;;  %v1147_v33 = vcombine.high %v1145_v58, %v1145_v58  ;;  %v1622_v34 = vsel %vm1229_vm5, %v1138_v22, -inf }
 0x21b   :  { %v1809_v1 = vsel %vm1766_vm12, %v1621_v52, %v1808_v62  ;;  %v1659_v6 = vmax.f32 %v1657_v0, %v1658_v42  ;;  %v1666_v18 = vmax.f32 %v1664_v60, %v1665_v28  ;;  %v1672_v35 = vrot.slane %v1671_v29, 4 }
 0x21c   :  { %1831 = vst.msk [vmem:[#allocation2 + $0x3a] sm:$0xff] %vm1678_vm15, %v1809_v1  ;;  %v1623_v37 = vrot.slane %v1622_v34, 4  ;;  %v1629_v40 = vsel %vm1229_vm5, %v1146_v17, -inf  ;;  %v1636_v43 = vsel %vm1229_vm5, %v1145_v58, -inf  ;;  %v1653_v36 = vrot.slane %v1652_v24, 2 }
 0x21d   :  { %v1630_v44 = vrot.slane %v1629_v40, 4  ;;  %v1673_v54 = vmax.f32 %v1671_v29, %v1672_v35  ;;  %v1637_v12 = vrot.slane %v1636_v43, 4  ;;  %v1643_v38 = vsel %vm1229_vm5, %v1147_v33, -inf }
 0x21e   :  { %v1624_v47 = vmax.f32 %v1622_v34, %v1623_v37  ;;  %v1660_v39 = vrot.slane %v1659_v6, 2  ;;  %v1667_v49 = vrot.slane %v1666_v18, 2  ;;  %v1644_v59 = vrot.slane %v1643_v38, 4 }
 0x21f   :  { %v1631_v51 = vmax.f32 %v1629_v40, %v1630_v44  ;;  %v1638_v57 = vmax.f32 %v1636_v43, %v1637_v12  ;;  %v1654_v61 = vmax.f32 %v1652_v24, %v1653_v36  ;;  %v1957_v52 = vrot.slane %v4915_v30, 3 }
 0x220   :  { %v1625_v56 = vrot.slane %v1624_v47, 2  ;;  %v1674_v25 = vrot.slane %v1673_v54, 2  ;;  %v1645_v2 = vmax.f32 %v1643_v38, %v1644_v59  ;;  %v1661_v11 = vmax.f32 %v1659_v6, %v1660_v39 }
 0x221   :  { %v1632_v13 = vrot.slane %v1631_v51, 2  ;;  %v1639_v10 = vrot.slane %v1638_v57, 2  ;;  %v1958_v14 = vrot.slane %v4939_v48, 3  ;;  %v1999_v19 = vrot.slane %v4915_v30, 4 }
 0x222   :  { %v1626_v9 = vmax.f32 %v1624_v47, %v1625_v56  ;;  %v1668_v55 = vmax.f32 %v1666_v18, %v1667_v49  ;;  %v1646_v22 = vrot.slane %v1645_v2, 2  ;;  %v2000_v23 = vrot.slane %v4939_v48, 4 }
 0x223   :  { %v1633_v3 = vmax.f32 %v1631_v51, %v1632_v13  ;;  %v4980_v32 = vld [vmem:[#allocation2 + $0x38] sm:$0xff]  ;;  %v1640_v21 = vmax.f32 %v1638_v57, %v1639_v10  ;;  %v1959_v8 = vsel %vm226_vm2, %v1957_v52, %v1958_v14  ;;  %v1883_v16 = vpop.permute.xlu0 %1882  ;;  %v1655_v4 = vrot.slane %v1654_v61, 1 }
 0x224   :  { %v1627_v20 = vrot.slane %v1626_v9, 1  ;;  %v1876_v27 = vrot.slane %v4980_v32, 1  ;;  %v1675_v58 = vmax.f32 %v1673_v54, %v1674_v25  ;;  %v1647_v26 = vmax.f32 %v1645_v2, %v1646_v22  ;;  %1974 = vrot.lane.b32.xlu0 %v1959_v8, %s4037_s27 }
 0x225   :  { %v1634_v41 = vrot.slane %v1633_v3, 1  ;;  %v1641_v17 = vrot.slane %v1640_v21, 1  ;;  %v1662_v7 = vrot.slane %v1661_v11, 1  ;;  %v2002_v28 = vrot.slane %v4980_v32, 4 }
 0x226   :  { %v1628_v0 = vmax.f32 %v1626_v9, %v1627_v20  ;;  %v1877_v50 = vsel %vm60_vm1, %v1874_v63, %v1876_v27  ;;  %v1648_v42 = vrot.slane %v1647_v26, 1  ;;  %v1918_v62 = vrot.slane %v4980_v32, 2 }
 0x227   :  { %v1635_v60 = vmax.f32 %v1633_v3, %v1634_v41  ;;  %v1642_v24 = vmax.f32 %v1640_v21, %v1641_v17  ;;  %1892 = vrot.lane.b32.xlu1 %v1877_v50, %s4035_s25  ;;  %v1669_v29 = vrot.slane %v1668_v55, 1  ;;  %v2001_v34 = vsel %vm309_vm3, %v1999_v19, %v2000_v23  ;;  %v1925_v1 = vpop.permute.xlu0 %1924 }
 0x228   :  { %v1676_v6 = vrot.slane %v1675_v58, 1  ;;  %v1649_v18 = vmax.f32 %v1647_v26, %v1648_v42  ;;  %2016 = vrot.lane.b32.xlu0 %v2001_v34, %s4038_s29  ;;  %v1656_v63 = vmax.f32 %v1654_v61, %v1655_v4  ;;  %v2003_v37 = vsel %vm309_vm3, %v2000_v23, %v2002_v28  ;;  %v3999_v4 = vld [vmem:[#allocation2 + $0x8] sm:$0xff] }
 0x229   :  { %v1810_v33 = vsel %vm1754_vm6, %v1635_v60, %v1628_v0  ;;  %v1919_v40 = vsel %vm143_vm0, %v1916_v5, %v1918_v62  ;;  %v1960_v43 = vrot.slane %v4980_v32, 3  ;;  %v1663_v36 = vmax.f32 %v1661_v11, %v1662_v7  ;;  %v3998_v5 = vld [vmem:[#allocation2] sm:$0xff] }
 0x22a   :  { %v1811_v35 = vsel %vm1756_vm7, %v1642_v24, %v1810_v33  ;;  %v1670_v54 = vmax.f32 %v1668_v55, %v1669_v29  ;;  %v1677_v38 = vmax.f32 %v1675_v58, %v1676_v6  ;;  %v2032_v49 = vsel %vm1678_vm15, %v3998_v5, %v1883_v16 }
 0x22b   :  { %v1812_v44 = vsel %vm1758_vm8, %v1649_v18, %v1811_v35  ;;  %1934 = vrot.lane.b32.xlu1 %v1919_v40, %s4036_s26  ;;  %v1967_v12 = vpop.permute.xlu0 %1966  ;;  %v1961_v56 = vsel %vm226_vm2, %v1958_v14, %v1960_v43  ;;  %v2041_v59 = vsel %vm2040_vm13, %v2032_v49, %v1925_v1  ;;  %vm2071_vm5 = vcmask 654336  }
 0x22c   :  { %v1813_v47 = vsel %vm1760_vm9, %v1656_v63, %v1812_v44  ;;  %2018 = vrot.lane.b32.xlu0 %v2003_v37, %s4038_s29  ;;  %v2050_v61 = vsel %vm2049_vm14, %v2041_v59, %v1967_v12 }
 0x22d   :  { %v1814_v39 = vsel %vm1762_vm10, %v1663_v36, %v1813_v47 }
 0x22e   :  { %v1815_v51 = vsel %vm1764_vm11, %v1670_v54, %v1814_v39 }
 0x22f   :  { %v1816_v57 = vsel %vm1766_vm12, %v1677_v38, %v1815_v51  ;;  %1976 = vrot.lane.b32.xlu1 %v1961_v56, %s4037_s27  ;;  %v2009_v13 = vpop.permute.xlu0 %2008 }
 0x230   :  { %1832 = vst.msk [vmem:[#allocation2 + $0x42] sm:$0xff] %vm1678_vm15, %v1816_v57  ;;  %v2059_v52 = vsel %vm2058_vm4, %v2050_v61, %v2009_v13 }
 0x231   :  { %3756 = vmatprep.mubr.msk.f32.mxu1 %vm2071_vm5, %v2059_v52 }
 0x237   :  { %v5016_v25 = vld [vmem:[#allocation2 + $0x40] sm:$0xff]  ;;  %v1842_v9 = vld [vmem:[#allocation2 + $0x48] sm:$0xf] }
 0x238   :  { %v1878_v10 = vrot.slane %v5016_v25, 1  ;;  %v1920_v2 = vrot.slane %v5016_v25, 2  ;;  %v1880_v14 = vrot.slane %v1842_v9, 1  ;;  %v1962_v19 = vrot.slane %v5016_v25, 3 }
 0x239   :  { %v1922_v22 = vrot.slane %v1842_v9, 2  ;;  %v2004_v41 = vrot.slane %v5016_v25, 4  ;;  %v2006_v50 = vrot.slane %v1842_v9, 4 }
 0x23a   :  { %v1879_v11 = vsel %vm60_vm1, %v1876_v27, %v1878_v10  ;;  %v1921_v3 = vsel %vm143_vm0, %v1918_v62, %v1920_v2  ;;  %v1881_v20 = vsel %vm60_vm1, %v1878_v10, %v1880_v14  ;;  %v1963_v21 = vsel %vm226_vm2, %v1960_v43, %v1962_v19 }
 0x23b   :  { %1894 = vrot.lane.b32.xlu1 %v1879_v11, %s4035_s25  ;;  %1936 = vrot.lane.b32.xlu0 %v1921_v3, %s4036_s26  ;;  %v1885_v55 = vpop.permute.xlu1 %1884  ;;  %v1923_v23 = vsel %vm143_vm0, %v1920_v2, %v1922_v22  ;;  %v2005_v16 = vsel %vm309_vm3, %v2002_v28, %v2004_v41  ;;  %v1964_v27 = vrot.slane %v1842_v9, 3  ;;  %v2011_v7 = vpop.permute.xlu0 %2010  ;;  %v2007_v42 = vsel %vm309_vm3, %v2004_v41, %v2006_v50 }
 0x23c   :  { %v2033_v58 = vsel %vm1678_vm15, %v3999_v4, %v1885_v55  ;;  %vm2765_vm3 = vcmask 785408  }
 0x23d   :  { %v1965_v60 = vsel %vm226_vm2, %v1962_v19, %v1964_v27  ;;  %vm2385_vm2 = vcmask 254976   ;;  %v5087_v27 = vld [vmem:[%s5589_s2] sm:$0x1f] }
 0x23e   :  { %2612 = vst.msk [vmem:[#allocation3 + $0x10] sm:$0x3] %vm2385_vm2, %v4033_v45  ;;  %2615 = vst.msk [vmem:[#allocation3 + $0x28] sm:$0x3] %vm2385_vm2, %v4033_v45 }
 0x23f   :  { %1896 = vrot.lane.b32.xlu1 %v1881_v20, %s4035_s25  ;;  %1978 = vrot.lane.b32.xlu0 %v1963_v21, %s4037_s27  ;;  %v1927_v8 = vpop.permute.xlu1 %1926 }
 0x240   :  { %v2042_v17 = vsel %vm2040_vm13, %v2033_v58, %v1927_v8 }
 0x243   :  { %1938 = vrot.lane.b32.xlu1 %v1923_v23, %s4036_s26  ;;  %2020 = vrot.lane.b32.xlu0 %v2005_v16, %s4038_s29  ;;  %v1969_v26 = vpop.permute.xlu1 %1968  ;;  %v2069_v16 = vsub.s32 1, %v4652_v15 }
 0x244   :  { %v2051_v0 = vsel %vm2049_vm14, %v2042_v17, %v1969_v26 }
 0x245   :  { %v2060_v24 = vsel %vm2058_vm4, %v2051_v0, %v2011_v7  ;;  %v5090_v4 = vrot.slane %v5087_v27, %v2069_v16 }
 0x246   :  { %3757 = vmatmul.mubr.msk.f32.vlgmr.msra.gmra.mrb[0].mxu1 %vm2071_vm5, %v2060_v24 }
 0x247   :  { %1980 = vrot.lane.b32.xlu1 %v1965_v60, %s4037_s27 }
 0x24b   :  { %2022 = vrot.lane.b32.xlu1 %v2007_v42, %s4038_s29 }
 0x255   :  { %v1887_v28 = vpop.permute.xlu1 %1886  ;;  %v1929_v62 = vpop.permute.xlu0 %1928 }
 0x256   :  { %v2034_v33 = vsel %vm1678_vm15, %v4791_v46, %v1887_v28 }
 0x257   :  { %v2043_v1 = vsel %vm2040_vm13, %v2034_v33, %v1929_v62 }
 0x259   :  { %v1889_v29 = vpop.permute.xlu1 %1888  ;;  %v1971_v34 = vpop.permute.xlu0 %1970 }
 0x25a   :  { %v2052_v18 = vsel %vm2049_vm14, %v2043_v1, %v1971_v34  ;;  %v2035_v37 = vsel %vm1678_vm15, %v4861_v31, %v1889_v29 }
 0x25d   :  { %v1931_v6 = vpop.permute.xlu1 %1930  ;;  %v2013_v35 = vpop.permute.xlu0 %2012 }
 0x25e   :  { %v2061_v63 = vsel %vm2058_vm4, %v2052_v18, %v2013_v35  ;;  %v2044_v40 = vsel %vm2040_vm13, %v2035_v37, %v1931_v6 }
 0x25f   :  { %3759 = vmatprep.mubr.msk.f32.mxu1 %vm2071_vm5, %v2061_v63 }
 0x261   :  { %v1973_v43 = vpop.permute.xlu1 %1972  ;;  %v2015_v46 = vpop.permute.xlu0 %2014 }
 0x262   :  { %v2053_v36 = vsel %vm2049_vm14, %v2044_v40, %v1973_v43 }
 0x263   :  { %v2062_v44 = vsel %vm2058_vm4, %v2053_v36, %v2015_v46 }
 0x264   :  { %3760 = vmatmul.mubr.msk.f32.gmra.mrb[2].mxu1 %vm2071_vm5, %v2062_v44 }
 0x287   :  { %v1891_v47 = vpop.permute.xlu1 %1890 }
 0x288   :  { %v1933_v54 = vpop.permute.xlu0 %1932  ;;  %v2036_v12 = vsel %vm1678_vm15, %v4915_v30, %v1891_v47 }
 0x289   :  { %v2045_v31 = vsel %vm2040_vm13, %v2036_v12, %v1933_v54 }
 0x296   :  { %v1975_v38 = vpop.permute.xlu0 %1974 }
 0x297   :  { %v2054_v51 = vsel %vm2049_vm14, %v2045_v31, %v1975_v38 }
 0x299   :  { %v1893_v39 = vpop.permute.xlu1 %1892 }
 0x29a   :  { %v2017_v5 = vpop.permute.xlu0 %2016  ;;  %v2037_v57 = vsel %vm1678_vm15, %v4939_v48, %v1893_v39 }
 0x29b   :  { %v2063_v49 = vsel %vm2058_vm4, %v2054_v51, %v2017_v5 }
 0x29c   :  { %3762 = vmatprep.mubr.msk.f32.mxu1 %vm2071_vm5, %v2063_v49 }
 0x29d   :  { %v1935_v56 = vpop.permute.xlu1 %1934 }
 0x29e   :  { %v2046_v59 = vsel %vm2040_vm13, %v2037_v57, %v1935_v56  ;;  %v2019_v13 = vpop.permute.xlu0 %2018 }
 0x2a1   :  { %v1977_v61 = vpop.permute.xlu1 %1976 }
 0x2a2   :  { %v2055_v30 = vsel %vm2049_vm14, %v2046_v59, %v1977_v61 }
 0x2a3   :  { %v2064_v52 = vsel %vm2058_vm4, %v2055_v30, %v2019_v13 }
 0x2a4   :  { %3763 = vmatmul.mubr.msk.f32.gmra.mrb[4].mxu1 %vm2071_vm5, %v2064_v52 }
 0x2ad   :  { %v1895_v9 = vpop.permute.xlu1 %1894  ;;  %v1937_v10 = vpop.permute.xlu0 %1936 }
 0x2ae   :  { %v2038_v48 = vsel %vm1678_vm15, %v4980_v32, %v1895_v9 }
 0x2af   :  { %v2047_v3 = vsel %vm2040_vm13, %v2038_v48, %v1937_v10 }
 0x2b1   :  { %v1897_v2 = vpop.permute.xlu1 %1896  ;;  %v1979_v11 = vpop.permute.xlu0 %1978 }
 0x2b2   :  { %v2056_v14 = vsel %vm2049_vm14, %v2047_v3, %v1979_v11  ;;  %v2039_v22 = vsel %vm1678_vm15, %v5016_v25, %v1897_v2  ;;  %vm3502_vm15 = vcmask 25600  }
 0x2b5   :  { %v1939_v19 = vpop.permute.xlu1 %1938  ;;  %v2021_v55 = vpop.permute.xlu0 %2020 }
 0x2b6   :  { %v2065_v20 = vsel %vm2058_vm4, %v2056_v14, %v2021_v55  ;;  %v2048_v41 = vsel %vm2040_vm13, %v2039_v22, %v1939_v19 }
 0x2b7   :  { %3765 = vmatprep.mubr.msk.f32.mxu1 %vm2071_vm5, %v2065_v20 }
 0x2b9   :  { %v1981_v21 = vpop.permute.xlu1 %1980 }
 0x2ba   :  { %v2057_v32 = vsel %vm2049_vm14, %v2048_v41, %v1981_v21 }
 0x2bd   :  { %v2023_v8 = vpop.permute.xlu1 %2022 }
 0x2be   :  { %v2066_v23 = vsel %vm2058_vm4, %v2057_v32, %v2023_v8 }
 0x2bf   :  { %3766 = vmatmul.mubr.msk.f32.gmra.mrb[6].mxu1 %vm2071_vm5, %v2066_v23 }
 0x319   :  { %v3758_v25 = vpop.f32.mrb[0].mxu1 }
 0x31a   :  { %v2168_v58 = vadd.f32 %v3758_v25, %v5090_v4  ;;  %v2162_v17 = vpop.f32.mrb[1].mxu1 }
 0x31b   :  { %v2163_v26 = vadd.f32 %v2162_v17, %v5090_v4 }
 0x31c   :  { %v2202_v7 = vmax.f32 %v2168_v58, 0.0 }
 0x31d   :  { %v2201_v0 = vmax.f32 %v2163_v26, 0.0 }
 0x31e   :  { %v2234_v60 = vcombine.high %v2202_v7, %v2202_v7  ;;  %v2241_v50 = vrot.slane %v2202_v7, %v4662_v53 }
 0x31f   :  { %v2217_v24 = vcombine.high %v2201_v0, %v2201_v0  ;;  %v2224_v42 = vrot.slane %v2201_v0, %v4662_v53 }
 0x320   :  { %v2248_v28 = vrot.slane %v2234_v60, %v4662_v53  ;;  %v2249_v62 = vcombine.high %v2241_v50, %v2241_v50  ;;  %v2414_v29 = vsel %vm2385_vm2, %v2241_v50, -inf }
 0x321   :  { %v2415_v33 = vrot.slane %v2414_v29, 4  ;;  %v2231_v34 = vrot.slane %v2217_v24, %v4662_v53  ;;  %v2232_v1 = vcombine.high %v2224_v42, %v2224_v42  ;;  %v2386_v6 = vsel %vm2385_vm2, %v2224_v42, -inf }
 0x322   :  { %v2250_v18 = vcombine.high %v2248_v28, %v2248_v28  ;;  %v2421_v35 = vsel %vm2385_vm2, %v2249_v62, -inf  ;;  %v2428_v63 = vsel %vm2385_vm2, %v2248_v28, -inf  ;;  %v2387_v37 = vrot.slane %v2386_v6, 4 }
 0x323   :  { %v2416_v40 = vmax.f32 %v2414_v29, %v2415_v33  ;;  %v2422_v43 = vrot.slane %v2421_v35, 4  ;;  %v2429_v36 = vrot.slane %v2428_v63, 4  ;;  %v2233_v46 = vcombine.high %v2231_v34, %v2231_v34 }
 0x324   :  { %v2435_v44 = vsel %vm2385_vm2, %v2250_v18, -inf  ;;  %v2388_v54 = vmax.f32 %v2386_v6, %v2387_v37  ;;  %v2393_v47 = vsel %vm2385_vm2, %v2232_v1, -inf  ;;  %v2400_v12 = vsel %vm2385_vm2, %v2231_v34, -inf }
 0x325   :  { %v2423_v38 = vmax.f32 %v2421_v35, %v2422_v43  ;;  %v2430_v39 = vmax.f32 %v2428_v63, %v2429_v36  ;;  %v2436_v31 = vrot.slane %v2435_v44, 4  ;;  %v2394_v5 = vrot.slane %v2393_v47, 4 }
 0x326   :  { %v2389_v51 = vrot.slane %v2388_v54, 2  ;;  %v2401_v49 = vrot.slane %v2400_v12, 4  ;;  %v2407_v56 = vsel %vm2385_vm2, %v2233_v46, -inf  ;;  %v2417_v57 = vrot.slane %v2416_v40, 2 }
 0x327   :  { %v2424_v59 = vrot.slane %v2423_v38, 2  ;;  %v2437_v61 = vmax.f32 %v2435_v44, %v2436_v31  ;;  %v2395_v30 = vmax.f32 %v2393_v47, %v2394_v5  ;;  %v2408_v9 = vrot.slane %v2407_v56, 4 }
 0x328   :  { %v2390_v13 = vmax.f32 %v2388_v54, %v2389_v51  ;;  %v2402_v52 = vmax.f32 %v2400_v12, %v2401_v49  ;;  %v2431_v10 = vrot.slane %v2430_v39, 2  ;;  %v2418_v14 = vmax.f32 %v2416_v40, %v2417_v57 }
 0x329   :  { %v2438_v48 = vrot.slane %v2437_v61, 2  ;;  %v2396_v2 = vrot.slane %v2395_v30, 2  ;;  %v2409_v3 = vmax.f32 %v2407_v56, %v2408_v9  ;;  %v2425_v19 = vmax.f32 %v2423_v38, %v2424_v59 }
 0x32a   :  { %v2403_v11 = vrot.slane %v2402_v52, 2  ;;  %v2391_v55 = vrot.slane %v2390_v13, 1  ;;  %v2432_v41 = vmax.f32 %v2430_v39, %v2431_v10  ;;  %v2419_v25 = vrot.slane %v2418_v14, 1 }
 0x32b   :  { %v2397_v20 = vmax.f32 %v2395_v30, %v2396_v2  ;;  %v2410_v22 = vrot.slane %v2409_v3, 2  ;;  %v2439_v32 = vmax.f32 %v2437_v61, %v2438_v48  ;;  %v2426_v58 = vrot.slane %v2425_v19, 1 }
 0x32c   :  { %v2404_v21 = vmax.f32 %v2402_v52, %v2403_v11  ;;  %v2392_v17 = vmax.f32 %v2390_v13, %v2391_v55  ;;  %v2433_v60 = vrot.slane %v2432_v41, 1  ;;  %v2420_v28 = vmax.f32 %v2418_v14, %v2419_v25 }
 0x32d   :  { %v2398_v8 = vrot.slane %v2397_v20, 1  ;;  %v2411_v16 = vmax.f32 %v2409_v3, %v2410_v22  ;;  %v2440_v50 = vrot.slane %v2439_v32, 1  ;;  %v2427_v29 = vmax.f32 %v2425_v19, %v2426_v58 }
 0x32e   :  { %v2405_v23 = vrot.slane %v2404_v21, 1  ;;  %v2434_v34 = vmax.f32 %v2432_v41, %v2433_v60 }
 0x32f   :  { %v2399_v26 = vmax.f32 %v2397_v20, %v2398_v8  ;;  %v2412_v0 = vrot.slane %v2411_v16, 1  ;;  %v2441_v18 = vmax.f32 %v2439_v32, %v2440_v50 }
 0x330   :  { %v2406_v7 = vmax.f32 %v2404_v21, %v2405_v23 }
 0x331   :  { %v2413_v24 = vmax.f32 %v2411_v16, %v2412_v0  ;;  %v2648_v42 = vsel %vm1754_vm6, %v2399_v26, %v2392_v17 }
 0x332   :  { %v2649_v62 = vsel %vm1756_vm7, %v2406_v7, %v2648_v42 }
 0x333   :  { %v2650_v33 = vsel %vm1758_vm8, %v2413_v24, %v2649_v62  ;;  %v3553_v62 = vld [vmem:[%s5588_s1 + $0xc0] sm:$0xff] }
 0x334   :  { %v2651_v1 = vsel %vm1760_vm9, %v2420_v28, %v2650_v33 }
 0x335   :  { %v2652_v35 = vsel %vm1762_vm10, %v2427_v29, %v2651_v1 }
 0x336   :  { %v2653_v40 = vsel %vm1764_vm11, %v2434_v34, %v2652_v35  ;;  %v3556_v35 = vld [vmem:[%s5588_s1 + $0xd8] sm:$0xff] }
 0x337   :  { %v3761_v6 = vpop.f32.mrb[2].mxu1  ;;  %v2654_v36 = vsel %vm1766_vm12, %v2441_v18, %v2653_v40  ;;  %v3555_v18 = vld [vmem:[%s5588_s1 + $0xd0] sm:$0xff] }
 0x338   :  { %v2178_v63 = vadd.f32 %v3761_v6, %v5090_v4  ;;  %v2172_v37 = vpop.f32.mrb[3].mxu1  ;;  %2680 = vst.msk [vmem:[#allocation3 + $0x1] sm:$0xff] %vm2040_vm13, %v2654_v36  ;;  %v3554_v6 = vld [vmem:[%s5588_s1 + $0xc8] sm:$0xff] }
 0x339   :  { %v2173_v43 = vadd.f32 %v2172_v37, %v5090_v4 }
 0x33a   :  { %v2204_v46 = vmax.f32 %v2178_v63, 0.0 }
 0x33b   :  { %v2203_v44 = vmax.f32 %v2173_v43, 0.0 }
 0x33c   :  { %v2268_v54 = vcombine.high %v2204_v46, %v2204_v46  ;;  %v2275_v47 = vrot.slane %v2204_v46, %v4662_v53 }
 0x33d   :  { %v2251_v12 = vcombine.high %v2203_v44, %v2203_v44  ;;  %v2258_v38 = vrot.slane %v2203_v44, %v4662_v53 }
 0x33e   :  { %v2282_v39 = vrot.slane %v2268_v54, %v4662_v53  ;;  %v2283_v31 = vcombine.high %v2275_v47, %v2275_v47  ;;  %v2470_v51 = vsel %vm2385_vm2, %v2275_v47, -inf  ;;  %v3859_v54 = vpack.c.bf16 %v3554_v6, %v3553_v62 }
 0x33f   :  { %v2471_v5 = vrot.slane %v2470_v51, 4  ;;  %v2265_v49 = vrot.slane %v2251_v12, %v4662_v53  ;;  %v2266_v56 = vcombine.high %v2258_v38, %v2258_v38  ;;  %v2442_v57 = vsel %vm2385_vm2, %v2258_v38, -inf }
 0x340   :  { %v2284_v59 = vcombine.high %v2282_v39, %v2282_v39  ;;  %v2477_v61 = vsel %vm2385_vm2, %v2283_v31, -inf  ;;  %v2484_v13 = vsel %vm2385_vm2, %v2282_v39, -inf  ;;  %v2443_v30 = vrot.slane %v2442_v57, 4  ;;  %3860 = vmatprep.subr.bf16.mxu0 %v3859_v54 }
 0x341   :  { %v2472_v52 = vmax.f32 %v2470_v51, %v2471_v5  ;;  %v2478_v9 = vrot.slane %v2477_v61, 4  ;;  %v2485_v10 = vrot.slane %v2484_v13, 4  ;;  %v2267_v48 = vcombine.high %v2265_v49, %v2265_v49  ;;  %v3557_v51 = vld [vmem:[%s5588_s1 + $0xe0] sm:$0xff]  ;;  %v3558_v5 = vld [vmem:[%s5588_s1 + $0xe8] sm:$0xff]  ;;  %3862 = vmatpush3.bf16.msra.mxu0 %v3859_v54 }
 0x342   :  { %v2491_v2 = vsel %vm2385_vm2, %v2284_v59, -inf  ;;  %v2444_v11 = vmax.f32 %v2442_v57, %v2443_v30  ;;  %v2449_v3 = vsel %vm2385_vm2, %v2266_v56, -inf  ;;  %v2456_v14 = vsel %vm2385_vm2, %v2265_v49, -inf }
 0x343   :  { %v2479_v19 = vmax.f32 %v2477_v61, %v2478_v9  ;;  %v2486_v55 = vmax.f32 %v2484_v13, %v2485_v10  ;;  %v2492_v20 = vrot.slane %v2491_v2, 4  ;;  %v2450_v22 = vrot.slane %v2449_v3, 4  ;;  %v3559_v10 = vld [vmem:[%s5588_s1 + $0xf0] sm:$0xff] }
 0x344   :  { %v2445_v21 = vrot.slane %v2444_v11, 2  ;;  %v2457_v41 = vrot.slane %v2456_v14, 4  ;;  %v2463_v32 = vsel %vm2385_vm2, %v2267_v48, -inf  ;;  %v2473_v8 = vrot.slane %v2472_v52, 2  ;;  %v3560_v48 = vld [vmem:[%s5588_s1 + $0xf8] sm:$0xff] }
 0x345   :  { %v2480_v23 = vrot.slane %v2479_v19, 2  ;;  %v2493_v16 = vmax.f32 %v2491_v2, %v2492_v20  ;;  %v2451_v58 = vmax.f32 %v2449_v3, %v2450_v22  ;;  %v2464_v26 = vrot.slane %v2463_v32, 4  ;;  %v3562_v22 = vld [vmem:[%s5588_s1 + $0x108] sm:$0xff] }
 0x346   :  { %v2446_v25 = vmax.f32 %v2444_v11, %v2445_v21  ;;  %v2458_v17 = vmax.f32 %v2456_v14, %v2457_v41  ;;  %v2487_v7 = vrot.slane %v2486_v55, 2  ;;  %v2474_v42 = vmax.f32 %v2472_v52, %v2473_v8  ;;  %v3561_v21 = vld [vmem:[%s5588_s1 + $0x100] sm:$0xff]  ;;  %v3564_v8 = vld [vmem:[%s5588_s1 + $0x118] sm:$0xff] }
 0x347   :  { %v2494_v0 = vrot.slane %v2493_v16, 2  ;;  %v2452_v60 = vrot.slane %v2451_v58, 2  ;;  %v2465_v24 = vmax.f32 %v2463_v32, %v2464_v26  ;;  %v2481_v28 = vmax.f32 %v2479_v19, %v2480_v23  ;;  %v3563_v32 = vld [vmem:[%s5588_s1 + $0x110] sm:$0xff] }
 0x348   :  { %v2459_v50 = vrot.slane %v2458_v17, 2  ;;  %v2447_v29 = vrot.slane %v2446_v25, 1  ;;  %v2488_v63 = vmax.f32 %v2486_v55, %v2487_v7  ;;  %v2475_v46 = vrot.slane %v2474_v42, 1  ;;  %v5172_v23 = vld [vmem:[#allocation3] sm:$0xff] }
 0x349   :  { %v2453_v33 = vmax.f32 %v2451_v58, %v2452_v60  ;;  %v2466_v1 = vrot.slane %v2465_v24, 2  ;;  %v2495_v37 = vmax.f32 %v2493_v16, %v2494_v0  ;;  %v2482_v44 = vrot.slane %v2481_v28, 1 }
 0x34a   :  { %v2460_v34 = vmax.f32 %v2458_v17, %v2459_v50  ;;  %v3863_v47 = vpack.c.bf16 %v3556_v35, %v3555_v18  ;;  %v2448_v12 = vmax.f32 %v2446_v25, %v2447_v29  ;;  %v2489_v49 = vrot.slane %v2488_v63, 1 }
 0x34b   :  { %v2454_v40 = vrot.slane %v2453_v33, 1  ;;  %v2467_v36 = vmax.f32 %v2465_v24, %v2466_v1  ;;  %v2496_v56 = vrot.slane %v2495_v37, 1  ;;  %v2476_v61 = vmax.f32 %v2474_v42, %v2475_v46 }
 0x34c   :  { %v2461_v43 = vrot.slane %v2460_v34, 1  ;;  %3864 = vmatprep.subr.bf16.mxu0 %v3863_v47  ;;  %v3867_v30 = vpack.c.bf16 %v3558_v5, %v3557_v51  ;;  %v2483_v52 = vmax.f32 %v2481_v28, %v2482_v44  ;;  %v2490_v2 = vmax.f32 %v2488_v63, %v2489_v49 }
 0x34d   :  { %v2455_v38 = vmax.f32 %v2453_v33, %v2454_v40  ;;  %v2468_v31 = vrot.slane %v2467_v36, 1  ;;  %v2497_v3 = vmax.f32 %v2495_v37, %v2496_v56  ;;  %3866 = vmatpush3.bf16.msra.mxu0 %v3863_v47  ;;  %v3871_v55 = vpack.c.bf16 %v3560_v48, %v3559_v10 }
 0x34e   :  { %v2462_v39 = vmax.f32 %v2460_v34, %v2461_v43  ;;  %3868 = vmatprep.subr.bf16.mxu0 %v3867_v30  ;;  %v3875_v41 = vpack.c.bf16 %v3562_v22, %v3561_v21  ;;  %v3879_v16 = vpack.c.bf16 %v3564_v8, %v3563_v32  ;;  %v2709_v7 = vrot.slane %v5172_v23, 1 }
 0x34f   :  { %v2469_v57 = vmax.f32 %v2467_v36, %v2468_v31  ;;  %v2655_v59 = vsel %vm1754_vm6, %v2455_v38, %v2448_v12  ;;  %v2731_v42 = vrot.slane %v5172_v23, 2 }
 0x350   :  { %v2656_v13 = vsel %vm1756_vm7, %v2462_v39, %v2655_v59 }
 0x351   :  { %v2657_v9 = vsel %vm1758_vm8, %v2469_v57, %v2656_v13  ;;  %3870 = vmatpush3.bf16.msra.mxu0 %v3867_v30 }
 0x352   :  { %v2658_v11 = vsel %vm1760_vm9, %v2476_v61, %v2657_v9  ;;  %3872 = vmatprep.subr.bf16.mxu0 %v3871_v55 }
 0x353   :  { %v2659_v14 = vsel %vm1762_vm10, %v2483_v52, %v2658_v11 }
 0x354   :  { %v2660_v19 = vsel %vm1764_vm11, %v2490_v2, %v2659_v14 }
 0x355   :  { %v2661_v20 = vsel %vm1766_vm12, %v2497_v3, %v2660_v19  ;;  %3874 = vmatpush3.bf16.msra.mxu0 %v3871_v55 }
 0x356   :  { %2681 = vst.msk [vmem:[#allocation3 + $0x9] sm:$0xff] %vm2040_vm13, %v2661_v20  ;;  %3876 = vmatprep.subr.bf16.mxu0 %v3875_v41 }
 0x359   :  { %3878 = vmatpush3.bf16.msra.mxu0 %v3875_v41 }
 0x35a   :  { %3880 = vmatprep.subr.bf16.mxu0 %v3879_v16 }
 0x35d   :  { %v5174_v25 = vld [vmem:[#allocation3 + $0x8] sm:$0xff]  ;;  %v2686_v58 = vld [vmem:[#allocation3 + $0x10] sm:$0x3]  ;;  %3882 = vmatpush3.bf16.msra.mxu0 %v3879_v16 }
 0x35e   :  { %v2710_v17 = vrot.slane %v5174_v25, 1  ;;  %v2712_v26 = vrot.slane %v2686_v58, 1  ;;  %v2732_v50 = vrot.slane %v5174_v25, 2  ;;  %v2734_v24 = vrot.slane %v2686_v58, 2 }
 0x360   :  { %v2713_v0 = vsel %vm60_vm1, %v2710_v17, %v2712_v26  ;;  %v2711_v60 = vsel %vm60_vm1, %v2709_v7, %v2710_v17  ;;  %v2735_v28 = vsel %vm143_vm0, %v2732_v50, %v2734_v24  ;;  %v2733_v62 = vsel %vm143_vm0, %v2731_v42, %v2732_v50 }
 0x361   :  { %2721 = vrot.lane.b32.xlu1 %v2713_v0, %s4036_s26  ;;  %2719 = vrot.lane.b32.xlu0 %v2711_v60, %s4036_s26 }
 0x365   :  { %2743 = vrot.lane.b32.xlu1 %v2735_v28, %s4038_s29  ;;  %2741 = vrot.lane.b32.xlu0 %v2733_v62, %s4038_s29 }
 0x377   :  { %v3764_v29 = vpop.f32.mrb[4].mxu1 }
 0x378   :  { %v2188_v33 = vadd.f32 %v3764_v29, %v5090_v4  ;;  %v2182_v34 = vpop.f32.mrb[5].mxu1 }
 0x379   :  { %v2183_v1 = vadd.f32 %v2182_v34, %v5090_v4 }
 0x37a   :  { %v2206_v6 = vmax.f32 %v2188_v33, 0.0 }
 0x37b   :  { %v2205_v18 = vmax.f32 %v2183_v1, 0.0 }
 0x37c   :  { %v2302_v35 = vcombine.high %v2206_v6, %v2206_v6  ;;  %v2309_v63 = vrot.slane %v2206_v6, %v4662_v53 }
 0x37d   :  { %v2285_v37 = vcombine.high %v2205_v18, %v2205_v18  ;;  %v2292_v40 = vrot.slane %v2205_v18, %v4662_v53 }
 0x37e   :  { %v2316_v43 = vrot.slane %v2302_v35, %v4662_v53  ;;  %v2317_v36 = vcombine.high %v2309_v63, %v2309_v63  ;;  %v2526_v46 = vsel %vm2385_vm2, %v2309_v63, -inf }
 0x37f   :  { %v2527_v44 = vrot.slane %v2526_v46, 4  ;;  %v2299_v54 = vrot.slane %v2285_v37, %v4662_v53  ;;  %v2300_v47 = vcombine.high %v2292_v40, %v2292_v40  ;;  %v2498_v12 = vsel %vm2385_vm2, %v2292_v40, -inf }
 0x380   :  { %v2318_v38 = vcombine.high %v2316_v43, %v2316_v43  ;;  %v2533_v39 = vsel %vm2385_vm2, %v2317_v36, -inf  ;;  %v2540_v31 = vsel %vm2385_vm2, %v2316_v43, -inf  ;;  %v2499_v51 = vrot.slane %v2498_v12, 4 }
 0x381   :  { %v2528_v5 = vmax.f32 %v2526_v46, %v2527_v44  ;;  %v2534_v49 = vrot.slane %v2533_v39, 4  ;;  %v2541_v56 = vrot.slane %v2540_v31, 4  ;;  %v2301_v57 = vcombine.high %v2299_v54, %v2299_v54 }
 0x382   :  { %v2547_v59 = vsel %vm2385_vm2, %v2318_v38, -inf  ;;  %v2500_v61 = vmax.f32 %v2498_v12, %v2499_v51  ;;  %v2505_v13 = vsel %vm2385_vm2, %v2300_v47, -inf  ;;  %v2512_v30 = vsel %vm2385_vm2, %v2299_v54, -inf }
 0x383   :  { %v2535_v52 = vmax.f32 %v2533_v39, %v2534_v49  ;;  %v2542_v9 = vmax.f32 %v2540_v31, %v2541_v56  ;;  %v2548_v10 = vrot.slane %v2547_v59, 4  ;;  %v2506_v2 = vrot.slane %v2505_v13, 4 }
 0x384   :  { %v2501_v48 = vrot.slane %v2500_v61, 2  ;;  %v2513_v11 = vrot.slane %v2512_v30, 4  ;;  %v2519_v3 = vsel %vm2385_vm2, %v2301_v57, -inf  ;;  %v2529_v14 = vrot.slane %v2528_v5, 2 }
 0x385   :  { %v2536_v19 = vrot.slane %v2535_v52, 2  ;;  %v2549_v55 = vmax.f32 %v2547_v59, %v2548_v10  ;;  %v2507_v21 = vmax.f32 %v2505_v13, %v2506_v2  ;;  %v2520_v41 = vrot.slane %v2519_v3, 4 }
 0x386   :  { %v2502_v20 = vmax.f32 %v2500_v61, %v2501_v48  ;;  %v2514_v22 = vmax.f32 %v2512_v30, %v2513_v11  ;;  %v2543_v32 = vrot.slane %v2542_v9, 2  ;;  %v2530_v26 = vmax.f32 %v2528_v5, %v2529_v14 }
 0x387   :  { %v2550_v8 = vrot.slane %v2549_v55, 2  ;;  %v2508_v16 = vrot.slane %v2507_v21, 2  ;;  %v2521_v17 = vmax.f32 %v2519_v3, %v2520_v41  ;;  %v2537_v7 = vmax.f32 %v2535_v52, %v2536_v19 }
 0x388   :  { %v2515_v58 = vrot.slane %v2514_v22, 2  ;;  %v2503_v0 = vrot.slane %v2502_v20, 1  ;;  %v2544_v42 = vmax.f32 %v2542_v9, %v2543_v32  ;;  %v2531_v34 = vrot.slane %v2530_v26, 1 }
 0x389   :  { %v2509_v60 = vmax.f32 %v2507_v21, %v2508_v16  ;;  %v2522_v24 = vrot.slane %v2521_v17, 2  ;;  %v2551_v28 = vmax.f32 %v2549_v55, %v2550_v8  ;;  %v2538_v1 = vrot.slane %v2537_v7, 1 }
 0x38a   :  { %v2516_v50 = vmax.f32 %v2514_v22, %v2515_v58  ;;  %v2504_v6 = vmax.f32 %v2502_v20, %v2503_v0  ;;  %v2545_v37 = vrot.slane %v2544_v42, 1  ;;  %v2532_v46 = vmax.f32 %v2530_v26, %v2531_v34 }
 0x38b   :  { %v2510_v62 = vrot.slane %v2509_v60, 1  ;;  %v2523_v33 = vmax.f32 %v2521_v17, %v2522_v24  ;;  %v2552_v40 = vrot.slane %v2551_v28, 1  ;;  %v2539_v54 = vmax.f32 %v2537_v7, %v2538_v1 }
 0x38c   :  { %v2517_v29 = vrot.slane %v2516_v50, 1  ;;  %v2546_v38 = vmax.f32 %v2544_v42, %v2545_v37 }
 0x38d   :  { %v2511_v18 = vmax.f32 %v2509_v60, %v2510_v62  ;;  %v2524_v63 = vrot.slane %v2523_v33, 1  ;;  %v2553_v5 = vmax.f32 %v2551_v28, %v2552_v40 }
 0x38e   :  { %v2518_v35 = vmax.f32 %v2516_v50, %v2517_v29 }
 0x38f   :  { %v2525_v43 = vmax.f32 %v2523_v33, %v2524_v63  ;;  %v2662_v36 = vsel %vm1754_vm6, %v2511_v18, %v2504_v6 }
 0x390   :  { %v2663_v44 = vsel %vm1756_vm7, %v2518_v35, %v2662_v36 }
 0x391   :  { %v2664_v47 = vsel %vm1758_vm8, %v2525_v43, %v2663_v44 }
 0x392   :  { %v3767_v12 = vpop.f32.mrb[6].mxu1  ;;  %v2665_v39 = vsel %vm1760_vm9, %v2532_v46, %v2664_v47 }
 0x393   :  { %v2198_v31 = vadd.f32 %v3767_v12, %v5090_v4  ;;  %v2192_v51 = vpop.f32.mrb[7].mxu1  ;;  %v2666_v49 = vsel %vm1762_vm10, %v2539_v54, %v2665_v39 }
 0x394   :  { %v2193_v56 = vadd.f32 %v2192_v51, %v5090_v4  ;;  %v2667_v57 = vsel %vm1764_vm11, %v2546_v38, %v2666_v49 }
 0x395   :  { %v2208_v59 = vmax.f32 %v2198_v31, 0.0  ;;  %v2668_v61 = vsel %vm1766_vm12, %v2553_v5, %v2667_v57 }
 0x396   :  { %v2207_v13 = vmax.f32 %v2193_v56, 0.0  ;;  %2682 = vst.msk [vmem:[#allocation3 + $0x19] sm:$0xff] %vm2040_vm13, %v2668_v61 }
 0x397   :  { %v2336_v30 = vcombine.high %v2208_v59, %v2208_v59  ;;  %v2343_v52 = vrot.slane %v2208_v59, %v4662_v53 }
 0x398   :  { %v2319_v9 = vcombine.high %v2207_v13, %v2207_v13  ;;  %v2326_v10 = vrot.slane %v2207_v13, %v4662_v53 }
 0x399   :  { %v2350_v48 = vrot.slane %v2336_v30, %v4662_v53  ;;  %v2351_v2 = vcombine.high %v2343_v52, %v2343_v52  ;;  %v2582_v11 = vsel %vm2385_vm2, %v2343_v52, -inf }
 0x39a   :  { %v2583_v4 = vrot.slane %v2582_v11, 4  ;;  %v2333_v3 = vrot.slane %v2319_v9, %v4662_v53  ;;  %v2334_v14 = vcombine.high %v2326_v10, %v2326_v10  ;;  %v2554_v19 = vsel %vm2385_vm2, %v2326_v10, -inf }
 0x39b   :  { %v2352_v55 = vcombine.high %v2350_v48, %v2350_v48  ;;  %v2589_v20 = vsel %vm2385_vm2, %v2351_v2, -inf  ;;  %v2596_v21 = vsel %vm2385_vm2, %v2350_v48, -inf  ;;  %v2555_v22 = vrot.slane %v2554_v19, 4 }
 0x39c   :  { %v2584_v41 = vmax.f32 %v2582_v11, %v2583_v4  ;;  %v2590_v32 = vrot.slane %v2589_v20, 4  ;;  %v2597_v8 = vrot.slane %v2596_v21, 4  ;;  %v2335_v16 = vcombine.high %v2333_v3, %v2333_v3 }
 0x39d   :  { %v2603_v58 = vsel %vm2385_vm2, %v2352_v55, -inf  ;;  %v2556_v17 = vmax.f32 %v2554_v19, %v2555_v22  ;;  %v2561_v26 = vsel %vm2385_vm2, %v2334_v14, -inf  ;;  %v2568_v7 = vsel %vm2385_vm2, %v2333_v3, -inf }
 0x39e   :  { %v2591_v0 = vmax.f32 %v2589_v20, %v2590_v32  ;;  %v2598_v60 = vmax.f32 %v2596_v21, %v2597_v8  ;;  %v2604_v50 = vrot.slane %v2603_v58, 4  ;;  %v2562_v42 = vrot.slane %v2561_v26, 4 }
 0x39f   :  { %v2557_v24 = vrot.slane %v2556_v17, 2  ;;  %v2569_v28 = vrot.slane %v2568_v7, 4  ;;  %v2575_v62 = vsel %vm2385_vm2, %v2335_v16, -inf  ;;  %v2585_v29 = vrot.slane %v2584_v41, 2 }
 0x3a0   :  { %v2592_v33 = vrot.slane %v2591_v0, 2  ;;  %v2605_v34 = vmax.f32 %v2603_v58, %v2604_v50  ;;  %v2563_v6 = vmax.f32 %v2561_v26, %v2562_v42  ;;  %v2576_v35 = vrot.slane %v2575_v62, 4 }
 0x3a1   :  { %v2558_v1 = vmax.f32 %v2556_v17, %v2557_v24  ;;  %v2570_v18 = vmax.f32 %v2568_v7, %v2569_v28  ;;  %v2599_v63 = vrot.slane %v2598_v60, 2  ;;  %v2586_v46 = vmax.f32 %v2584_v41, %v2585_v29  ;;  %v2687_v41 = vld [vmem:[#allocation3 + $0x18] sm:$0xff] }
 0x3a2   :  { %v2606_v37 = vrot.slane %v2605_v34, 2  ;;  %v2564_v40 = vrot.slane %v2563_v6, 2  ;;  %v2577_v36 = vmax.f32 %v2575_v62, %v2576_v35  ;;  %v2593_v44 = vmax.f32 %v2591_v0, %v2592_v33 }
 0x3a3   :  { %v2571_v43 = vrot.slane %v2570_v18, 2  ;;  %v2559_v54 = vrot.slane %v2558_v1, 1  ;;  %v2600_v39 = vmax.f32 %v2598_v60, %v2599_v63  ;;  %v2587_v56 = vrot.slane %v2586_v46, 1 }
 0x3a4   :  { %v2565_v47 = vmax.f32 %v2563_v6, %v2564_v40  ;;  %v2578_v38 = vrot.slane %v2577_v36, 2  ;;  %v2607_v31 = vmax.f32 %v2605_v34, %v2606_v37  ;;  %v2594_v57 = vrot.slane %v2593_v44, 1 }
 0x3a5   :  { %v2572_v12 = vmax.f32 %v2570_v18, %v2571_v43  ;;  %v2560_v59 = vmax.f32 %v2558_v1, %v2559_v54  ;;  %v2601_v52 = vrot.slane %v2600_v39, 1  ;;  %v2588_v2 = vmax.f32 %v2586_v46, %v2587_v56 }
 0x3a6   :  { %v2566_v51 = vrot.slane %v2565_v47, 1  ;;  %v2579_v49 = vmax.f32 %v2577_v36, %v2578_v38  ;;  %v2608_v9 = vrot.slane %v2607_v31, 1  ;;  %v2595_v4 = vmax.f32 %v2593_v44, %v2594_v57 }
 0x3a7   :  { %v2573_v5 = vrot.slane %v2572_v12, 1  ;;  %v2602_v14 = vmax.f32 %v2600_v39, %v2601_v52  ;;  %v2714_v17 = vrot.slane %v2687_v41, 1  ;;  %v2736_v50 = vrot.slane %v2687_v41, 2 }
 0x3a8   :  { %v2567_v61 = vmax.f32 %v2565_v47, %v2566_v51  ;;  %v2580_v30 = vrot.slane %v2579_v49, 1  ;;  %v2609_v55 = vmax.f32 %v2607_v31, %v2608_v9  ;;  %v2763_v46 = vsub.s32 2, %v4652_v15 }
 0x3a9   :  { %v2574_v13 = vmax.f32 %v2572_v12, %v2573_v5 }
 0x3aa   :  { %v2581_v10 = vmax.f32 %v2579_v49, %v2580_v30  ;;  %v2669_v48 = vsel %vm1754_vm6, %v2567_v61, %v2560_v59  ;;  %v5256_v44 = vrot.slane %v5087_v27, %v2763_v46  ;;  %v3220_v46 = vld [vmem:[%s5590_s3 + $0x88] sm:$0xff] }
 0x3ab   :  { %v2670_v11 = vsel %vm1756_vm7, %v2574_v13, %v2669_v48 }
 0x3ac   :  { %v2671_v3 = vsel %vm1758_vm8, %v2581_v10, %v2670_v11 }
 0x3ad   :  { %v2672_v19 = vsel %vm1760_vm9, %v2588_v2, %v2671_v3 }
 0x3ae   :  { %v2673_v20 = vsel %vm1762_vm10, %v2595_v4, %v2672_v19 }
 0x3af   :  { %v2674_v21 = vsel %vm1764_vm11, %v2602_v14, %v2673_v20 }
 0x3b0   :  { %v2675_v22 = vsel %vm1766_vm12, %v2609_v55, %v2674_v21 }
 0x3b1   :  { %2683 = vst.msk [vmem:[#allocation3 + $0x21] sm:$0xff] %vm2040_vm13, %v2675_v22 }
 0x3b8   :  { %v2688_v32 = vld [vmem:[#allocation3 + $0x20] sm:$0xff]  ;;  %v2689_v8 = vld [vmem:[#allocation3 + $0x28] sm:$0x3] }
 0x3b9   :  { %v2715_v16 = vrot.slane %v2688_v32, 1  ;;  %v2717_v58 = vrot.slane %v2689_v8, 1  ;;  %v2737_v0 = vrot.slane %v2688_v32, 2  ;;  %v2739_v60 = vrot.slane %v2689_v8, 2 }
 0x3bb   :  { %v2718_v26 = vsel %vm60_vm1, %v2715_v16, %v2717_v58  ;;  %v2716_v7 = vsel %vm60_vm1, %v2714_v17, %v2715_v16  ;;  %v2740_v24 = vsel %vm143_vm0, %v2737_v0, %v2739_v60  ;;  %v2738_v42 = vsel %vm143_vm0, %v2736_v50, %v2737_v0 }
 0x3bc   :  { %2725 = vrot.lane.b32.xlu1 %v2718_v26, %s4036_s26  ;;  %2723 = vrot.lane.b32.xlu0 %v2716_v7, %s4036_s26  ;;  %vm2955_vm0 = vcmask 517120   ;;  %vm4041_vm1 = vmmov 0  }
 0x3c0   :  { %2747 = vrot.lane.b32.xlu1 %v2740_v24, %s4038_s29  ;;  %2745 = vrot.lane.b32.xlu0 %v2738_v42, %s4038_s29 }
 0x3d3   :  { %v2722_v28 = vpop.permute.xlu1 %2721  ;;  %v2720_v62 = vpop.permute.xlu0 %2719 }
 0x3d4   :  { %v2754_v29 = vsel %vm2040_vm13, %v5174_v25, %v2722_v28  ;;  %v2753_v33 = vsel %vm2040_vm13, %v5172_v23, %v2720_v62 }
 0x3d7   :  { %v2744_v34 = vpop.permute.xlu1 %2743  ;;  %v2742_v1 = vpop.permute.xlu0 %2741 }
 0x3d8   :  { %v2758_v6 = vsel %vm2058_vm4, %v2754_v29, %v2744_v34  ;;  %v2757_v18 = vsel %vm2058_vm4, %v2753_v33, %v2742_v1 }
 0x3d9   :  { %3792 = vmatprep.mubr.msk.f32.mxu0 %vm2765_vm3, %v2757_v18 }
 0x3da   :  { %3793 = vmatmul.mubr.msk.f32.vlgmr.msra.gmra.mrb[16].mxu0 %vm2765_vm3, %v2758_v6 }
 0x42e   :  { %v2726_v35 = vpop.permute.xlu1 %2725  ;;  %v2724_v63 = vpop.permute.xlu0 %2723 }
 0x42f   :  { %v2756_v37 = vsel %vm2040_vm13, %v2688_v32, %v2726_v35  ;;  %v2755_v40 = vsel %vm2040_vm13, %v2687_v41, %v2724_v63 }
 0x432   :  { %v2748_v25 = vpop.permute.xlu1 %2747  ;;  %v2746_v43 = vpop.permute.xlu0 %2745 }
 0x433   :  { %v2760_v23 = vsel %vm2058_vm4, %v2756_v37, %v2748_v25  ;;  %v2759_v36 = vsel %vm2058_vm4, %v2755_v40, %v2746_v43  ;;  %v3219_v25 = vld [vmem:[%s5590_s3 + $0x80] sm:$0xff] }
 0x434   :  { %3795 = vmatprep.mubr.msk.f32.mxu0 %vm2765_vm3, %v2759_v36 }
 0x435   :  { %3796 = vmatmul.mubr.msk.f32.gmra.mrb[18].mxu0 %vm2765_vm3, %v2760_v23 }
 0x4ad   :  { %v3794_v54 = vpop.f32.mrb[16].mxu0 }
 0x4ae   :  { %v2850_v47 = vadd.f32 %v3794_v54, %v5256_v44  ;;  %v2844_v12 = vpop.f32.mrb[17].mxu0  ;;  %v3203_v54 = vld [vmem:[%s5590_s3] sm:$0xff] }
 0x4af   :  { %v2845_v38 = vadd.f32 %v2844_v12, %v5256_v44 }
 0x4b0   :  { %v2864_v39 = vmax.f32 %v2850_v47, 0.0  ;;  %v3204_v47 = vld [vmem:[%s5590_s3 + $0x8] sm:$0xff] }
 0x4b1   :  { %v2863_v31 = vmax.f32 %v2845_v38, 0.0  ;;  %v3251_v38 = vld [vmem:[%s5590_s3 + $0x180] sm:$0xff] }
 0x4b2   :  { %v2888_v51 = vcombine.high %v2864_v39, %v2864_v39  ;;  %v2895_v5 = vrot.slane %v2864_v39, %v4662_v53  ;;  %v3252_v39 = vld [vmem:[%s5590_s3 + $0x188] sm:$0xff] }
 0x4b3   :  { %v2871_v49 = vcombine.high %v2863_v31, %v2863_v31  ;;  %v2878_v56 = vrot.slane %v2863_v31, %v4662_v53  ;;  %v3235_v31 = vld [vmem:[%s5590_s3 + $0x100] sm:$0xff] }
 0x4b4   :  { %v2902_v57 = vrot.slane %v2888_v51, %v4662_v53  ;;  %v2903_v59 = vcombine.high %v2895_v5, %v2895_v5  ;;  %v2984_v27 = vsel %vm2955_vm0, %v2895_v5, 0.0 }
 0x4b5   :  { %v2985_v61 = vrot.slane %v2984_v27, 4  ;;  %v2885_v13 = vrot.slane %v2871_v49, %v4662_v53  ;;  %v2886_v30 = vcombine.high %v2878_v56, %v2878_v56  ;;  %v2956_v52 = vsel %vm2955_vm0, %v2878_v56, 0.0 }
 0x4b6   :  { %v2904_v9 = vcombine.high %v2902_v57, %v2902_v57  ;;  %v2991_v10 = vsel %vm2955_vm0, %v2903_v59, 0.0  ;;  %v2998_v48 = vsel %vm2955_vm0, %v2902_v57, 0.0  ;;  %v2957_v2 = vrot.slane %v2956_v52, 4  ;;  %v3236_v57 = vld [vmem:[%s5590_s3 + $0x108] sm:$0xff]  ;;  %v3221_v59 = vld [vmem:[%s5590_s3 + $0x90] sm:$0xff] }
 0x4b7   :  { %v2986_v11 = vadd.f32 %v2985_v61, %v2984_v27  ;;  %v2992_v4 = vrot.slane %v2991_v10, 4  ;;  %v2999_v3 = vrot.slane %v2998_v48, 4  ;;  %v2887_v14 = vcombine.high %v2885_v13, %v2885_v13  ;;  %v3222_v27 = vld [vmem:[%s5590_s3 + $0x98] sm:$0xff] }
 0x4b8   :  { %v3005_v19 = vsel %vm2955_vm0, %v2904_v9, 0.0  ;;  %v2958_v55 = vadd.f32 %v2957_v2, %v2956_v52  ;;  %v2963_v20 = vsel %vm2955_vm0, %v2886_v30, 0.0  ;;  %v2970_v21 = vsel %vm2955_vm0, %v2885_v13, 0.0  ;;  %v3205_v9 = vld [vmem:[%s5590_s3 + $0x10] sm:$0xff] }
 0x4b9   :  { %v2987_v22 = vrot.slane %v2986_v11, 2  ;;  %v2993_v41 = vadd.f32 %v2992_v4, %v2991_v10  ;;  %v3000_v32 = vadd.f32 %v2999_v3, %v2998_v48  ;;  %v3006_v8 = vrot.slane %v3005_v19, 4  ;;  %v3206_v10 = vld [vmem:[%s5590_s3 + $0x18] sm:$0xff]  ;;  %v3253_v48 = vld [vmem:[%s5590_s3 + $0x190] sm:$0xff] }
 0x4ba   :  { %v2959_v16 = vrot.slane %v2958_v55, 2  ;;  %v2964_v58 = vrot.slane %v2963_v20, 4  ;;  %v2971_v17 = vrot.slane %v2970_v21, 4  ;;  %v2977_v26 = vsel %vm2955_vm0, %v2887_v14, 0.0  ;;  %v3254_v14 = vld [vmem:[%s5590_s3 + $0x198] sm:$0xff] }
 0x4bb   :  { %v2988_v7 = vadd.f32 %v2987_v22, %v2986_v11  ;;  %v2994_v0 = vrot.slane %v2993_v41, 2  ;;  %v3001_v60 = vrot.slane %v3000_v32, 2  ;;  %v3007_v50 = vadd.f32 %v3006_v8, %v3005_v19  ;;  %v3223_v19 = vld [vmem:[%s5590_s3 + $0xa0] sm:$0xff]  ;;  %v3238_v8 = vld [vmem:[%s5590_s3 + $0x118] sm:$0xff] }
 0x4bc   :  { %v2960_v24 = vadd.f32 %v2959_v16, %v2958_v55  ;;  %v2965_v42 = vadd.f32 %v2964_v58, %v2963_v20  ;;  %v2972_v28 = vadd.f32 %v2971_v17, %v2970_v21  ;;  %v2978_v62 = vrot.slane %v2977_v26, 4  ;;  %v3224_v55 = vld [vmem:[%s5590_s3 + $0xa8] sm:$0xff] }
 0x4bd   :  { %v2989_v29 = vrot.slane %v2988_v7, 1  ;;  %v2995_v33 = vadd.f32 %v2994_v0, %v2993_v41  ;;  %v3008_v34 = vrot.slane %v3007_v50, 2  ;;  %v3002_v37 = vadd.f32 %v3001_v60, %v3000_v32  ;;  %v3237_v32 = vld [vmem:[%s5590_s3 + $0x110] sm:$0xff]  ;;  %v3256_v0 = vld [vmem:[%s5590_s3 + $0x1a8] sm:$0xff] }
 0x4be   :  { %v2961_v1 = vrot.slane %v2960_v24, 1  ;;  %v2966_v6 = vrot.slane %v2965_v42, 2  ;;  %v2973_v18 = vrot.slane %v2972_v28, 2  ;;  %v2979_v35 = vadd.f32 %v2978_v62, %v2977_v26 }
 0x4bf   :  { %v2996_v63 = vrot.slane %v2995_v33, 1  ;;  %v3009_v40 = vadd.f32 %v3008_v34, %v3007_v50  ;;  %v2990_v51 = vadd.f32 %v2989_v29, %v2988_v7  ;;  %v3003_v13 = vrot.slane %v3002_v37, 1  ;;  %v3255_v7 = vld [vmem:[%s5590_s3 + $0x1a0] sm:$0xff] }
 0x4c0   :  { %v2967_v43 = vadd.f32 %v2966_v6, %v2965_v42  ;;  %v2974_v23 = vadd.f32 %v2973_v18, %v2972_v28  ;;  %v2980_v36 = vrot.slane %v2979_v35, 2  ;;  %v2962_v12 = vadd.f32 %v2961_v1, %v2960_v24  ;;  %v3207_v42 = vld [vmem:[%s5590_s3 + $0x20] sm:$0xff]  ;;  %v3208_v28 = vld [vmem:[%s5590_s3 + $0x28] sm:$0xff]  ;;  %v3225_v1 = vld [vmem:[%s5590_s3 + $0xb0] sm:$0xff] }
 0x4c1   :  { %v2997_v61 = vadd.f32 %v2996_v63, %v2995_v33  ;;  %v3010_v30 = vrot.slane %v3009_v40, 1  ;;  %v3883_v52 = vpack.c.bf16 %v3220_v46, %v3219_v25  ;;  %v3885_v3 = vpack.c.bf16 %v3204_v47, %v3203_v54  ;;  %v3226_v6 = vld [vmem:[%s5590_s3 + $0xb8] sm:$0xff] }
 0x4c2   :  { %v2968_v5 = vrot.slane %v2967_v43, 1  ;;  %v2975_v49 = vrot.slane %v2974_v23, 1  ;;  %v2981_v56 = vadd.f32 %v2980_v36, %v2979_v35  ;;  %v3069_v20 = vmul.f32 0.5, %v2962_v12  ;;  %v3257_v36 = vld [vmem:[%s5590_s3 + $0x1b0] sm:$0xff]  ;;  %v3258_v46 = vld [vmem:[%s5590_s3 + $0x1b8] sm:$0xff] }
 0x4c3   :  { %3884 = vmatprep.subr.bf16.mxu1 %v3883_v52  ;;  %v3915_v21 = vpack.c.bf16 %v3252_v39, %v3251_v38  ;;  %v3917_v22 = vpack.c.bf16 %v3236_v57, %v3235_v31  ;;  %v3887_v41 = vpack.c.bf16 %v3222_v27, %v3221_v59  ;;  %v3889_v26 = vpack.c.bf16 %v3206_v10, %v3205_v9  ;;  %v3209_v38 = vld [vmem:[%s5590_s3 + $0x30] sm:$0xff]  ;;  %v3210_v39 = vld [vmem:[%s5590_s3 + $0x38] sm:$0xff]  ;;  %v3259_v52 = vld [vmem:[%s5590_s3 + $0x1c0] sm:$0xff] }
 0x4c4   :  { %v2969_v2 = vadd.f32 %v2968_v5, %v2967_v43  ;;  %v2976_v11 = vadd.f32 %v2975_v49, %v2974_v23  ;;  %v2982_v4 = vrot.slane %v2981_v56, 1  ;;  %3886 = vmatpush3.bf16.msra.mxu1 %v3885_v3  ;;  %v3004_v60 = vadd.f32 %v3003_v13, %v3002_v37  ;;  %v3239_v37 = vld [vmem:[%s5590_s3 + $0x120] sm:$0xff]  ;;  %v3241_v27 = vld [vmem:[%s5590_s3 + $0x130] sm:$0xff]  ;;  %v3260_v9 = vld [vmem:[%s5590_s3 + $0x1c8] sm:$0xff] }
 0x4c5   :  { %3916 = vmatprep.subr.bf16.mxu0 %v3915_v21  ;;  %3888 = vmatprep.subr.bf16.mxu1 %v3887_v41  ;;  %v3919_v50 = vpack.c.bf16 %v3254_v14, %v3253_v48  ;;  %v3891_v24 = vpack.c.bf16 %v3224_v55, %v3223_v19  ;;  %v3011_v62 = vadd.f32 %v3010_v30, %v3009_v40  ;;  %v3073_v18 = vmul.f32 0.5, %v2990_v51  ;;  %v3240_v40 = vld [vmem:[%s5590_s3 + $0x128] sm:$0xff]  ;;  %v3227_v49 = vld [vmem:[%s5590_s3 + $0xc0] sm:$0xff]  ;;  %v3230_v3 = vld [vmem:[%s5590_s3 + $0xd8] sm:$0xff] }
 0x4c6   :  { %v2983_v16 = vadd.f32 %v2982_v4, %v2981_v56  ;;  %v3070_v58 = vmul.f32 0.5, %v2969_v2  ;;  %v3071_v17 = vmul.f32 0.5, %v2976_v11  ;;  %3918 = vmatpush3.bf16.msra.mxu0 %v3917_v22  ;;  %v3921_v34 = vpack.c.bf16 %v3238_v8, %v3237_v32  ;;  %v3228_v56 = vld [vmem:[%s5590_s3 + $0xc8] sm:$0xff]  ;;  %v3211_v48 = vld [vmem:[%s5590_s3 + $0x40] sm:$0xff]  ;;  %v3229_v4 = vld [vmem:[%s5590_s3 + $0xd0] sm:$0xff] }
 0x4c7   :  { %3920 = vmatprep.subr.bf16.mxu0 %v3919_v50  ;;  %v3923_v63 = vpack.c.bf16 %v3256_v0, %v3255_v7  ;;  %v3074_v25 = vmul.f32 0.5, %v2997_v61  ;;  %v3893_v23 = vpack.c.bf16 %v3208_v28, %v3207_v42  ;;  %v3075_v54 = vmul.f32 0.5, %v3004_v60  ;;  %v3242_v61 = vld [vmem:[%s5590_s3 + $0x138] sm:$0xff]  ;;  %v3212_v2 = vld [vmem:[%s5590_s3 + $0x48] sm:$0xff]  ;;  %v3243_v19 = vld [vmem:[%s5590_s3 + $0x140] sm:$0xff] }
 0x4c8   :  { %v3072_v29 = vmul.f32 0.5, %v2983_v16  ;;  %v3101_v33 = vsel %vm1754_vm6, %v3070_v58, %v3069_v20  ;;  %3890 = vmatpush3.bf16.msra.mxu1 %v3889_v26  ;;  %v3895_v12 = vpack.c.bf16 %v3226_v6, %v3225_v1  ;;  %v3076_v31 = vmul.f32 0.5, %v3011_v62  ;;  %v3244_v55 = vld [vmem:[%s5590_s3 + $0x148] sm:$0xff]  ;;  %v3261_v21 = vld [vmem:[%s5590_s3 + $0x1d0] sm:$0xff]  ;;  %v3262_v22 = vld [vmem:[%s5590_s3 + $0x1d8] sm:$0xff] }
 0x4c9   :  { %v3102_v35 = vsel %vm1756_vm7, %v3071_v17, %v3101_v33  ;;  %3892 = vmatprep.subr.bf16.mxu1 %v3891_v24  ;;  %v3925_v5 = vpack.c.bf16 %v3240_v40, %v3239_v37  ;;  %v3927_v59 = vpack.c.bf16 %v3258_v46, %v3257_v36  ;;  %v3897_v30 = vpack.c.bf16 %v3210_v39, %v3209_v38  ;;  %v3213_v32 = vld [vmem:[%s5590_s3 + $0x50] sm:$0xff]  ;;  %v3214_v8 = vld [vmem:[%s5590_s3 + $0x58] sm:$0xff]  ;;  %v3231_v58 = vld [vmem:[%s5590_s3 + $0xe0] sm:$0xff] }
 0x4ca   :  { %v3103_v43 = vsel %vm1758_vm8, %v3072_v29, %v3102_v35  ;;  %3922 = vmatpush3.bf16.msra.mxu0 %v3921_v34  ;;  %v3899_v10 = vpack.c.bf16 %v3228_v56, %v3227_v49  ;;  %v3929_v11 = vpack.c.bf16 %v3242_v61, %v3241_v27  ;;  %v3931_v14 = vpack.c.bf16 %v3260_v9, %v3259_v52  ;;  %v3232_v17 = vld [vmem:[%s5590_s3 + $0xe8] sm:$0xff]  ;;  %v3245_v7 = vld [vmem:[%s5590_s3 + $0x150] sm:$0xff]  ;;  %v3246_v0 = vld [vmem:[%s5590_s3 + $0x158] sm:$0xff] }
 0x4cb   :  { %v3104_v47 = vsel %vm1760_vm9, %v3073_v18, %v3103_v43  ;;  %3924 = vmatprep.subr.bf16.mxu0 %v3923_v63  ;;  %v3901_v20 = vpack.c.bf16 %v3212_v2, %v3211_v48  ;;  %v3903_v41 = vpack.c.bf16 %v3230_v3, %v3229_v4  ;;  %v3933_v16 = vpack.c.bf16 %v3244_v55, %v3243_v19  ;;  %v3263_v50 = vld [vmem:[%s5590_s3 + $0x1e0] sm:$0xff]  ;;  %v3264_v24 = vld [vmem:[%s5590_s3 + $0x1e8] sm:$0xff] }
 0x4cc   :  { %v3105_v51 = vsel %vm1762_vm10, %v3074_v25, %v3104_v47  ;;  %3894 = vmatpush3.bf16.msra.mxu1 %v3893_v23  ;;  %v3935_v26 = vpack.c.bf16 %v3262_v22, %v3261_v21  ;;  %v3905_v60 = vpack.c.bf16 %v3214_v8, %v3213_v32  ;;  %v3907_v42 = vpack.c.bf16 %v3232_v17, %v3231_v58  ;;  %v3215_v28 = vld [vmem:[%s5590_s3 + $0x60] sm:$0xff]  ;;  %v3216_v62 = vld [vmem:[%s5590_s3 + $0x68] sm:$0xff] }
 0x4cd   :  { %v3106_v57 = vsel %vm1764_vm11, %v3075_v54, %v3105_v51  ;;  %3896 = vmatprep.subr.bf16.mxu1 %v3895_v12  ;;  %v3937_v29 = vpack.c.bf16 %v3246_v0, %v3245_v7  ;;  %v3939_v33 = vpack.c.bf16 %v3264_v24, %v3263_v50  ;;  %v3247_v34 = vld [vmem:[%s5590_s3 + $0x160] sm:$0xff]  ;;  %v3248_v1 = vld [vmem:[%s5590_s3 + $0x168] sm:$0xff]  ;;  %v3909_v6 = vpack.c.bf16 %v3216_v62, %v3215_v28 }
 0x4ce   :  { %v5381_v13 = vsel %vm1766_vm12, %v3076_v31, %v3106_v57  ;;  %3926 = vmatpush3.bf16.msra.mxu0 %v3925_v5  ;;  %v3941_v18 = vpack.c.bf16 %v3248_v1, %v3247_v34 }
 0x4cf   :  { %3928 = vmatprep.subr.bf16.mxu0 %v3927_v59 }
 0x4d0   :  { %3898 = vmatpush3.bf16.msra.mxu1 %v3897_v30 }
 0x4d1   :  { %3900 = vmatprep.subr.bf16.mxu1 %v3899_v10 }
 0x4d2   :  { %3930 = vmatpush3.bf16.msra.mxu0 %v3929_v11 }
 0x4d3   :  { %3932 = vmatprep.subr.bf16.mxu0 %v3931_v14 }
 0x4d4   :  { %3902 = vmatpush3.bf16.msra.mxu1 %v3901_v20 }
 0x4d5   :  { %3904 = vmatprep.subr.bf16.mxu1 %v3903_v41 }
 0x4d6   :  { %3934 = vmatpush3.bf16.msra.mxu0 %v3933_v16 }
 0x4d7   :  { %3936 = vmatprep.subr.bf16.mxu0 %v3935_v26 }
 0x4d8   :  { %3906 = vmatpush3.bf16.msra.mxu1 %v3905_v60 }
 0x4d9   :  { %3908 = vmatprep.subr.bf16.mxu1 %v3907_v42 }
 0x4da   :  { %3938 = vmatpush3.bf16.msra.mxu0 %v3937_v29 }
 0x4db   :  { %3940 = vmatprep.subr.bf16.mxu0 %v3939_v33 }
 0x4dc   :  { %3910 = vmatpush3.bf16.msra.mxu1 %v3909_v6 }
 0x4de   :  { %3942 = vmatpush3.bf16.msra.mxu0 %v3941_v18 }
 0x508   :  { %v3797_v35 = vpop.f32.mrb[18].mxu0 }
 0x509   :  { %v2860_v63 = vadd.f32 %v3797_v35, %v5256_v44  ;;  %v2854_v37 = vpop.f32.mrb[19].mxu0 }
 0x50a   :  { %v2855_v40 = vadd.f32 %v2854_v37, %v5256_v44 }
 0x50b   :  { %v2866_v25 = vmax.f32 %v2860_v63, 0.0 }
 0x50c   :  { %v2865_v43 = vmax.f32 %v2855_v40, 0.0 }
 0x50d   :  { %v2922_v23 = vcombine.high %v2866_v25, %v2866_v25  ;;  %v2929_v36 = vrot.slane %v2866_v25, %v4662_v53 }
 0x50e   :  { %v2905_v46 = vcombine.high %v2865_v43, %v2865_v43  ;;  %v2912_v54 = vrot.slane %v2865_v43, %v4662_v53 }
 0x50f   :  { %v2936_v47 = vrot.slane %v2922_v23, %v4662_v53  ;;  %v2937_v12 = vcombine.high %v2929_v36, %v2929_v36  ;;  %v3040_v38 = vsel %vm2955_vm0, %v2929_v36, 0.0 }
 0x510   :  { %v3041_v39 = vrot.slane %v3040_v38, 4  ;;  %v2919_v31 = vrot.slane %v2905_v46, %v4662_v53  ;;  %v2920_v51 = vcombine.high %v2912_v54, %v2912_v54  ;;  %v3012_v5 = vsel %vm2955_vm0, %v2912_v54, 0.0 }
 0x511   :  { %v2938_v44 = vcombine.high %v2936_v47, %v2936_v47  ;;  %v3047_v49 = vsel %vm2955_vm0, %v2937_v12, 0.0  ;;  %v3054_v56 = vsel %vm2955_vm0, %v2936_v47, 0.0  ;;  %v3013_v57 = vrot.slane %v3012_v5, 4 }
 0x512   :  { %v3042_v59 = vadd.f32 %v3041_v39, %v3040_v38  ;;  %v3048_v27 = vrot.slane %v3047_v49, 4  ;;  %v3055_v61 = vrot.slane %v3054_v56, 4  ;;  %v2921_v30 = vcombine.high %v2919_v31, %v2919_v31 }
 0x513   :  { %v3061_v52 = vsel %vm2955_vm0, %v2938_v44, 0.0  ;;  %v3014_v9 = vadd.f32 %v3013_v57, %v3012_v5  ;;  %v3019_v10 = vsel %vm2955_vm0, %v2920_v51, 0.0  ;;  %v3026_v48 = vsel %vm2955_vm0, %v2919_v31, 0.0 }
 0x514   :  { %v3043_v2 = vrot.slane %v3042_v59, 2  ;;  %v3049_v11 = vadd.f32 %v3048_v27, %v3047_v49  ;;  %v3056_v4 = vadd.f32 %v3055_v61, %v3054_v56  ;;  %v3062_v3 = vrot.slane %v3061_v52, 4 }
 0x515   :  { %v3015_v14 = vrot.slane %v3014_v9, 2  ;;  %v3020_v19 = vrot.slane %v3019_v10, 4  ;;  %v3027_v55 = vrot.slane %v3026_v48, 4  ;;  %v3033_v20 = vsel %vm2955_vm0, %v2921_v30, 0.0 }
 0x516   :  { %v3050_v21 = vrot.slane %v3049_v11, 2  ;;  %v3057_v22 = vrot.slane %v3056_v4, 2  ;;  %v3063_v41 = vadd.f32 %v3062_v3, %v3061_v52  ;;  %v3034_v58 = vrot.slane %v3033_v20, 4  ;;  %v3233_v3 = vld [vmem:[%s5590_s3 + $0xf0] sm:$0xff] }
 0x517   :  { %v3016_v32 = vadd.f32 %v3015_v14, %v3014_v9  ;;  %v3021_v8 = vadd.f32 %v3020_v19, %v3019_v10  ;;  %v3028_v16 = vadd.f32 %v3027_v55, %v3026_v48  ;;  %v3044_v17 = vadd.f32 %v3043_v2, %v3042_v59  ;;  %v3234_v14 = vld [vmem:[%s5590_s3 + $0xf8] sm:$0xff]  ;;  %v3217_v19 = vld [vmem:[%s5590_s3 + $0x70] sm:$0xff] }
 0x518   :  { %v3051_v26 = vadd.f32 %v3050_v21, %v3049_v11  ;;  %v3064_v7 = vrot.slane %v3063_v41, 2  ;;  %v3035_v24 = vadd.f32 %v3034_v58, %v3033_v20  ;;  %v3058_v42 = vadd.f32 %v3057_v22, %v3056_v4  ;;  %v3249_v58 = vld [vmem:[%s5590_s3 + $0x170] sm:$0xff] }
 0x519   :  { %v3017_v0 = vrot.slane %v3016_v32, 1  ;;  %v3022_v60 = vrot.slane %v3021_v8, 2  ;;  %v3029_v50 = vrot.slane %v3028_v16, 2  ;;  %v3045_v34 = vrot.slane %v3044_v17, 1 }
 0x51a   :  { %v3065_v28 = vadd.f32 %v3064_v7, %v3063_v41  ;;  %v3036_v33 = vrot.slane %v3035_v24, 2  ;;  %v3052_v1 = vrot.slane %v3051_v26, 1  ;;  %v3059_v37 = vrot.slane %v3058_v42, 1  ;;  %v3218_v41 = vld [vmem:[%s5590_s3 + $0x78] sm:$0xff] }
 0x51b   :  { %v3023_v62 = vadd.f32 %v3022_v60, %v3021_v8  ;;  %v3030_v29 = vadd.f32 %v3029_v50, %v3028_v16  ;;  %v3018_v6 = vadd.f32 %v3017_v0, %v3016_v32  ;;  %v3046_v36 = vadd.f32 %v3045_v34, %v3044_v17  ;;  %v3265_v16 = vld [vmem:[%s5590_s3 + $0x1f0] sm:$0xff]  ;;  %v3250_v60 = vld [vmem:[%s5590_s3 + $0x178] sm:$0xff] }
 0x51c   :  { %v3037_v63 = vadd.f32 %v3036_v33, %v3035_v24  ;;  %v3066_v40 = vrot.slane %v3065_v28, 1  ;;  %v3053_v46 = vadd.f32 %v3052_v1, %v3051_v26  ;;  %v4039_v54 = vmov 1934713408  }
 0x51d   :  { %v3024_v18 = vrot.slane %v3023_v62, 1  ;;  %v3031_v35 = vrot.slane %v3030_v29, 1  ;;  %v3150_v47 = vunpack.c.l.s4 %v4039_v54  ;;  %v3077_v38 = vmul.f32 0.5, %v3018_v6 }
 0x51e   :  { %v3038_v23 = vrot.slane %v3037_v63, 1  ;;  %v3060_v51 = vadd.f32 %v3059_v37, %v3058_v42  ;;  %v3067_v5 = vadd.f32 %v3066_v40, %v3065_v28  ;;  %v3081_v56 = vmul.f32 0.5, %v3046_v36  ;;  %v3412_v37 = vld [vmem:[%s5591_s4] sm:$0xff]  ;;  %v3413_v40 = vld [vmem:[%s5591_s4 + $0x8] sm:$0xff] }
 0x51f   :  { %v3025_v25 = vadd.f32 %v3024_v18, %v3023_v62  ;;  %v3032_v43 = vadd.f32 %v3031_v35, %v3030_v29  ;;  %v3082_v59 = vmul.f32 0.5, %v3053_v46  ;;  %v3151_v61 = vunpack.c.0.s8 %v3150_v47 }
 0x520   :  { %v3039_v12 = vadd.f32 %v3038_v23, %v3037_v63  ;;  %v3083_v30 = vmul.f32 0.5, %v3060_v51  ;;  %v3084_v9 = vmul.f32 0.5, %v3067_v5  ;;  %v3117_v48 = vcombine.high %v5381_v13, %v4033_v45 }
 0x521   :  { %v3078_v39 = vmul.f32 0.5, %v3025_v25  ;;  %v3079_v31 = vmul.f32 0.5, %v3032_v43  ;;  %v3154_v4 = vsub.s32 %v3151_v61, %v4652_v15  ;;  %v3124_v55 = vrot.slane %v5381_v13, %v4662_v53  ;;  %v3266_v13 = vld [vmem:[%s5590_s3 + $0x1f8] sm:$0xff] }
 0x522   :  { %v3080_v44 = vmul.f32 0.5, %v3039_v12  ;;  %v3911_v22 = vpack.c.bf16 %v3234_v14, %v3233_v3  ;;  %v3131_v32 = vrot.slane %v3117_v48, %v4662_v53  ;;  %v3913_v8 = vpack.c.bf16 %v3218_v41, %v3217_v19  ;;  %v3423_v48 = vld [vmem:[%s5591_s4 + $0x58] sm:$0xff]  ;;  %v3426_v3 = vld [vmem:[%s5591_s4 + $0x70] sm:$0xff] }
 0x523   :  { %v3108_v49 = vsel %vm1754_vm6, %v3078_v39, %v3077_v38  ;;  %v3943_v0 = vpack.c.bf16 %v3266_v13, %v3265_v16  ;;  %v3945_v50 = vpack.c.bf16 %v3250_v60, %v3249_v58  ;;  %v4040_v29 = vmov 0.0|0.0   ;;  %v3414_v39 = vld [vmem:[%s5591_s4 + $0x10] sm:$0xff]  ;;  %v3427_v19 = vld [vmem:[%s5591_s4 + $0x78] sm:$0xff] }
 0x524   :  { %v3109_v57 = vsel %vm1756_vm7, %v3079_v31, %v3108_v49  ;;  %3912 = vmatprep.subr.bf16.mxu1 %v3911_v22  ;;  %v3948_v46 = vpack.c.bf16 %v3413_v40, %v3412_v37  ;;  %v3415_v31 = vld [vmem:[%s5591_s4 + $0x18] sm:$0xff]  ;;  %v3416_v49 = vld [vmem:[%s5591_s4 + $0x20] sm:$0xff] }
 0x525   :  { %v3110_v27 = vsel %vm1758_vm8, %v3080_v44, %v3109_v57  ;;  %3914 = vmatpush3.bf16.msra.mxu1 %v3913_v8  ;;  %3944 = vmatprep.subr.bf16.mxu0 %v3943_v0  ;;  %v3951_v44 = vpack.c.bf16 %v3415_v31, %v3414_v39  ;;  %v4001_v22 = vld [vmem:[%s5589_s2] sm:$0x1f] }
 0x526   :  { %v3111_v52 = vsel %vm1760_vm9, %v3081_v56, %v3110_v27  ;;  %3946 = vmatpush3.bf16.msra.mxu0 %v3945_v50  ;;  %3947 = vmatprep.subr.bf16.mxu1 %v4040_v29  ;;  %v3417_v56 = vld [vmem:[%s5591_s4 + $0x28] sm:$0xff]  ;;  %v3419_v27 = vld [vmem:[%s5591_s4 + $0x38] sm:$0xff] }
 0x527   :  { %v3112_v10 = vsel %vm1762_vm10, %v3082_v59, %v3111_v52  ;;  %v3954_v57 = vpack.c.bf16 %v3417_v56, %v3416_v49  ;;  %v3418_v59 = vld [vmem:[%s5591_s4 + $0x30] sm:$0xff]  ;;  %v3421_v52 = vld [vmem:[%s5591_s4 + $0x48] sm:$0xff] }
 0x528   :  { %v3113_v2 = vsel %vm1764_vm11, %v3083_v30, %v3112_v10  ;;  %v3957_v61 = vpack.c.bf16 %v3419_v27, %v3418_v59  ;;  %v3420_v30 = vld [vmem:[%s5591_s4 + $0x40] sm:$0xff]  ;;  %v3422_v10 = vld [vmem:[%s5591_s4 + $0x50] sm:$0xff] }
 0x529   :  { %v3114_v11 = vsel %vm1766_vm12, %v3084_v9, %v3113_v2  ;;  %v3960_v9 = vpack.c.bf16 %v3421_v52, %v3420_v30  ;;  %v3963_v2 = vpack.c.bf16 %v3423_v48, %v3422_v10 }
 0x52a   :  { %v3139_v20 = vrot.slane %v3114_v11, %v4662_v53  ;;  %v3132_v21 = vcombine.high %v3114_v11, %v4033_v45  ;;  %v3424_v11 = vld [vmem:[%s5591_s4 + $0x60] sm:$0xff] }
 0x52c   :  { %v3147_v17 = vcombine.low %v3124_v55, %v3139_v20  ;;  %v3148_v26 = vcombine.high %v3124_v55, %v3139_v20  ;;  %v3146_v7 = vrot.slane %v3132_v21, %v4662_v53  ;;  %v3969_v55 = vpack.c.bf16 %v3427_v19, %v3426_v3 }
 0x52d   :  { %v3269_v20 = vsub.s32 3, %v4652_v15 }
 0x52e   :  { %v3155_v24 = vrot.slane %v3147_v17, %v3154_v4  ;;  %v3162_v42 = vrot.slane %v3148_v26, %v3154_v4  ;;  %v3163_v28 = vcombine.low %v3131_v32, %v3146_v7  ;;  %v3164_v62 = vcombine.high %v3131_v32, %v3146_v7 }
 0x52f   :  { %v3270_v41 = vrot.slane %v4001_v22, %v3269_v20  ;;  %v3430_v7 = vsub.s32 4, %v4652_v15 }
 0x530   :  { %v3179_v33 = vcombine.high %v3155_v24, %v4033_v45  ;;  %v3180_v53 = vcombine.high %v3162_v42, %v4033_v45  ;;  %v3171_v34 = vrot.slane %v3163_v28, %v3154_v4  ;;  %v3178_v1 = vrot.slane %v3164_v62, %v3154_v4  ;;  %v3425_v4 = vld [vmem:[%s5591_s4 + $0x68] sm:$0xff]  ;;  %s4042_s4 = smov [#allocation4]  }
 0x531   :  { %v3966_v14 = vpack.c.bf16 %v3425_v4, %v3424_v11  ;;  %v3431_v0 = vrot.slane %v4001_v22, %v3430_v7  ;;  %s3510_s25 = sshll.u32 %s4042_s4, 4  ;;  %s3511_s25 = int_to_ptr.vmem [resolvable:$true] %s3510_s25 }
 0x532   :  { %v3988_v6 = vpack.i.bf16 %v3179_v33, %v3180_v53  ;;  %v3181_v18 = vcombine.high %v3171_v34, %v4033_v45  ;;  %v3182_v35 = vcombine.high %v3178_v1, %v4033_v45  ;;  %s4002_s2 = scalar_lea.vmem %s3511_s25, 32  ;;  %p4007_p1 = scmp.lt.s32.totalorder %s3511_s25, %s3511_s25 }
 0x533   :  { %p4003_p0 = scmp.ne.s32.totalorder %s3511_s25, %s4002_s2  ;;  %p4008_p2 = scmp.lt.s32.totalorder %s4002_s2, %s4002_s2 }
 0x534   :  { %3989 = vrot.lane.b32.xlu0 %v3988_v6, %s4038_s29  ;;  %v3993_v63 = vpack.i.bf16 %v3181_v18, %v3182_v35 }
 0x535   :  { %p4009_p3 = por %p4008_p2, %p4007_p1 }
 0x536   :  { %3994 = vrot.lane.b32.xlu1 %v3993_v63, %s4038_s29 }
 0x537   :  { %p4010_p4 = pnand %p4009_p3, %p4003_p0 }
 0x5a6   :  { %v3990_v25 = vpop.permute.xlu0 %3989 }
 0x5a7   :  { %v3992_v43 = vunpack.i.h.bf16 %v3990_v25  ;;  %v3991_v23 = vunpack.i.l.bf16 %v3990_v25 }
 0x5a8   :  { %v3995_v36 = vpop.permute.xlu1 %3994 }
 0x5a9   :  { %v3199_v54 = vsel %vm2058_vm4, %v3155_v24, %v3992_v43  ;;  %v3997_v47 = vunpack.i.h.bf16 %v3995_v36  ;;  %v3996_v12 = vunpack.i.l.bf16 %v3995_v36  ;;  %v3200_v38 = vsel %vm2058_vm4, %v3162_v42, %v3991_v23 }
 0x5aa   :  { %3335 = vmatprep.mubr.f32.mxu1 %v3200_v38 }
 0x5ab   :  { %v3201_v51 = vsel %vm2058_vm4, %v3171_v34, %v3997_v47  ;;  %3336 = vmatmul.mubr.f32.vlgmr.msra.gmra.mrb[8].mxu1 %v3199_v54  ;;  %v3202_v5 = vsel %vm2058_vm4, %v3178_v1, %v3996_v12 }
 0x5ac   :  { %3405 = vmatprep.mubr.f32.mxu0 %v3202_v5  ;;  %3949 = vmatpush3.bf16.msra.mxu1 %v3948_v46 }
 0x5ad   :  { %3406 = vmatmul.mubr.f32.vlgmr.msra.gmra.mrb[20].mxu0 %v3201_v51  ;;  %3950 = vmatprep.subr.bf16.mxu1 %v4040_v29 }
 0x5ae   :  { %3830 = vmatprep.mubr.msk.f32.mxu1 %vm4041_vm1, %v4033_v45 }
 0x5b0   :  { %3952 = vmatpush3.bf16.msra.mxu1 %v3951_v44 }
 0x5b1   :  { %3953 = vmatprep.subr.bf16.mxu1 %v4040_v29 }
 0x5b4   :  { %3955 = vmatpush3.bf16.msra.mxu1 %v3954_v57 }
 0x5b5   :  { %3956 = vmatprep.subr.bf16.mxu1 %v4040_v29 }
 0x5b8   :  { %3958 = vmatpush3.bf16.msra.mxu1 %v3957_v61 }
 0x5b9   :  { %3959 = vmatprep.subr.bf16.mxu1 %v4040_v29 }
 0x5bc   :  { %3961 = vmatpush3.bf16.msra.mxu1 %v3960_v9 }
 0x5bd   :  { %3962 = vmatprep.subr.bf16.mxu1 %v4040_v29 }
 0x5c0   :  { %3964 = vmatpush3.bf16.msra.mxu1 %v3963_v2 }
 0x5c1   :  { %3965 = vmatprep.subr.bf16.mxu1 %v4040_v29 }
 0x5c4   :  { %3967 = vmatpush3.bf16.msra.mxu1 %v3966_v14 }
 0x5c5   :  { %3968 = vmatprep.subr.bf16.mxu1 %v4040_v29 }
 0x5c8   :  { %3970 = vmatpush3.bf16.msra.mxu1 %v3969_v55 }
 0x67e   :  { %v3653_v21 = vpop.f32.mrb[8].mxu1 }
 0x67f   :  { %v3654_v32 = vpop.f32.mrb[9].mxu1 }
 0x680   :  { %v3655_v8 = vadd.f32 %v3654_v32, %v3653_v21  ;;  %v3688_v16 = vpop.f32.mrb[20].mxu0 }
 0x681   :  { %v3689_v13 = vpop.f32.mrb[21].mxu0 }
 0x682   :  { %v3338_v58 = vadd.f32 %v3655_v8, %v3270_v41  ;;  %v3690_v17 = vadd.f32 %v3689_v13, %v3688_v16 }
 0x684   :  { %v3408_v45 = vadd.f32 %v3690_v17, %v3338_v58 }
 0x686   :  { %v3411_v26 = vmax.f32 %v3408_v45, 0.0 }
 0x688   :  { %3831 = vmatmul.mubr.f32.vlgmr.msra.gmra.mrb[10].mxu1 %v3411_v26 }
 0x75b   :  { %v3498_v60 = vpop.f32.mrb[10].mxu1 }
 0x75c   :  { %v3499_v50 = vadd.f32 %v3498_v60, %v3431_v0  ;;  %v3832_v24 = vpop.f32.mrb[11].mxu1 }
 0x75e   :  { %3503 = vst.msk [vmem:[#allocation4] sm:$0x3] %vm3502_vm15, %v3499_v50 }
 0x75f   :  { %4013 = shalt.err (!%p4010_p4)
}
 0x760   :  { %s4014_s7 = scalar_lea.hbm %s5592_s5, 32 }
 0x761   :  { %p4015_p5 = scmp.ne.s32.totalorder %s5592_s5, %s4014_s7  ;;  %p4018_p6 = scmp.lt.u32.totalorder %s4014_s7, %s5592_s5 }
 0x763   :  { %p4020_p7 = pnand %p4018_p6, %p4015_p5 }
 0x765   :  { %4023 = shalt.err (!%p4020_p7)
}
 0x766   :  { %3513 = dma.vmem_to_hbm [thread:$0]  %s3511_s25, 32, %s5592_s5, [#allocation5]  }
 0x767   :  { %4024 = dma.done.wait [#allocation5], 32  }
 0x768   :  { %4025 = vsyncadd [#allocation5], 4294967264 }
 0x769   :  { %3517 = vsyncpa [#allocation5], 1 }

</bundles_post_ra>
